<compile_context>
chip_gen: v6e
topology: v6e:2x2x1
jax: 0.10.0
libtpu: 0.0.40
codegen_flags: <defaults>
</compile_context>

<pallas_src>
import functools

import jax
import jax.numpy as jnp
from jax.experimental import pallas as pl
from jax.experimental.pallas import tpu as pltpu

DIM = 32
NUM_HEADS = 4
HEAD_DIM = DIM // NUM_HEADS
HIDDEN = 2 * DIM
LN_EPS = 1e-5
NEG_BIG = -1e30          # finite "minus infinity" (avoids exp(-inf) / inf-inf NaN)
_SQRT1_2 = 0.7071067811865476
_LANES = 128             # packed-weight buffer lane width (one full vreg lane tile)


# ----------------------------- in-kernel math ------------------------------ #

def _layernorm(x, g, b):
    mu = jnp.mean(x, axis=-1, keepdims=True)
    var = jnp.mean(jnp.square(x - mu), axis=-1, keepdims=True)
    return (x - mu) * jax.lax.rsqrt(var + LN_EPS) * g + b


def _erf(x):
    # Abramowitz & Stegun 7.1.26 (|err| < 1.5e-7); only abs/exp/select -> always lowers.
    ax = jnp.abs(x)
    t = 1.0 / (1.0 + 0.3275911 * ax)
    poly = ((((1.061405429 * t - 1.453152027) * t + 1.421413741) * t
             - 0.284496736) * t + 0.254829592) * t
    y = 1.0 - poly * jnp.exp(-ax * ax)
    return jnp.where(x < 0.0, -y, y)


def _gelu_exact(x):
    # Matches torch.nn.GELU() default (erf form), not the tanh approximation.
    return 0.5 * x * (1.0 + _erf(x * _SQRT1_2))


def _dot(a, b):
    """MXU matmul with bf16 operands, f32 accumulation."""
    return jnp.dot(a.astype(jnp.bfloat16), b.astype(jnp.bfloat16),
                   preferred_element_type=jnp.float32)


def _dot_nt(a, b):
    """a (M, K) x b (N, K) -> (M, N), bf16 operands, f32 accumulation."""
    return jax.lax.dot_general(a.astype(jnp.bfloat16), b.astype(jnp.bfloat16),
                               (((1,), (1,)), ((), ())),
                               preferred_element_type=jnp.float32)


def _piece(w_ref, entries, name, c0=0, c1=None):
    """Static view into the packed weight buffer: rows [r0, r0+r), lanes [c0, c1)."""
    row, r, c = entries[name]
    if c1 is None:
        c1 = c
    return w_ref[row:row + r, c0:c1]


def _attn_block(x, src, bias, w_ref, entries, prefix, num_heads):
    """Residual(Attention): x + Attn(LN(x), k=v=(src or LN(x)), additive bias)."""
    d = x.shape[-1]
    dh = d // num_heads
    scale = dh ** -0.5

    ln = _piece(w_ref, entries, prefix + "/ln")                      # (2, D)
    xn = _layernorm(x, ln[0:1, :], ln[1:2, :])

    if src is None:
        # self-attention: one fused full-width QKV projection of the normed activations
        proj = (_dot(xn, _piece(w_ref, entries, prefix + "/wqkv"))
                + _piece(w_ref, entries, prefix + "/bqkv"))          # (N, 3D)
        q_all, k_all, v_all = proj[:, :d], proj[:, d:2 * d], proj[:, 2 * d:3 * d]
    else:
        # cross-attention: Q from LN(x), fused K|V projection from the raw source
        q_all = (_dot(xn, _piece(w_ref, entries, prefix + "/wqkv", 0, d))
                 + _piece(w_ref, entries, prefix + "/bqkv", 0, d))   # (Nq, D)
        kvp = (_dot(src, _piece(w_ref, entries, prefix + "/wqkv", d, 3 * d))
               + _piece(w_ref, entries, prefix + "/bqkv", d, 3 * d))  # (Nk, 2D)
        k_all, v_all = kvp[:, :d], kvp[:, d:]

    heads = []
    for h in range(num_heads):                    # static unroll; per-head lane slices
        lo, hi = h * dh, (h + 1) * dh
        qh = q_all[:, lo:hi] * scale
        kh = k_all[:, lo:hi]
        vh = v_all[:, lo:hi]
        s = _dot_nt(qh, kh)                       # (Nq, Nk) f32
        if bias is not None:
            s = s + bias
        p = jnp.exp(s - jnp.max(s, axis=-1, keepdims=True))
        p = p * pl.reciprocal(jnp.sum(p, axis=-1, keepdims=True), approx=True)
        heads.append(_dot(p, vh))                 # (Nq, dh)

    o = jnp.concatenate(heads, axis=-1)           # (Nq, D) — single full-width out matmul
    out = (_dot(o, _piece(w_ref, entries, prefix + "/wo"))
           + _piece(w_ref, entries, prefix + "/bo"))
    return x + out


def _dense_block(x, w_ref, entries, prefix):
    """Residual(Dense): x + W2 @ gelu(W1 @ LN(x))."""
    ln = _piece(w_ref, entries, prefix + "/ln")
    xn = _layernorm(x, ln[0:1, :], ln[1:2, :])
    h = _dot(xn, _piece(w_ref, entries, prefix + "/w1")) + _piece(w_ref, entries, prefix + "/b1")
    h = _gelu_exact(h)
    return x + _dot(h, _piece(w_ref, entries, prefix + "/w2")) + _piece(w_ref, entries, prefix + "/b2")


# ------------------------------- fused kernel ------------------------------- #

def _decoder_layer_kernel(*refs, entries, num_heads, masked, bidirectional):
    it = iter(refs)
    q_ref = next(it)                      # (bb, NQ, D)
    kv_ref = next(it)                     # (bb, NKV, D)
    mask_ref = next(it) if masked else None
    w_ref = next(it)                      # (rows, 128) packed weights
    q_out_ref = next(it)
    kv_out_ref = next(it) if bidirectional else None

    for b in range(q_ref.shape[0]):       # static loop over batch elems in this block
        x_q = q_ref[b]                    # (NQ, D)
        x_kv = kv_ref[b]                  # (NKV, D)

        if masked:
            m = mask_ref[b]               # (NQ, NKV), 1.0 == blocked
            # PyTorch fix-up: rows that block everything are un-blocked.
            full = jnp.sum(m, axis=-1, keepdims=True) >= (m.shape[-1] - 0.5)
            blocked = jnp.logical_and(m > 0.5, jnp.logical_not(full))
            bias = jnp.where(blocked, NEG_BIG, 0.0)
        else:
            bias = None

        # ----- q path: masked cross-attn -> self-attn -> dense -----
        x_q = _attn_block(x_q, x_kv, bias, w_ref, entries, "q_ca", num_heads)
        x_q = _attn_block(x_q, None, None, w_ref, entries, "q_sa", num_heads)
        x_q = _dense_block(x_q, w_ref, entries, "q_dense")
        q_out_ref[b] = x_q.astype(q_out_ref.dtype)

        # ----- kv path: reverse cross-attn (in-kernel transposed bias) -> dense -----
        if bidirectional:
            bias_t = None if bias is None else bias.T        # (NKV, NQ), XLU transpose
            x_kv = _attn_block(x_kv, x_q, bias_t, w_ref, entries, "kv_ca", num_heads)
            x_kv = _dense_block(x_kv, w_ref, entries, "kv_dense")
            kv_out_ref[b] = x_kv.astype(kv_out_ref.dtype)


# --------------------------- host-side weight packing ----------------------- #

def _pack_weights(params, bidirectional):
    """Pack every weight into one (rows, 128) f32 buffer; return buffer + static offsets."""
    pieces = []
    entries = {}
    row = 0

    def add(name, arr):
        nonlocal row
        arr = jnp.asarray(arr, jnp.float32)
        r, c = arr.shape
        assert c <= _LANES
        entries[name] = (row, r, c)
        r_pad = (-r) % 8                              # keep every piece sublane-aligned
        buf = jnp.zeros((r + r_pad, _LANES), jnp.float32).at[:r, :c].set(arr)
        pieces.append(buf)
        row += r + r_pad

    def add_attn(prefix, p):
        g, bln, wq, bq, wk, bk, wv, bv, wo, bo = p
        add(prefix + "/ln", jnp.concatenate([g, bln], axis=0))          # (2, D)
        add(prefix + "/wqkv", jnp.concatenate([wq, wk, wv], axis=1))    # (D, 3D)
        add(prefix + "/bqkv", jnp.concatenate([bq, bk, bv], axis=1))    # (1, 3D)
        add(prefix + "/wo", wo)                                         # (D, D)
        add(prefix + "/bo", bo)                                         # (1, D)

    def add_dense(prefix, p):
        g, bln, w1, b1, w2, b2 = p
        add(prefix + "/ln", jnp.concatenate([g, bln], axis=0))
        add(prefix + "/w1", w1)                                         # (D, 2D)
        add(prefix + "/b1", b1)
        add(prefix + "/w2", w2)                                         # (2D, D)
        add(prefix + "/b2", b2)

    add_attn("q_ca", params["q_ca"])
    add_attn("q_sa", params["q_sa"])
    add_dense("q_dense", params["q_dense"])
    if bidirectional:
        add_attn("kv_ca", params["kv_ca"])
        add_dense("kv_dense", params["kv_dense"])

    return jnp.concatenate(pieces, axis=0), entries


# --------------------------------- wrapper ---------------------------------- #

def maskformer_decoder_layer(q, kv, attn_mask, params, kv_mask=None, *,
                             mask_attention=True, bidirectional_ca=True,
                             num_heads=NUM_HEADS):
    """Mirrors MaskFormerDecoderLayer.forward as one fused Pallas kernel."""
    assert kv_mask is None, "KV mask is not yet supported"
    B, NQ, D = q.shape
    NKV = kv.shape[1]

    packed, entries = _pack_weights(params, bidirectional_ca)

    inputs = [q, kv]
    if mask_attention:
        assert attn_mask is not None, "attn mask must be provided for mask attention"
        inputs.append(attn_mask.astype(jnp.float32))      # True -> 1.0 (blocked)
    inputs.append(packed)

    # Batch tiling: single grid step (whole batch resident, static in-kernel loop) by
    # default — correct choice on single-TC v5e/v6e and for small shapes on v7x.  Only
    # split the batch across grid steps ("parallel" -> 2 TCs on v7x) when per-batch work
    # is large enough to amortise the cross-core split overhead.
    split_batch = B > 1 and (NQ * NKV * D >= (1 << 20))
    bb = 1 if split_batch else B
    grid = (B // bb,)
    semantics = ("parallel",) if split_batch else ("arbitrary",)

    def batched(rows, cols):
        return pl.BlockSpec((bb, rows, cols), lambda b: (b, 0, 0))

    in_specs = [batched(NQ, D), batched(NKV, D)]
    if mask_attention:
        in_specs.append(batched(NQ, NKV))
    in_specs.append(pl.BlockSpec(packed.shape, lambda b: (0, 0)))   # one resident weight DMA

    if bidirectional_ca:
        out_shape = (jax.ShapeDtypeStruct((B, NQ, D), q.dtype),
                     jax.ShapeDtypeStruct((B, NKV, D), kv.dtype))
        out_specs = (batched(NQ, D), batched(NKV, D))
    else:
        out_shape = jax.ShapeDtypeStruct((B, NQ, D), q.dtype)
        out_specs = batched(NQ, D)

    kernel = functools.partial(_decoder_layer_kernel, entries=entries,
                               num_heads=num_heads, masked=mask_attention,
                               bidirectional=bidirectional_ca)

    result = pl.pallas_call(
        kernel,
        out_shape=out_shape,
        grid=grid,
        in_specs=in_specs,
        out_specs=out_specs,
        compiler_params=pltpu.CompilerParams(dimension_semantics=semantics),
    )(*inputs)

    if bidirectional_ca:
        q_out, kv_out = result
        return q_out, kv_out
    return result, kv


# ---------------------------- parameter init -------------------------------- #

def _linear(key, din, dout):
    k1, k2 = jax.random.split(key)
    w = jax.random.normal(k1, (din, dout), jnp.float32) / jnp.sqrt(float(din))
    b = 0.01 * jax.random.normal(k2, (1, dout), jnp.float32)
    return w, b


def _attn_params(key, dim):
    ks = jax.random.split(key, 4)
    wq, bq = _linear(ks[0], dim, dim)
    wk, bk = _linear(ks[1], dim, dim)
    wv, bv = _linear(ks[2], dim, dim)
    wo, bo = _linear(ks[3], dim, dim)
    g = jnp.ones((1, dim), jnp.float32)
    bln = jnp.zeros((1, dim), jnp.float32)
    return (g, bln, wq, bq, wk, bk, wv, bv, wo, bo)


def _dense_params(key, dim, hidden):
    k1, k2 = jax.random.split(key)
    w1, b1 = _linear(k1, dim, hidden)
    w2, b2 = _linear(k2, hidden, dim)
    g = jnp.ones((1, dim), jnp.float32)
    bln = jnp.zeros((1, dim), jnp.float32)
    return (g, bln, w1, b1, w2, b2)


def init_params(key, dim=DIM, hidden=HIDDEN):
    ks = jax.random.split(key, 5)
    return {
        "q_ca": _attn_params(ks[0], dim),
        "q_sa": _attn_params(ks[1], dim),
        "q_dense": _dense_params(ks[2], dim, hidden),
        "kv_ca": _attn_params(ks[3], dim),
        "kv_dense": _dense_params(ks[4], dim, hidden),
    }


# --------------------------- pure-JAX f32 reference -------------------------- #

def _reference(q, kv, attn_mask, params, num_heads=NUM_HEADS):
    def ln(x, g, b):
        mu = x.mean(-1, keepdims=True)
        var = ((x - mu) ** 2).mean(-1, keepdims=True)
        return (x - mu) / jnp.sqrt(var + LN_EPS) * g + b

    def mha(xn, src, bias, p):
        _, _, wq, bq, wk, bk, wv, bv, wo, bo = p
        qp, kp, vp = xn @ wq + bq, src @ wk + bk, src @ wv + bv
        Bb, Nq, Dd = qp.shape
        dh = Dd // num_heads
        qp = qp.reshape(Bb, Nq, num_heads, dh).transpose(0, 2, 1, 3)
        kp = kp.reshape(Bb, -1, num_heads, dh).transpose(0, 2, 1, 3)
        vp = vp.reshape(Bb, -1, num_heads, dh).transpose(0, 2, 1, 3)
        s = jnp.einsum("bhqd,bhkd->bhqk", qp, kp) * dh ** -0.5
        if bias is not None:
            s = s + bias[:, None]
        pr = jax.nn.softmax(s, axis=-1)
        o = jnp.einsum("bhqk,bhkd->bhqd", pr, vp).transpose(0, 2, 1, 3).reshape(Bb, Nq, Dd)
        return o @ wo + bo

    def attn_res(x, src, bias, p, self_attn=False):
        xn = ln(x, p[0], p[1])
        return x + mha(xn, xn if self_attn else src, bias, p)

    def dense_res(x, p):
        g, bln, w1, b1, w2, b2 = p
        xn = ln(x, g, bln)
        return x + jax.nn.gelu(xn @ w1 + b1, approximate=False) @ w2 + b2

    m = attn_mask.astype(jnp.float32)
    row_full = m.sum(-1, keepdims=True) >= m.shape[-1] - 0.5
    bias = jnp.where((m > 0.5) & (~row_full), NEG_BIG, 0.0)
    q = attn_res(q, kv, bias, params["q_ca"])
    q = attn_res(q, None, None, params["q_sa"], self_attn=True)
    q = dense_res(q, params["q_dense"])
    kv = attn_res(kv, q, jnp.transpose(bias, (0, 2, 1)), params["kv_ca"])
    kv = dense_res(kv, params["kv_dense"])
    return q, kv


# --------------------------------- main ------------------------------------- #

if __name__ == "__main__":
    key = jax.random.PRNGKey(0)
    kq, kkv, kmask, kparams = jax.random.split(key, 4)

    B, NQ, NKV = 2, 8, 16
    q = jax.random.normal(kq, (B, NQ, DIM), jnp.float32)
    kv = jax.random.normal(kkv, (B, NKV, DIM), jnp.float32)

    # boolean attn mask, True = blocked; one fully-blocked query row exercises the
    # all-True -> all-False fix-up.
    attn_mask = jax.random.bernoulli(kmask, 0.3, (B, NQ, NKV))
    attn_mask = attn_mask.at[:, 0, :].set(True)

    params = init_params(kparams)

    fwd = jax.jit(functools.partial(maskformer_decoder_layer,
                                    mask_attention=True, bidirectional_ca=True))
    q_out, kv_out = fwd(q, kv, attn_mask, params)
    jax.block_until_ready((q_out, kv_out))

    assert q_out.shape == (B, NQ, DIM) and kv_out.shape == (B, NKV, DIM)
    assert bool(jnp.all(jnp.isfinite(q_out))) and bool(jnp.all(jnp.isfinite(kv_out)))

    # Loose tolerance vs. the f32 reference: bf16 matmul operands + approx EUP reciprocal
    # in the softmax + polynomial erf, compounded over five residual sub-blocks.
    q_ref, kv_ref = _reference(q, kv, attn_mask, params)
    err = max(float(jnp.max(jnp.abs(q_out - q_ref))),
              float(jnp.max(jnp.abs(kv_out - kv_ref))))
    assert err < 2e-1, f"mismatch vs pure-JAX reference: max abs err {err}"

    print("KERNEL_OK")
</pallas_src>

<mosaic_0001>
module attributes {stable_mosaic.version = 11 : i64} {
  func.func @_decoder_layer_kernel(%arg0: i32, %arg1: memref<2x8x32xf32, #tpu.memory_space<vmem>>, %arg2: memref<2x16x32xf32, #tpu.memory_space<vmem>>, %arg3: memref<2x8x16xf32, #tpu.memory_space<vmem>>, %arg4: memref<504x128xf32, #tpu.memory_space<vmem>>, %arg5: memref<2x8x32xf32, #tpu.memory_space<vmem>>, %arg6: memref<2x16x32xf32, #tpu.memory_space<vmem>>) attributes {dimension_semantics = [#tpu.dimension_semantics<arbitrary>], iteration_bounds = array<i64: 1>, scalar_prefetch = 0 : i64, scratch_operands = 0 : i64, tpu.core_type = #tpu.core_type<tc>, window_params = [{transform_indices = @transform_0, window_bounds = array<i64: 2, 8, 32>}, {transform_indices = @transform_1, window_bounds = array<i64: 2, 16, 32>}, {transform_indices = @transform_2, window_bounds = array<i64: 2, 8, 16>}, {pipeline_mode = #tpu.pipeline_mode<synchronous>, transform_indices = @transform_3, window_bounds = array<i64: 504, 128>}, {transform_indices = @transform_4, window_bounds = array<i64: 2, 8, 32>}, {transform_indices = @transform_5, window_bounds = array<i64: 2, 16, 32>}]} {
    %c0 = arith.constant 0 : index
    %c0_0 = arith.constant 0 : index
    %c0_1 = arith.constant 0 : index
    %0 = vector.load %arg1[%c0, %c0_0, %c0_1] : memref<2x8x32xf32, #tpu.memory_space<vmem>>, vector<1x8x32xf32>
    %1 = vector.shape_cast %0 : vector<1x8x32xf32> to vector<8x32xf32>
    %c0_2 = arith.constant 0 : index
    %c0_3 = arith.constant 0 : index
    %c0_4 = arith.constant 0 : index
    %2 = vector.load %arg2[%c0_2, %c0_3, %c0_4] : memref<2x16x32xf32, #tpu.memory_space<vmem>>, vector<1x16x32xf32>
    %3 = vector.shape_cast %2 : vector<1x16x32xf32> to vector<16x32xf32>
    %c0_5 = arith.constant 0 : index
    %c0_6 = arith.constant 0 : index
    %c0_7 = arith.constant 0 : index
    %4 = vector.load %arg3[%c0_5, %c0_6, %c0_7] : memref<2x8x16xf32, #tpu.memory_space<vmem>>, vector<1x8x16xf32>
    %5 = vector.shape_cast %4 : vector<1x8x16xf32> to vector<8x16xf32>
    %cst = arith.constant dense<0.000000e+00> : vector<8xf32>
    %6 = vector.multi_reduction <add>, %5, %cst [1] : vector<8x16xf32> to vector<8xf32>
    %7 = vector.shape_cast %6 : vector<8xf32> to vector<8x1xf32>
    %cst_8 = arith.constant 1.550000e+01 : f32
    %8 = vector.broadcast %cst_8 : f32 to vector<8x1xf32>
    %9 = arith.cmpf oge, %7, %8 : vector<8x1xf32>
    %cst_9 = arith.constant 5.000000e-01 : f32
    %10 = vector.broadcast %cst_9 : f32 to vector<8x16xf32>
    %11 = arith.cmpf ogt, %5, %10 : vector<8x16xf32>
    %cst_10 = arith.constant dense<true> : vector<8x1xi1>
    %12 = arith.xori %9, %cst_10 : vector<8x1xi1>
    %13 = vector.broadcast %12 : vector<8x1xi1> to vector<8x16xi1>
    %14 = arith.andi %11, %13 : vector<8x16xi1>
    %cst_11 = arith.constant -1.000000e+30 : f32
    %cst_12 = arith.constant 0.000000e+00 : f32
    %15 = vector.broadcast %cst_11 : f32 to vector<8x16xf32>
    %16 = vector.broadcast %cst_12 : f32 to vector<8x16xf32>
    %17 = arith.select %14, %15, %16 : vector<8x16xi1>, vector<8x16xf32>
    %c0_13 = arith.constant 0 : index
    %c0_14 = arith.constant 0 : index
    %18 = vector.load %arg4[%c0_13, %c0_14] : memref<504x128xf32, #tpu.memory_space<vmem>>, vector<2x32xf32>
    %19 = vector.extract_strided_slice %18 {offsets = [0, 0], sizes = [1, 32], strides = [1, 1]} : vector<2x32xf32> to vector<1x32xf32>
    %20 = vector.extract_strided_slice %18 {offsets = [1, 0], sizes = [1, 32], strides = [1, 1]} : vector<2x32xf32> to vector<1x32xf32>
    %cst_15 = arith.constant dense<0.000000e+00> : vector<8xf32>
    %21 = vector.multi_reduction <add>, %1, %cst_15 [1] : vector<8x32xf32> to vector<8xf32>
    %22 = vector.shape_cast %21 : vector<8xf32> to vector<8x1xf32>
    %cst_16 = arith.constant 3.200000e+01 : f32
    %23 = vector.broadcast %cst_16 : f32 to vector<8x1xf32>
    %24 = arith.divf %22, %23 : vector<8x1xf32>
    %25 = vector.broadcast %24 : vector<8x1xf32> to vector<8x32xf32>
    %26 = arith.subf %1, %25 : vector<8x32xf32>
    %27 = arith.mulf %26, %26 : vector<8x32xf32>
    %cst_17 = arith.constant dense<0.000000e+00> : vector<8xf32>
    %28 = vector.multi_reduction <add>, %27, %cst_17 [1] : vector<8x32xf32> to vector<8xf32>
    %29 = vector.shape_cast %28 : vector<8xf32> to vector<8x1xf32>
    %cst_18 = arith.constant 3.200000e+01 : f32
    %30 = vector.broadcast %cst_18 : f32 to vector<8x1xf32>
    %31 = arith.divf %29, %30 : vector<8x1xf32>
    %32 = vector.broadcast %24 : vector<8x1xf32> to vector<8x32xf32>
    %33 = arith.subf %1, %32 : vector<8x32xf32>
    %cst_19 = arith.constant 9.99999974E-6 : f32
    %34 = vector.broadcast %cst_19 : f32 to vector<8x1xf32>
    %35 = arith.addf %31, %34 : vector<8x1xf32>
    %36 = math.rsqrt %35 : vector<8x1xf32>
    %37 = vector.broadcast %36 : vector<8x1xf32> to vector<8x32xf32>
    %38 = arith.mulf %33, %37 : vector<8x32xf32>
    %39 = vector.broadcast %19 : vector<1x32xf32> to vector<8x32xf32>
    %40 = arith.mulf %38, %39 : vector<8x32xf32>
    %41 = vector.broadcast %20 : vector<1x32xf32> to vector<8x32xf32>
    %42 = arith.addf %40, %41 : vector<8x32xf32>
    %c8 = arith.constant 8 : index
    %c0_20 = arith.constant 0 : index
    %43 = vector.load %arg4[%c8, %c0_20] : memref<504x128xf32, #tpu.memory_space<vmem>>, vector<32x32xf32>
    %44 = arith.truncf %42 : vector<8x32xf32> to vector<8x32xbf16>
    %45 = arith.truncf %43 : vector<32x32xf32> to vector<32x32xbf16>
    %cst_21 = arith.constant dense<0.000000e+00> : vector<8x32xf32>
    %46 = tpu.matmul %44, %45, %cst_21 {dimension_numbers = #tpu.dot_dimension_numbers<[1], [0], [0], [1], [0, 0, 1, 1], [], []>} : vector<8x32xbf16>, vector<32x32xbf16>, vector<8x32xf32> -> vector<8x32xf32>
    %c40 = arith.constant 40 : index
    %c0_22 = arith.constant 0 : index
    %47 = vector.load %arg4[%c40, %c0_22] : memref<504x128xf32, #tpu.memory_space<vmem>>, vector<1x32xf32>
    %48 = vector.broadcast %47 : vector<1x32xf32> to vector<8x32xf32>
    %49 = arith.addf %46, %48 : vector<8x32xf32>
    %c8_23 = arith.constant 8 : index
    %c32 = arith.constant 32 : index
    %50 = vector.load %arg4[%c8_23, %c32] : memref<504x128xf32, #tpu.memory_space<vmem>>, vector<32x64xf32>
    %51 = arith.truncf %3 : vector<16x32xf32> to vector<16x32xbf16>
    %52 = arith.truncf %50 : vector<32x64xf32> to vector<32x64xbf16>
    %cst_24 = arith.constant dense<0.000000e+00> : vector<16x64xf32>
    %53 = tpu.matmul %51, %52, %cst_24 {dimension_numbers = #tpu.dot_dimension_numbers<[1], [0], [0], [1], [0, 0, 1, 1], [], []>} : vector<16x32xbf16>, vector<32x64xbf16>, vector<16x64xf32> -> vector<16x64xf32>
    %c40_25 = arith.constant 40 : index
    %c32_26 = arith.constant 32 : index
    %54 = vector.load %arg4[%c40_25, %c32_26] : memref<504x128xf32, #tpu.memory_space<vmem>>, vector<1x64xf32>
    %55 = vector.broadcast %54 : vector<1x64xf32> to vector<16x64xf32>
    %56 = arith.addf %53, %55 : vector<16x64xf32>
    %57 = vector.extract_strided_slice %56 {offsets = [0, 0], sizes = [16, 32], strides = [1, 1]} : vector<16x64xf32> to vector<16x32xf32>
    %58 = vector.extract_strided_slice %56 {offsets = [0, 32], sizes = [16, 32], strides = [1, 1]} : vector<16x64xf32> to vector<16x32xf32>
    %59 = vector.extract_strided_slice %49 {offsets = [0, 0], sizes = [8, 8], strides = [1, 1]} : vector<8x32xf32> to vector<8x8xf32>
    %cst_27 = arith.constant 0.353553385 : f32
    %60 = vector.broadcast %cst_27 : f32 to vector<8x8xf32>
    %61 = arith.mulf %59, %60 : vector<8x8xf32>
    %62 = vector.extract_strided_slice %57 {offsets = [0, 0], sizes = [16, 8], strides = [1, 1]} : vector<16x32xf32> to vector<16x8xf32>
    %63 = vector.extract_strided_slice %58 {offsets = [0, 0], sizes = [16, 8], strides = [1, 1]} : vector<16x32xf32> to vector<16x8xf32>
    %64 = arith.truncf %61 : vector<8x8xf32> to vector<8x8xbf16>
    %65 = arith.truncf %62 : vector<16x8xf32> to vector<16x8xbf16>
    %cst_28 = arith.constant dense<0.000000e+00> : vector<8x16xf32>
    %66 = tpu.matmul %64, %65, %cst_28 {dimension_numbers = #tpu.dot_dimension_numbers<[1], [1], [0], [0], [0, 0, 1, 0], [], []>} : vector<8x8xbf16>, vector<16x8xbf16>, vector<8x16xf32> -> vector<8x16xf32>
    %67 = arith.addf %66, %17 : vector<8x16xf32>
    %cst_29 = arith.constant dense<0xFF800000> : vector<8xf32>
    %68 = vector.multi_reduction <maximumf>, %67, %cst_29 [1] : vector<8x16xf32> to vector<8xf32>
    %69 = vector.shape_cast %68 : vector<8xf32> to vector<8x1xf32>
    %70 = vector.broadcast %69 : vector<8x1xf32> to vector<8x16xf32>
    %71 = arith.subf %67, %70 : vector<8x16xf32>
    %72 = math.exp %71 : vector<8x16xf32>
    %cst_30 = arith.constant dense<0.000000e+00> : vector<8xf32>
    %73 = vector.multi_reduction <add>, %72, %cst_30 [1] : vector<8x16xf32> to vector<8xf32>
    %74 = vector.shape_cast %73 : vector<8xf32> to vector<8x1xf32>
    %75 = tpu.reciprocal %74 {approx = true} : vector<8x1xf32> -> vector<8x1xf32>
    %76 = vector.broadcast %75 : vector<8x1xf32> to vector<8x16xf32>
    %77 = arith.mulf %72, %76 : vector<8x16xf32>
    %78 = arith.truncf %77 : vector<8x16xf32> to vector<8x16xbf16>
    %79 = arith.truncf %63 : vector<16x8xf32> to vector<16x8xbf16>
    %cst_31 = arith.constant dense<0.000000e+00> : vector<8x8xf32>
    %80 = tpu.matmul %78, %79, %cst_31 {dimension_numbers = #tpu.dot_dimension_numbers<[1], [0], [0], [1], [0, 0, 1, 1], [], []>} : vector<8x16xbf16>, vector<16x8xbf16>, vector<8x8xf32> -> vector<8x8xf32>
    %81 = vector.extract_strided_slice %49 {offsets = [0, 8], sizes = [8, 8], strides = [1, 1]} : vector<8x32xf32> to vector<8x8xf32>
    %cst_32 = arith.constant 0.353553385 : f32
    %82 = vector.broadcast %cst_32 : f32 to vector<8x8xf32>
    %83 = arith.mulf %81, %82 : vector<8x8xf32>
    %84 = vector.extract_strided_slice %57 {offsets = [0, 8], sizes = [16, 8], strides = [1, 1]} : vector<16x32xf32> to vector<16x8xf32>
    %85 = vector.extract_strided_slice %58 {offsets = [0, 8], sizes = [16, 8], strides = [1, 1]} : vector<16x32xf32> to vector<16x8xf32>
    %86 = arith.truncf %83 : vector<8x8xf32> to vector<8x8xbf16>
    %87 = arith.truncf %84 : vector<16x8xf32> to vector<16x8xbf16>
    %cst_33 = arith.constant dense<0.000000e+00> : vector<8x16xf32>
    %88 = tpu.matmul %86, %87, %cst_33 {dimension_numbers = #tpu.dot_dimension_numbers<[1], [1], [0], [0], [0, 0, 1, 0], [], []>} : vector<8x8xbf16>, vector<16x8xbf16>, vector<8x16xf32> -> vector<8x16xf32>
    %89 = arith.addf %88, %17 : vector<8x16xf32>
    %cst_34 = arith.constant dense<0xFF800000> : vector<8xf32>
    %90 = vector.multi_reduction <maximumf>, %89, %cst_34 [1] : vector<8x16xf32> to vector<8xf32>
    %91 = vector.shape_cast %90 : vector<8xf32> to vector<8x1xf32>
    %92 = vector.broadcast %91 : vector<8x1xf32> to vector<8x16xf32>
    %93 = arith.subf %89, %92 : vector<8x16xf32>
    %94 = math.exp %93 : vector<8x16xf32>
    %cst_35 = arith.constant dense<0.000000e+00> : vector<8xf32>
    %95 = vector.multi_reduction <add>, %94, %cst_35 [1] : vector<8x16xf32> to vector<8xf32>
    %96 = vector.shape_cast %95 : vector<8xf32> to vector<8x1xf32>
    %97 = tpu.reciprocal %96 {approx = true} : vector<8x1xf32> -> vector<8x1xf32>
    %98 = vector.broadcast %97 : vector<8x1xf32> to vector<8x16xf32>
    %99 = arith.mulf %94, %98 : vector<8x16xf32>
    %100 = arith.truncf %99 : vector<8x16xf32> to vector<8x16xbf16>
    %101 = arith.truncf %85 : vector<16x8xf32> to vector<16x8xbf16>
    %cst_36 = arith.constant dense<0.000000e+00> : vector<8x8xf32>
    %102 = tpu.matmul %100, %101, %cst_36 {dimension_numbers = #tpu.dot_dimension_numbers<[1], [0], [0], [1], [0, 0, 1, 1], [], []>} : vector<8x16xbf16>, vector<16x8xbf16>, vector<8x8xf32> -> vector<8x8xf32>
    %103 = vector.extract_strided_slice %49 {offsets = [0, 16], sizes = [8, 8], strides = [1, 1]} : vector<8x32xf32> to vector<8x8xf32>
    %cst_37 = arith.constant 0.353553385 : f32
    %104 = vector.broadcast %cst_37 : f32 to vector<8x8xf32>
    %105 = arith.mulf %103, %104 : vector<8x8xf32>
    %106 = vector.extract_strided_slice %57 {offsets = [0, 16], sizes = [16, 8], strides = [1, 1]} : vector<16x32xf32> to vector<16x8xf32>
    %107 = vector.extract_strided_slice %58 {offsets = [0, 16], sizes = [16, 8], strides = [1, 1]} : vector<16x32xf32> to vector<16x8xf32>
    %108 = arith.truncf %105 : vector<8x8xf32> to vector<8x8xbf16>
    %109 = arith.truncf %106 : vector<16x8xf32> to vector<16x8xbf16>
    %cst_38 = arith.constant dense<0.000000e+00> : vector<8x16xf32>
    %110 = tpu.matmul %108, %109, %cst_38 {dimension_numbers = #tpu.dot_dimension_numbers<[1], [1], [0], [0], [0, 0, 1, 0], [], []>} : vector<8x8xbf16>, vector<16x8xbf16>, vector<8x16xf32> -> vector<8x16xf32>
    %111 = arith.addf %110, %17 : vector<8x16xf32>
    %cst_39 = arith.constant dense<0xFF800000> : vector<8xf32>
    %112 = vector.multi_reduction <maximumf>, %111, %cst_39 [1] : vector<8x16xf32> to vector<8xf32>
    %113 = vector.shape_cast %112 : vector<8xf32> to vector<8x1xf32>
    %114 = vector.broadcast %113 : vector<8x1xf32> to vector<8x16xf32>
    %115 = arith.subf %111, %114 : vector<8x16xf32>
    %116 = math.exp %115 : vector<8x16xf32>
    %cst_40 = arith.constant dense<0.000000e+00> : vector<8xf32>
    %117 = vector.multi_reduction <add>, %116, %cst_40 [1] : vector<8x16xf32> to vector<8xf32>
    %118 = vector.shape_cast %117 : vector<8xf32> to vector<8x1xf32>
    %119 = tpu.reciprocal %118 {approx = true} : vector<8x1xf32> -> vector<8x1xf32>
    %120 = vector.broadcast %119 : vector<8x1xf32> to vector<8x16xf32>
    %121 = arith.mulf %116, %120 : vector<8x16xf32>
    %122 = arith.truncf %121 : vector<8x16xf32> to vector<8x16xbf16>
    %123 = arith.truncf %107 : vector<16x8xf32> to vector<16x8xbf16>
    %cst_41 = arith.constant dense<0.000000e+00> : vector<8x8xf32>
    %124 = tpu.matmul %122, %123, %cst_41 {dimension_numbers = #tpu.dot_dimension_numbers<[1], [0], [0], [1], [0, 0, 1, 1], [], []>} : vector<8x16xbf16>, vector<16x8xbf16>, vector<8x8xf32> -> vector<8x8xf32>
    %125 = vector.extract_strided_slice %49 {offsets = [0, 24], sizes = [8, 8], strides = [1, 1]} : vector<8x32xf32> to vector<8x8xf32>
    %cst_42 = arith.constant 0.353553385 : f32
    %126 = vector.broadcast %cst_42 : f32 to vector<8x8xf32>
    %127 = arith.mulf %125, %126 : vector<8x8xf32>
    %128 = vector.extract_strided_slice %57 {offsets = [0, 24], sizes = [16, 8], strides = [1, 1]} : vector<16x32xf32> to vector<16x8xf32>
    %129 = vector.extract_strided_slice %58 {offsets = [0, 24], sizes = [16, 8], strides = [1, 1]} : vector<16x32xf32> to vector<16x8xf32>
    %130 = arith.truncf %127 : vector<8x8xf32> to vector<8x8xbf16>
    %131 = arith.truncf %128 : vector<16x8xf32> to vector<16x8xbf16>
    %cst_43 = arith.constant dense<0.000000e+00> : vector<8x16xf32>
    %132 = tpu.matmul %130, %131, %cst_43 {dimension_numbers = #tpu.dot_dimension_numbers<[1], [1], [0], [0], [0, 0, 1, 0], [], []>} : vector<8x8xbf16>, vector<16x8xbf16>, vector<8x16xf32> -> vector<8x16xf32>
    %133 = arith.addf %132, %17 : vector<8x16xf32>
    %cst_44 = arith.constant dense<0xFF800000> : vector<8xf32>
    %134 = vector.multi_reduction <maximumf>, %133, %cst_44 [1] : vector<8x16xf32> to vector<8xf32>
    %135 = vector.shape_cast %134 : vector<8xf32> to vector<8x1xf32>
    %136 = vector.broadcast %135 : vector<8x1xf32> to vector<8x16xf32>
    %137 = arith.subf %133, %136 : vector<8x16xf32>
    %138 = math.exp %137 : vector<8x16xf32>
    %cst_45 = arith.constant dense<0.000000e+00> : vector<8xf32>
    %139 = vector.multi_reduction <add>, %138, %cst_45 [1] : vector<8x16xf32> to vector<8xf32>
    %140 = vector.shape_cast %139 : vector<8xf32> to vector<8x1xf32>
    %141 = tpu.reciprocal %140 {approx = true} : vector<8x1xf32> -> vector<8x1xf32>
    %142 = vector.broadcast %141 : vector<8x1xf32> to vector<8x16xf32>
    %143 = arith.mulf %138, %142 : vector<8x16xf32>
    %144 = arith.truncf %143 : vector<8x16xf32> to vector<8x16xbf16>
    %145 = arith.truncf %129 : vector<16x8xf32> to vector<16x8xbf16>
    %cst_46 = arith.constant dense<0.000000e+00> : vector<8x8xf32>
    %146 = tpu.matmul %144, %145, %cst_46 {dimension_numbers = #tpu.dot_dimension_numbers<[1], [0], [0], [1], [0, 0, 1, 1], [], []>} : vector<8x16xbf16>, vector<16x8xbf16>, vector<8x8xf32> -> vector<8x8xf32>
    %147 = tpu.concatenate %80, %102, %124, %146 in 1 : vector<8x8xf32>, vector<8x8xf32>, vector<8x8xf32>, vector<8x8xf32> -> vector<8x32xf32>
    %c48 = arith.constant 48 : index
    %c0_47 = arith.constant 0 : index
    %148 = vector.load %arg4[%c48, %c0_47] : memref<504x128xf32, #tpu.memory_space<vmem>>, vector<32x32xf32>
    %149 = arith.truncf %147 : vector<8x32xf32> to vector<8x32xbf16>
    %150 = arith.truncf %148 : vector<32x32xf32> to vector<32x32xbf16>
    %cst_48 = arith.constant dense<0.000000e+00> : vector<8x32xf32>
    %151 = tpu.matmul %149, %150, %cst_48 {dimension_numbers = #tpu.dot_dimension_numbers<[1], [0], [0], [1], [0, 0, 1, 1], [], []>} : vector<8x32xbf16>, vector<32x32xbf16>, vector<8x32xf32> -> vector<8x32xf32>
    %c80 = arith.constant 80 : index
    %c0_49 = arith.constant 0 : index
    %152 = vector.load %arg4[%c80, %c0_49] : memref<504x128xf32, #tpu.memory_space<vmem>>, vector<1x32xf32>
    %153 = vector.broadcast %152 : vector<1x32xf32> to vector<8x32xf32>
    %154 = arith.addf %151, %153 : vector<8x32xf32>
    %155 = arith.addf %1, %154 : vector<8x32xf32>
    %c88 = arith.constant 88 : index
    %c0_50 = arith.constant 0 : index
    %156 = vector.load %arg4[%c88, %c0_50] : memref<504x128xf32, #tpu.memory_space<vmem>>, vector<2x32xf32>
    %157 = vector.extract_strided_slice %156 {offsets = [0, 0], sizes = [1, 32], strides = [1, 1]} : vector<2x32xf32> to vector<1x32xf32>
    %158 = vector.extract_strided_slice %156 {offsets = [1, 0], sizes = [1, 32], strides = [1, 1]} : vector<2x32xf32> to vector<1x32xf32>
    %cst_51 = arith.constant dense<0.000000e+00> : vector<8xf32>
    %159 = vector.multi_reduction <add>, %155, %cst_51 [1] : vector<8x32xf32> to vector<8xf32>
    %160 = vector.shape_cast %159 : vector<8xf32> to vector<8x1xf32>
    %cst_52 = arith.constant 3.200000e+01 : f32
    %161 = vector.broadcast %cst_52 : f32 to vector<8x1xf32>
    %162 = arith.divf %160, %161 : vector<8x1xf32>
    %163 = vector.broadcast %162 : vector<8x1xf32> to vector<8x32xf32>
    %164 = arith.subf %155, %163 : vector<8x32xf32>
    %165 = arith.mulf %164, %164 : vector<8x32xf32>
    %cst_53 = arith.constant dense<0.000000e+00> : vector<8xf32>
    %166 = vector.multi_reduction <add>, %165, %cst_53 [1] : vector<8x32xf32> to vector<8xf32>
    %167 = vector.shape_cast %166 : vector<8xf32> to vector<8x1xf32>
    %cst_54 = arith.constant 3.200000e+01 : f32
    %168 = vector.broadcast %cst_54 : f32 to vector<8x1xf32>
    %169 = arith.divf %167, %168 : vector<8x1xf32>
    %170 = vector.broadcast %162 : vector<8x1xf32> to vector<8x32xf32>
    %171 = arith.subf %155, %170 : vector<8x32xf32>
    %cst_55 = arith.constant 9.99999974E-6 : f32
    %172 = vector.broadcast %cst_55 : f32 to vector<8x1xf32>
    %173 = arith.addf %169, %172 : vector<8x1xf32>
    %174 = math.rsqrt %173 : vector<8x1xf32>
    %175 = vector.broadcast %174 : vector<8x1xf32> to vector<8x32xf32>
    %176 = arith.mulf %171, %175 : vector<8x32xf32>
    %177 = vector.broadcast %157 : vector<1x32xf32> to vector<8x32xf32>
    %178 = arith.mulf %176, %177 : vector<8x32xf32>
    %179 = vector.broadcast %158 : vector<1x32xf32> to vector<8x32xf32>
    %180 = arith.addf %178, %179 : vector<8x32xf32>
    %c96 = arith.constant 96 : index
    %c0_56 = arith.constant 0 : index
    %181 = vector.load %arg4[%c96, %c0_56] : memref<504x128xf32, #tpu.memory_space<vmem>>, vector<32x96xf32>
    %182 = arith.truncf %180 : vector<8x32xf32> to vector<8x32xbf16>
    %183 = arith.truncf %181 : vector<32x96xf32> to vector<32x96xbf16>
    %cst_57 = arith.constant dense<0.000000e+00> : vector<8x96xf32>
    %184 = tpu.matmul %182, %183, %cst_57 {dimension_numbers = #tpu.dot_dimension_numbers<[1], [0], [0], [1], [0, 0, 1, 1], [], []>} : vector<8x32xbf16>, vector<32x96xbf16>, vector<8x96xf32> -> vector<8x96xf32>
    %c128 = arith.constant 128 : index
    %c0_58 = arith.constant 0 : index
    %185 = vector.load %arg4[%c128, %c0_58] : memref<504x128xf32, #tpu.memory_space<vmem>>, vector<1x96xf32>
    %186 = vector.broadcast %185 : vector<1x96xf32> to vector<8x96xf32>
    %187 = arith.addf %184, %186 : vector<8x96xf32>
    %188 = vector.extract_strided_slice %187 {offsets = [0, 0], sizes = [8, 32], strides = [1, 1]} : vector<8x96xf32> to vector<8x32xf32>
    %189 = vector.extract_strided_slice %187 {offsets = [0, 32], sizes = [8, 32], strides = [1, 1]} : vector<8x96xf32> to vector<8x32xf32>
    %190 = vector.extract_strided_slice %187 {offsets = [0, 64], sizes = [8, 32], strides = [1, 1]} : vector<8x96xf32> to vector<8x32xf32>
    %191 = vector.extract_strided_slice %188 {offsets = [0, 0], sizes = [8, 8], strides = [1, 1]} : vector<8x32xf32> to vector<8x8xf32>
    %cst_59 = arith.constant 0.353553385 : f32
    %192 = vector.broadcast %cst_59 : f32 to vector<8x8xf32>
    %193 = arith.mulf %191, %192 : vector<8x8xf32>
    %194 = vector.extract_strided_slice %189 {offsets = [0, 0], sizes = [8, 8], strides = [1, 1]} : vector<8x32xf32> to vector<8x8xf32>
    %195 = vector.extract_strided_slice %190 {offsets = [0, 0], sizes = [8, 8], strides = [1, 1]} : vector<8x32xf32> to vector<8x8xf32>
    %196 = arith.truncf %193 : vector<8x8xf32> to vector<8x8xbf16>
    %197 = arith.truncf %194 : vector<8x8xf32> to vector<8x8xbf16>
    %cst_60 = arith.constant dense<0.000000e+00> : vector<8x8xf32>
    %198 = tpu.matmul %196, %197, %cst_60 {dimension_numbers = #tpu.dot_dimension_numbers<[1], [1], [0], [0], [0, 0, 1, 0], [], []>} : vector<8x8xbf16>, vector<8x8xbf16>, vector<8x8xf32> -> vector<8x8xf32>
    %cst_61 = arith.constant dense<0xFF800000> : vector<8xf32>
    %199 = vector.multi_reduction <maximumf>, %198, %cst_61 [1] : vector<8x8xf32> to vector<8xf32>
    %200 = vector.shape_cast %199 : vector<8xf32> to vector<8x1xf32>
    %201 = vector.broadcast %200 : vector<8x1xf32> to vector<8x8xf32>
    %202 = arith.subf %198, %201 : vector<8x8xf32>
    %203 = math.exp %202 : vector<8x8xf32>
    %cst_62 = arith.constant dense<0.000000e+00> : vector<8xf32>
    %204 = vector.multi_reduction <add>, %203, %cst_62 [1] : vector<8x8xf32> to vector<8xf32>
    %205 = vector.shape_cast %204 : vector<8xf32> to vector<8x1xf32>
    %206 = tpu.reciprocal %205 {approx = true} : vector<8x1xf32> -> vector<8x1xf32>
    %207 = vector.broadcast %206 : vector<8x1xf32> to vector<8x8xf32>
    %208 = arith.mulf %203, %207 : vector<8x8xf32>
    %209 = arith.truncf %208 : vector<8x8xf32> to vector<8x8xbf16>
    %210 = arith.truncf %195 : vector<8x8xf32> to vector<8x8xbf16>
    %cst_63 = arith.constant dense<0.000000e+00> : vector<8x8xf32>
    %211 = tpu.matmul %209, %210, %cst_63 {dimension_numbers = #tpu.dot_dimension_numbers<[1], [0], [0], [1], [0, 0, 1, 1], [], []>} : vector<8x8xbf16>, vector<8x8xbf16>, vector<8x8xf32> -> vector<8x8xf32>
    %212 = vector.extract_strided_slice %188 {offsets = [0, 8], sizes = [8, 8], strides = [1, 1]} : vector<8x32xf32> to vector<8x8xf32>
    %cst_64 = arith.constant 0.353553385 : f32
    %213 = vector.broadcast %cst_64 : f32 to vector<8x8xf32>
    %214 = arith.mulf %212, %213 : vector<8x8xf32>
    %215 = vector.extract_strided_slice %189 {offsets = [0, 8], sizes = [8, 8], strides = [1, 1]} : vector<8x32xf32> to vector<8x8xf32>
    %216 = vector.extract_strided_slice %190 {offsets = [0, 8], sizes = [8, 8], strides = [1, 1]} : vector<8x32xf32> to vector<8x8xf32>
    %217 = arith.truncf %214 : vector<8x8xf32> to vector<8x8xbf16>
    %218 = arith.truncf %215 : vector<8x8xf32> to vector<8x8xbf16>
    %cst_65 = arith.constant dense<0.000000e+00> : vector<8x8xf32>
    %219 = tpu.matmul %217, %218, %cst_65 {dimension_numbers = #tpu.dot_dimension_numbers<[1], [1], [0], [0], [0, 0, 1, 0], [], []>} : vector<8x8xbf16>, vector<8x8xbf16>, vector<8x8xf32> -> vector<8x8xf32>
    %cst_66 = arith.constant dense<0xFF800000> : vector<8xf32>
    %220 = vector.multi_reduction <maximumf>, %219, %cst_66 [1] : vector<8x8xf32> to vector<8xf32>
    %221 = vector.shape_cast %220 : vector<8xf32> to vector<8x1xf32>
    %222 = vector.broadcast %221 : vector<8x1xf32> to vector<8x8xf32>
    %223 = arith.subf %219, %222 : vector<8x8xf32>
    %224 = math.exp %223 : vector<8x8xf32>
    %cst_67 = arith.constant dense<0.000000e+00> : vector<8xf32>
    %225 = vector.multi_reduction <add>, %224, %cst_67 [1] : vector<8x8xf32> to vector<8xf32>
    %226 = vector.shape_cast %225 : vector<8xf32> to vector<8x1xf32>
    %227 = tpu.reciprocal %226 {approx = true} : vector<8x1xf32> -> vector<8x1xf32>
    %228 = vector.broadcast %227 : vector<8x1xf32> to vector<8x8xf32>
    %229 = arith.mulf %224, %228 : vector<8x8xf32>
    %230 = arith.truncf %229 : vector<8x8xf32> to vector<8x8xbf16>
    %231 = arith.truncf %216 : vector<8x8xf32> to vector<8x8xbf16>
    %cst_68 = arith.constant dense<0.000000e+00> : vector<8x8xf32>
    %232 = tpu.matmul %230, %231, %cst_68 {dimension_numbers = #tpu.dot_dimension_numbers<[1], [0], [0], [1], [0, 0, 1, 1], [], []>} : vector<8x8xbf16>, vector<8x8xbf16>, vector<8x8xf32> -> vector<8x8xf32>
    %233 = vector.extract_strided_slice %188 {offsets = [0, 16], sizes = [8, 8], strides = [1, 1]} : vector<8x32xf32> to vector<8x8xf32>
    %cst_69 = arith.constant 0.353553385 : f32
    %234 = vector.broadcast %cst_69 : f32 to vector<8x8xf32>
    %235 = arith.mulf %233, %234 : vector<8x8xf32>
    %236 = vector.extract_strided_slice %189 {offsets = [0, 16], sizes = [8, 8], strides = [1, 1]} : vector<8x32xf32> to vector<8x8xf32>
    %237 = vector.extract_strided_slice %190 {offsets = [0, 16], sizes = [8, 8], strides = [1, 1]} : vector<8x32xf32> to vector<8x8xf32>
    %238 = arith.truncf %235 : vector<8x8xf32> to vector<8x8xbf16>
    %239 = arith.truncf %236 : vector<8x8xf32> to vector<8x8xbf16>
    %cst_70 = arith.constant dense<0.000000e+00> : vector<8x8xf32>
    %240 = tpu.matmul %238, %239, %cst_70 {dimension_numbers = #tpu.dot_dimension_numbers<[1], [1], [0], [0], [0, 0, 1, 0], [], []>} : vector<8x8xbf16>, vector<8x8xbf16>, vector<8x8xf32> -> vector<8x8xf32>
    %cst_71 = arith.constant dense<0xFF800000> : vector<8xf32>
    %241 = vector.multi_reduction <maximumf>, %240, %cst_71 [1] : vector<8x8xf32> to vector<8xf32>
    %242 = vector.shape_cast %241 : vector<8xf32> to vector<8x1xf32>
    %243 = vector.broadcast %242 : vector<8x1xf32> to vector<8x8xf32>
    %244 = arith.subf %240, %243 : vector<8x8xf32>
    %245 = math.exp %244 : vector<8x8xf32>
    %cst_72 = arith.constant dense<0.000000e+00> : vector<8xf32>
    %246 = vector.multi_reduction <add>, %245, %cst_72 [1] : vector<8x8xf32> to vector<8xf32>
    %247 = vector.shape_cast %246 : vector<8xf32> to vector<8x1xf32>
    %248 = tpu.reciprocal %247 {approx = true} : vector<8x1xf32> -> vector<8x1xf32>
    %249 = vector.broadcast %248 : vector<8x1xf32> to vector<8x8xf32>
    %250 = arith.mulf %245, %249 : vector<8x8xf32>
    %251 = arith.truncf %250 : vector<8x8xf32> to vector<8x8xbf16>
    %252 = arith.truncf %237 : vector<8x8xf32> to vector<8x8xbf16>
    %cst_73 = arith.constant dense<0.000000e+00> : vector<8x8xf32>
    %253 = tpu.matmul %251, %252, %cst_73 {dimension_numbers = #tpu.dot_dimension_numbers<[1], [0], [0], [1], [0, 0, 1, 1], [], []>} : vector<8x8xbf16>, vector<8x8xbf16>, vector<8x8xf32> -> vector<8x8xf32>
    %254 = vector.extract_strided_slice %188 {offsets = [0, 24], sizes = [8, 8], strides = [1, 1]} : vector<8x32xf32> to vector<8x8xf32>
    %cst_74 = arith.constant 0.353553385 : f32
    %255 = vector.broadcast %cst_74 : f32 to vector<8x8xf32>
    %256 = arith.mulf %254, %255 : vector<8x8xf32>
    %257 = vector.extract_strided_slice %189 {offsets = [0, 24], sizes = [8, 8], strides = [1, 1]} : vector<8x32xf32> to vector<8x8xf32>
    %258 = vector.extract_strided_slice %190 {offsets = [0, 24], sizes = [8, 8], strides = [1, 1]} : vector<8x32xf32> to vector<8x8xf32>
    %259 = arith.truncf %256 : vector<8x8xf32> to vector<8x8xbf16>
    %260 = arith.truncf %257 : vector<8x8xf32> to vector<8x8xbf16>
    %cst_75 = arith.constant dense<0.000000e+00> : vector<8x8xf32>
    %261 = tpu.matmul %259, %260, %cst_75 {dimension_numbers = #tpu.dot_dimension_numbers<[1], [1], [0], [0], [0, 0, 1, 0], [], []>} : vector<8x8xbf16>, vector<8x8xbf16>, vector<8x8xf32> -> vector<8x8xf32>
    %cst_76 = arith.constant dense<0xFF800000> : vector<8xf32>
    %262 = vector.multi_reduction <maximumf>, %261, %cst_76 [1] : vector<8x8xf32> to vector<8xf32>
    %263 = vector.shape_cast %262 : vector<8xf32> to vector<8x1xf32>
    %264 = vector.broadcast %263 : vector<8x1xf32> to vector<8x8xf32>
    %265 = arith.subf %261, %264 : vector<8x8xf32>
    %266 = math.exp %265 : vector<8x8xf32>
    %cst_77 = arith.constant dense<0.000000e+00> : vector<8xf32>
    %267 = vector.multi_reduction <add>, %266, %cst_77 [1] : vector<8x8xf32> to vector<8xf32>
    %268 = vector.shape_cast %267 : vector<8xf32> to vector<8x1xf32>
    %269 = tpu.reciprocal %268 {approx = true} : vector<8x1xf32> -> vector<8x1xf32>
    %270 = vector.broadcast %269 : vector<8x1xf32> to vector<8x8xf32>
    %271 = arith.mulf %266, %270 : vector<8x8xf32>
    %272 = arith.truncf %271 : vector<8x8xf32> to vector<8x8xbf16>
    %273 = arith.truncf %258 : vector<8x8xf32> to vector<8x8xbf16>
    %cst_78 = arith.constant dense<0.000000e+00> : vector<8x8xf32>
    %274 = tpu.matmul %272, %273, %cst_78 {dimension_numbers = #tpu.dot_dimension_numbers<[1], [0], [0], [1], [0, 0, 1, 1], [], []>} : vector<8x8xbf16>, vector<8x8xbf16>, vector<8x8xf32> -> vector<8x8xf32>
    %275 = tpu.concatenate %211, %232, %253, %274 in 1 : vector<8x8xf32>, vector<8x8xf32>, vector<8x8xf32>, vector<8x8xf32> -> vector<8x32xf32>
    %c136 = arith.constant 136 : index
    %c0_79 = arith.constant 0 : index
    %276 = vector.load %arg4[%c136, %c0_79] : memref<504x128xf32, #tpu.memory_space<vmem>>, vector<32x32xf32>
    %277 = arith.truncf %275 : vector<8x32xf32> to vector<8x32xbf16>
    %278 = arith.truncf %276 : vector<32x32xf32> to vector<32x32xbf16>
    %cst_80 = arith.constant dense<0.000000e+00> : vector<8x32xf32>
    %279 = tpu.matmul %277, %278, %cst_80 {dimension_numbers = #tpu.dot_dimension_numbers<[1], [0], [0], [1], [0, 0, 1, 1], [], []>} : vector<8x32xbf16>, vector<32x32xbf16>, vector<8x32xf32> -> vector<8x32xf32>
    %c168 = arith.constant 168 : index
    %c0_81 = arith.constant 0 : index
    %280 = vector.load %arg4[%c168, %c0_81] : memref<504x128xf32, #tpu.memory_space<vmem>>, vector<1x32xf32>
    %281 = vector.broadcast %280 : vector<1x32xf32> to vector<8x32xf32>
    %282 = arith.addf %279, %281 : vector<8x32xf32>
    %283 = arith.addf %155, %282 : vector<8x32xf32>
    %c176 = arith.constant 176 : index
    %c0_82 = arith.constant 0 : index
    %284 = vector.load %arg4[%c176, %c0_82] : memref<504x128xf32, #tpu.memory_space<vmem>>, vector<2x32xf32>
    %285 = vector.extract_strided_slice %284 {offsets = [0, 0], sizes = [1, 32], strides = [1, 1]} : vector<2x32xf32> to vector<1x32xf32>
    %286 = vector.extract_strided_slice %284 {offsets = [1, 0], sizes = [1, 32], strides = [1, 1]} : vector<2x32xf32> to vector<1x32xf32>
    %cst_83 = arith.constant dense<0.000000e+00> : vector<8xf32>
    %287 = vector.multi_reduction <add>, %283, %cst_83 [1] : vector<8x32xf32> to vector<8xf32>
    %288 = vector.shape_cast %287 : vector<8xf32> to vector<8x1xf32>
    %cst_84 = arith.constant 3.200000e+01 : f32
    %289 = vector.broadcast %cst_84 : f32 to vector<8x1xf32>
    %290 = arith.divf %288, %289 : vector<8x1xf32>
    %291 = vector.broadcast %290 : vector<8x1xf32> to vector<8x32xf32>
    %292 = arith.subf %283, %291 : vector<8x32xf32>
    %293 = arith.mulf %292, %292 : vector<8x32xf32>
    %cst_85 = arith.constant dense<0.000000e+00> : vector<8xf32>
    %294 = vector.multi_reduction <add>, %293, %cst_85 [1] : vector<8x32xf32> to vector<8xf32>
    %295 = vector.shape_cast %294 : vector<8xf32> to vector<8x1xf32>
    %cst_86 = arith.constant 3.200000e+01 : f32
    %296 = vector.broadcast %cst_86 : f32 to vector<8x1xf32>
    %297 = arith.divf %295, %296 : vector<8x1xf32>
    %298 = vector.broadcast %290 : vector<8x1xf32> to vector<8x32xf32>
    %299 = arith.subf %283, %298 : vector<8x32xf32>
    %cst_87 = arith.constant 9.99999974E-6 : f32
    %300 = vector.broadcast %cst_87 : f32 to vector<8x1xf32>
    %301 = arith.addf %297, %300 : vector<8x1xf32>
    %302 = math.rsqrt %301 : vector<8x1xf32>
    %303 = vector.broadcast %302 : vector<8x1xf32> to vector<8x32xf32>
    %304 = arith.mulf %299, %303 : vector<8x32xf32>
    %305 = vector.broadcast %285 : vector<1x32xf32> to vector<8x32xf32>
    %306 = arith.mulf %304, %305 : vector<8x32xf32>
    %307 = vector.broadcast %286 : vector<1x32xf32> to vector<8x32xf32>
    %308 = arith.addf %306, %307 : vector<8x32xf32>
    %c184 = arith.constant 184 : index
    %c0_88 = arith.constant 0 : index
    %309 = vector.load %arg4[%c184, %c0_88] : memref<504x128xf32, #tpu.memory_space<vmem>>, vector<32x64xf32>
    %310 = arith.truncf %308 : vector<8x32xf32> to vector<8x32xbf16>
    %311 = arith.truncf %309 : vector<32x64xf32> to vector<32x64xbf16>
    %cst_89 = arith.constant dense<0.000000e+00> : vector<8x64xf32>
    %312 = tpu.matmul %310, %311, %cst_89 {dimension_numbers = #tpu.dot_dimension_numbers<[1], [0], [0], [1], [0, 0, 1, 1], [], []>} : vector<8x32xbf16>, vector<32x64xbf16>, vector<8x64xf32> -> vector<8x64xf32>
    %c216 = arith.constant 216 : index
    %c0_90 = arith.constant 0 : index
    %313 = vector.load %arg4[%c216, %c0_90] : memref<504x128xf32, #tpu.memory_space<vmem>>, vector<1x64xf32>
    %314 = vector.broadcast %313 : vector<1x64xf32> to vector<8x64xf32>
    %315 = arith.addf %312, %314 : vector<8x64xf32>
    %cst_91 = arith.constant 5.000000e-01 : f32
    %316 = vector.broadcast %cst_91 : f32 to vector<8x64xf32>
    %317 = arith.mulf %316, %315 : vector<8x64xf32>
    %cst_92 = arith.constant 0.707106769 : f32
    %318 = vector.broadcast %cst_92 : f32 to vector<8x64xf32>
    %319 = arith.mulf %315, %318 : vector<8x64xf32>
    %320 = math.absf %319 : vector<8x64xf32>
    %cst_93 = arith.constant 0.327591091 : f32
    %321 = vector.broadcast %cst_93 : f32 to vector<8x64xf32>
    %322 = arith.mulf %321, %320 : vector<8x64xf32>
    %cst_94 = arith.constant 1.000000e+00 : f32
    %323 = vector.broadcast %cst_94 : f32 to vector<8x64xf32>
    %324 = arith.addf %323, %322 : vector<8x64xf32>
    %cst_95 = arith.constant 1.000000e+00 : f32
    %325 = vector.broadcast %cst_95 : f32 to vector<8x64xf32>
    %326 = arith.divf %325, %324 : vector<8x64xf32>
    %cst_96 = arith.constant 1.06140542 : f32
    %327 = vector.broadcast %cst_96 : f32 to vector<8x64xf32>
    %328 = arith.mulf %327, %326 : vector<8x64xf32>
    %cst_97 = arith.constant 1.45315206 : f32
    %329 = vector.broadcast %cst_97 : f32 to vector<8x64xf32>
    %330 = arith.subf %328, %329 : vector<8x64xf32>
    %331 = arith.mulf %330, %326 : vector<8x64xf32>
    %cst_98 = arith.constant 1.42141378 : f32
    %332 = vector.broadcast %cst_98 : f32 to vector<8x64xf32>
    %333 = arith.addf %331, %332 : vector<8x64xf32>
    %334 = arith.mulf %333, %326 : vector<8x64xf32>
    %cst_99 = arith.constant 0.284496725 : f32
    %335 = vector.broadcast %cst_99 : f32 to vector<8x64xf32>
    %336 = arith.subf %334, %335 : vector<8x64xf32>
    %337 = arith.mulf %336, %326 : vector<8x64xf32>
    %cst_100 = arith.constant 0.254829586 : f32
    %338 = vector.broadcast %cst_100 : f32 to vector<8x64xf32>
    %339 = arith.addf %337, %338 : vector<8x64xf32>
    %340 = arith.mulf %339, %326 : vector<8x64xf32>
    %cst_101 = arith.constant 0.000000e+00 : f32
    %341 = vector.broadcast %cst_101 : f32 to vector<8x64xf32>
    %342 = arith.subf %341, %320 : vector<8x64xf32>
    %343 = arith.mulf %342, %320 : vector<8x64xf32>
    %344 = math.exp %343 : vector<8x64xf32>
    %345 = arith.mulf %340, %344 : vector<8x64xf32>
    %cst_102 = arith.constant 1.000000e+00 : f32
    %346 = vector.broadcast %cst_102 : f32 to vector<8x64xf32>
    %347 = arith.subf %346, %345 : vector<8x64xf32>
    %cst_103 = arith.constant 0.000000e+00 : f32
    %348 = vector.broadcast %cst_103 : f32 to vector<8x64xf32>
    %349 = arith.cmpf olt, %319, %348 : vector<8x64xf32>
    %cst_104 = arith.constant 0.000000e+00 : f32
    %350 = vector.broadcast %cst_104 : f32 to vector<8x64xf32>
    %351 = arith.subf %350, %347 : vector<8x64xf32>
    %352 = arith.select %349, %351, %347 : vector<8x64xi1>, vector<8x64xf32>
    %cst_105 = arith.constant 1.000000e+00 : f32
    %353 = vector.broadcast %cst_105 : f32 to vector<8x64xf32>
    %354 = arith.addf %353, %352 : vector<8x64xf32>
    %355 = arith.mulf %317, %354 : vector<8x64xf32>
    %c224 = arith.constant 224 : index
    %c0_106 = arith.constant 0 : index
    %356 = vector.load %arg4[%c224, %c0_106] : memref<504x128xf32, #tpu.memory_space<vmem>>, vector<64x32xf32>
    %357 = arith.truncf %355 : vector<8x64xf32> to vector<8x64xbf16>
    %358 = arith.truncf %356 : vector<64x32xf32> to vector<64x32xbf16>
    %cst_107 = arith.constant dense<0.000000e+00> : vector<8x32xf32>
    %359 = tpu.matmul %357, %358, %cst_107 {dimension_numbers = #tpu.dot_dimension_numbers<[1], [0], [0], [1], [0, 0, 1, 1], [], []>} : vector<8x64xbf16>, vector<64x32xbf16>, vector<8x32xf32> -> vector<8x32xf32>
    %360 = arith.addf %283, %359 : vector<8x32xf32>
    %c288 = arith.constant 288 : index
    %c0_108 = arith.constant 0 : index
    %361 = vector.load %arg4[%c288, %c0_108] : memref<504x128xf32, #tpu.memory_space<vmem>>, vector<1x32xf32>
    %362 = vector.broadcast %361 : vector<1x32xf32> to vector<8x32xf32>
    %363 = arith.addf %360, %362 : vector<8x32xf32>
    %c0_109 = arith.constant 0 : index
    %c0_110 = arith.constant 0 : index
    %c0_111 = arith.constant 0 : index
    %364 = vector.load %arg5[%c0_109, %c0_110, %c0_111] : memref<2x8x32xf32, #tpu.memory_space<vmem>>, vector<1x8x32xf32>
    %365 = vector.shape_cast %364 : vector<1x8x32xf32> to vector<8x32xf32>
    %366 = vector.shape_cast %363 : vector<8x32xf32> to vector<1x8x32xf32>
    tpu.vector_store %arg5[%c0_109, %c0_110, %c0_111], %366 {strides = array<i32>} : memref<2x8x32xf32, #tpu.memory_space<vmem>>, vector<1x8x32xf32>,
    %367 = tpu.transpose %17, [1, 0] : vector<8x16xf32> -> vector<16x8xf32>
    %c296 = arith.constant 296 : index
    %c0_112 = arith.constant 0 : index
    %368 = vector.load %arg4[%c296, %c0_112] : memref<504x128xf32, #tpu.memory_space<vmem>>, vector<2x32xf32>
    %369 = vector.extract_strided_slice %368 {offsets = [0, 0], sizes = [1, 32], strides = [1, 1]} : vector<2x32xf32> to vector<1x32xf32>
    %370 = vector.extract_strided_slice %368 {offsets = [1, 0], sizes = [1, 32], strides = [1, 1]} : vector<2x32xf32> to vector<1x32xf32>
    %cst_113 = arith.constant dense<0.000000e+00> : vector<16xf32>
    %371 = vector.multi_reduction <add>, %3, %cst_113 [1] : vector<16x32xf32> to vector<16xf32>
    %372 = vector.shape_cast %371 : vector<16xf32> to vector<16x1xf32>
    %cst_114 = arith.constant 3.200000e+01 : f32
    %373 = vector.broadcast %cst_114 : f32 to vector<16x1xf32>
    %374 = arith.divf %372, %373 : vector<16x1xf32>
    %375 = vector.broadcast %374 : vector<16x1xf32> to vector<16x32xf32>
    %376 = arith.subf %3, %375 : vector<16x32xf32>
    %377 = arith.mulf %376, %376 : vector<16x32xf32>
    %cst_115 = arith.constant dense<0.000000e+00> : vector<16xf32>
    %378 = vector.multi_reduction <add>, %377, %cst_115 [1] : vector<16x32xf32> to vector<16xf32>
    %379 = vector.shape_cast %378 : vector<16xf32> to vector<16x1xf32>
    %cst_116 = arith.constant 3.200000e+01 : f32
    %380 = vector.broadcast %cst_116 : f32 to vector<16x1xf32>
    %381 = arith.divf %379, %380 : vector<16x1xf32>
    %382 = vector.broadcast %374 : vector<16x1xf32> to vector<16x32xf32>
    %383 = arith.subf %3, %382 : vector<16x32xf32>
    %cst_117 = arith.constant 9.99999974E-6 : f32
    %384 = vector.broadcast %cst_117 : f32 to vector<16x1xf32>
    %385 = arith.addf %381, %384 : vector<16x1xf32>
    %386 = math.rsqrt %385 : vector<16x1xf32>
    %387 = vector.broadcast %386 : vector<16x1xf32> to vector<16x32xf32>
    %388 = arith.mulf %383, %387 : vector<16x32xf32>
    %389 = vector.broadcast %369 : vector<1x32xf32> to vector<16x32xf32>
    %390 = arith.mulf %388, %389 : vector<16x32xf32>
    %391 = vector.broadcast %370 : vector<1x32xf32> to vector<16x32xf32>
    %392 = arith.addf %390, %391 : vector<16x32xf32>
    %c304 = arith.constant 304 : index
    %c0_118 = arith.constant 0 : index
    %393 = vector.load %arg4[%c304, %c0_118] : memref<504x128xf32, #tpu.memory_space<vmem>>, vector<32x32xf32>
    %394 = arith.truncf %392 : vector<16x32xf32> to vector<16x32xbf16>
    %395 = arith.truncf %393 : vector<32x32xf32> to vector<32x32xbf16>
    %cst_119 = arith.constant dense<0.000000e+00> : vector<16x32xf32>
    %396 = tpu.matmul %394, %395, %cst_119 {dimension_numbers = #tpu.dot_dimension_numbers<[1], [0], [0], [1], [0, 0, 1, 1], [], []>} : vector<16x32xbf16>, vector<32x32xbf16>, vector<16x32xf32> -> vector<16x32xf32>
    %c336 = arith.constant 336 : index
    %c0_120 = arith.constant 0 : index
    %397 = vector.load %arg4[%c336, %c0_120] : memref<504x128xf32, #tpu.memory_space<vmem>>, vector<1x32xf32>
    %398 = vector.broadcast %397 : vector<1x32xf32> to vector<16x32xf32>
    %399 = arith.addf %396, %398 : vector<16x32xf32>
    %c304_121 = arith.constant 304 : index
    %c32_122 = arith.constant 32 : index
    %400 = vector.load %arg4[%c304_121, %c32_122] : memref<504x128xf32, #tpu.memory_space<vmem>>, vector<32x64xf32>
    %401 = arith.truncf %363 : vector<8x32xf32> to vector<8x32xbf16>
    %402 = arith.truncf %400 : vector<32x64xf32> to vector<32x64xbf16>
    %cst_123 = arith.constant dense<0.000000e+00> : vector<8x64xf32>
    %403 = tpu.matmul %401, %402, %cst_123 {dimension_numbers = #tpu.dot_dimension_numbers<[1], [0], [0], [1], [0, 0, 1, 1], [], []>} : vector<8x32xbf16>, vector<32x64xbf16>, vector<8x64xf32> -> vector<8x64xf32>
    %c336_124 = arith.constant 336 : index
    %c32_125 = arith.constant 32 : index
    %404 = vector.load %arg4[%c336_124, %c32_125] : memref<504x128xf32, #tpu.memory_space<vmem>>, vector<1x64xf32>
    %405 = vector.broadcast %404 : vector<1x64xf32> to vector<8x64xf32>
    %406 = arith.addf %403, %405 : vector<8x64xf32>
    %407 = vector.extract_strided_slice %406 {offsets = [0, 0], sizes = [8, 32], strides = [1, 1]} : vector<8x64xf32> to vector<8x32xf32>
    %408 = vector.extract_strided_slice %406 {offsets = [0, 32], sizes = [8, 32], strides = [1, 1]} : vector<8x64xf32> to vector<8x32xf32>
    %409 = vector.extract_strided_slice %399 {offsets = [0, 0], sizes = [16, 8], strides = [1, 1]} : vector<16x32xf32> to vector<16x8xf32>
    %cst_126 = arith.constant 0.353553385 : f32
    %410 = vector.broadcast %cst_126 : f32 to vector<16x8xf32>
    %411 = arith.mulf %409, %410 : vector<16x8xf32>
    %412 = vector.extract_strided_slice %407 {offsets = [0, 0], sizes = [8, 8], strides = [1, 1]} : vector<8x32xf32> to vector<8x8xf32>
    %413 = vector.extract_strided_slice %408 {offsets = [0, 0], sizes = [8, 8], strides = [1, 1]} : vector<8x32xf32> to vector<8x8xf32>
    %414 = arith.truncf %411 : vector<16x8xf32> to vector<16x8xbf16>
    %415 = arith.truncf %412 : vector<8x8xf32> to vector<8x8xbf16>
    %cst_127 = arith.constant dense<0.000000e+00> : vector<16x8xf32>
    %416 = tpu.matmul %414, %415, %cst_127 {dimension_numbers = #tpu.dot_dimension_numbers<[1], [1], [0], [0], [0, 0, 1, 0], [], []>} : vector<16x8xbf16>, vector<8x8xbf16>, vector<16x8xf32> -> vector<16x8xf32>
    %417 = arith.addf %416, %367 : vector<16x8xf32>
    %cst_128 = arith.constant dense<0xFF800000> : vector<16xf32>
    %418 = vector.multi_reduction <maximumf>, %417, %cst_128 [1] : vector<16x8xf32> to vector<16xf32>
    %419 = vector.shape_cast %418 : vector<16xf32> to vector<16x1xf32>
    %420 = vector.broadcast %419 : vector<16x1xf32> to vector<16x8xf32>
    %421 = arith.subf %417, %420 : vector<16x8xf32>
    %422 = math.exp %421 : vector<16x8xf32>
    %cst_129 = arith.constant dense<0.000000e+00> : vector<16xf32>
    %423 = vector.multi_reduction <add>, %422, %cst_129 [1] : vector<16x8xf32> to vector<16xf32>
    %424 = vector.shape_cast %423 : vector<16xf32> to vector<16x1xf32>
    %425 = tpu.reciprocal %424 {approx = true} : vector<16x1xf32> -> vector<16x1xf32>
    %426 = vector.broadcast %425 : vector<16x1xf32> to vector<16x8xf32>
    %427 = arith.mulf %422, %426 : vector<16x8xf32>
    %428 = arith.truncf %427 : vector<16x8xf32> to vector<16x8xbf16>
    %429 = arith.truncf %413 : vector<8x8xf32> to vector<8x8xbf16>
    %cst_130 = arith.constant dense<0.000000e+00> : vector<16x8xf32>
    %430 = tpu.matmul %428, %429, %cst_130 {dimension_numbers = #tpu.dot_dimension_numbers<[1], [0], [0], [1], [0, 0, 1, 1], [], []>} : vector<16x8xbf16>, vector<8x8xbf16>, vector<16x8xf32> -> vector<16x8xf32>
    %431 = vector.extract_strided_slice %399 {offsets = [0, 8], sizes = [16, 8], strides = [1, 1]} : vector<16x32xf32> to vector<16x8xf32>
    %cst_131 = arith.constant 0.353553385 : f32
    %432 = vector.broadcast %cst_131 : f32 to vector<16x8xf32>
    %433 = arith.mulf %431, %432 : vector<16x8xf32>
    %434 = vector.extract_strided_slice %407 {offsets = [0, 8], sizes = [8, 8], strides = [1, 1]} : vector<8x32xf32> to vector<8x8xf32>
    %435 = vector.extract_strided_slice %408 {offsets = [0, 8], sizes = [8, 8], strides = [1, 1]} : vector<8x32xf32> to vector<8x8xf32>
    %436 = arith.truncf %433 : vector<16x8xf32> to vector<16x8xbf16>
    %437 = arith.truncf %434 : vector<8x8xf32> to vector<8x8xbf16>
    %cst_132 = arith.constant dense<0.000000e+00> : vector<16x8xf32>
    %438 = tpu.matmul %436, %437, %cst_132 {dimension_numbers = #tpu.dot_dimension_numbers<[1], [1], [0], [0], [0, 0, 1, 0], [], []>} : vector<16x8xbf16>, vector<8x8xbf16>, vector<16x8xf32> -> vector<16x8xf32>
    %439 = arith.addf %438, %367 : vector<16x8xf32>
    %cst_133 = arith.constant dense<0xFF800000> : vector<16xf32>
    %440 = vector.multi_reduction <maximumf>, %439, %cst_133 [1] : vector<16x8xf32> to vector<16xf32>
    %441 = vector.shape_cast %440 : vector<16xf32> to vector<16x1xf32>
    %442 = vector.broadcast %441 : vector<16x1xf32> to vector<16x8xf32>
    %443 = arith.subf %439, %442 : vector<16x8xf32>
    %444 = math.exp %443 : vector<16x8xf32>
    %cst_134 = arith.constant dense<0.000000e+00> : vector<16xf32>
    %445 = vector.multi_reduction <add>, %444, %cst_134 [1] : vector<16x8xf32> to vector<16xf32>
    %446 = vector.shape_cast %445 : vector<16xf32> to vector<16x1xf32>
    %447 = tpu.reciprocal %446 {approx = true} : vector<16x1xf32> -> vector<16x1xf32>
    %448 = vector.broadcast %447 : vector<16x1xf32> to vector<16x8xf32>
    %449 = arith.mulf %444, %448 : vector<16x8xf32>
    %450 = arith.truncf %449 : vector<16x8xf32> to vector<16x8xbf16>
    %451 = arith.truncf %435 : vector<8x8xf32> to vector<8x8xbf16>
    %cst_135 = arith.constant dense<0.000000e+00> : vector<16x8xf32>
    %452 = tpu.matmul %450, %451, %cst_135 {dimension_numbers = #tpu.dot_dimension_numbers<[1], [0], [0], [1], [0, 0, 1, 1], [], []>} : vector<16x8xbf16>, vector<8x8xbf16>, vector<16x8xf32> -> vector<16x8xf32>
    %453 = vector.extract_strided_slice %399 {offsets = [0, 16], sizes = [16, 8], strides = [1, 1]} : vector<16x32xf32> to vector<16x8xf32>
    %cst_136 = arith.constant 0.353553385 : f32
    %454 = vector.broadcast %cst_136 : f32 to vector<16x8xf32>
    %455 = arith.mulf %453, %454 : vector<16x8xf32>
    %456 = vector.extract_strided_slice %407 {offsets = [0, 16], sizes = [8, 8], strides = [1, 1]} : vector<8x32xf32> to vector<8x8xf32>
    %457 = vector.extract_strided_slice %408 {offsets = [0, 16], sizes = [8, 8], strides = [1, 1]} : vector<8x32xf32> to vector<8x8xf32>
    %458 = arith.truncf %455 : vector<16x8xf32> to vector<16x8xbf16>
    %459 = arith.truncf %456 : vector<8x8xf32> to vector<8x8xbf16>
    %cst_137 = arith.constant dense<0.000000e+00> : vector<16x8xf32>
    %460 = tpu.matmul %458, %459, %cst_137 {dimension_numbers = #tpu.dot_dimension_numbers<[1], [1], [0], [0], [0, 0, 1, 0], [], []>} : vector<16x8xbf16>, vector<8x8xbf16>, vector<16x8xf32> -> vector<16x8xf32>
    %461 = arith.addf %460, %367 : vector<16x8xf32>
    %cst_138 = arith.constant dense<0xFF800000> : vector<16xf32>
    %462 = vector.multi_reduction <maximumf>, %461, %cst_138 [1] : vector<16x8xf32> to vector<16xf32>
    %463 = vector.shape_cast %462 : vector<16xf32> to vector<16x1xf32>
    %464 = vector.broadcast %463 : vector<16x1xf32> to vector<16x8xf32>
    %465 = arith.subf %461, %464 : vector<16x8xf32>
    %466 = math.exp %465 : vector<16x8xf32>
    %cst_139 = arith.constant dense<0.000000e+00> : vector<16xf32>
    %467 = vector.multi_reduction <add>, %466, %cst_139 [1] : vector<16x8xf32> to vector<16xf32>
    %468 = vector.shape_cast %467 : vector<16xf32> to vector<16x1xf32>
    %469 = tpu.reciprocal %468 {approx = true} : vector<16x1xf32> -> vector<16x1xf32>
    %470 = vector.broadcast %469 : vector<16x1xf32> to vector<16x8xf32>
    %471 = arith.mulf %466, %470 : vector<16x8xf32>
    %472 = arith.truncf %471 : vector<16x8xf32> to vector<16x8xbf16>
    %473 = arith.truncf %457 : vector<8x8xf32> to vector<8x8xbf16>
    %cst_140 = arith.constant dense<0.000000e+00> : vector<16x8xf32>
    %474 = tpu.matmul %472, %473, %cst_140 {dimension_numbers = #tpu.dot_dimension_numbers<[1], [0], [0], [1], [0, 0, 1, 1], [], []>} : vector<16x8xbf16>, vector<8x8xbf16>, vector<16x8xf32> -> vector<16x8xf32>
    %475 = vector.extract_strided_slice %399 {offsets = [0, 24], sizes = [16, 8], strides = [1, 1]} : vector<16x32xf32> to vector<16x8xf32>
    %cst_141 = arith.constant 0.353553385 : f32
    %476 = vector.broadcast %cst_141 : f32 to vector<16x8xf32>
    %477 = arith.mulf %475, %476 : vector<16x8xf32>
    %478 = vector.extract_strided_slice %407 {offsets = [0, 24], sizes = [8, 8], strides = [1, 1]} : vector<8x32xf32> to vector<8x8xf32>
    %479 = vector.extract_strided_slice %408 {offsets = [0, 24], sizes = [8, 8], strides = [1, 1]} : vector<8x32xf32> to vector<8x8xf32>
    %480 = arith.truncf %477 : vector<16x8xf32> to vector<16x8xbf16>
    %481 = arith.truncf %478 : vector<8x8xf32> to vector<8x8xbf16>
    %cst_142 = arith.constant dense<0.000000e+00> : vector<16x8xf32>
    %482 = tpu.matmul %480, %481, %cst_142 {dimension_numbers = #tpu.dot_dimension_numbers<[1], [1], [0], [0], [0, 0, 1, 0], [], []>} : vector<16x8xbf16>, vector<8x8xbf16>, vector<16x8xf32> -> vector<16x8xf32>
    %483 = arith.addf %482, %367 : vector<16x8xf32>
    %cst_143 = arith.constant dense<0xFF800000> : vector<16xf32>
    %484 = vector.multi_reduction <maximumf>, %483, %cst_143 [1] : vector<16x8xf32> to vector<16xf32>
    %485 = vector.shape_cast %484 : vector<16xf32> to vector<16x1xf32>
    %486 = vector.broadcast %485 : vector<16x1xf32> to vector<16x8xf32>
    %487 = arith.subf %483, %486 : vector<16x8xf32>
    %488 = math.exp %487 : vector<16x8xf32>
    %cst_144 = arith.constant dense<0.000000e+00> : vector<16xf32>
    %489 = vector.multi_reduction <add>, %488, %cst_144 [1] : vector<16x8xf32> to vector<16xf32>
    %490 = vector.shape_cast %489 : vector<16xf32> to vector<16x1xf32>
    %491 = tpu.reciprocal %490 {approx = true} : vector<16x1xf32> -> vector<16x1xf32>
    %492 = vector.broadcast %491 : vector<16x1xf32> to vector<16x8xf32>
    %493 = arith.mulf %488, %492 : vector<16x8xf32>
    %494 = arith.truncf %493 : vector<16x8xf32> to vector<16x8xbf16>
    %495 = arith.truncf %479 : vector<8x8xf32> to vector<8x8xbf16>
    %cst_145 = arith.constant dense<0.000000e+00> : vector<16x8xf32>
    %496 = tpu.matmul %494, %495, %cst_145 {dimension_numbers = #tpu.dot_dimension_numbers<[1], [0], [0], [1], [0, 0, 1, 1], [], []>} : vector<16x8xbf16>, vector<8x8xbf16>, vector<16x8xf32> -> vector<16x8xf32>
    %497 = tpu.concatenate %430, %452, %474, %496 in 1 : vector<16x8xf32>, vector<16x8xf32>, vector<16x8xf32>, vector<16x8xf32> -> vector<16x32xf32>
    %c344 = arith.constant 344 : index
    %c0_146 = arith.constant 0 : index
    %498 = vector.load %arg4[%c344, %c0_146] : memref<504x128xf32, #tpu.memory_space<vmem>>, vector<32x32xf32>
    %499 = arith.truncf %497 : vector<16x32xf32> to vector<16x32xbf16>
    %500 = arith.truncf %498 : vector<32x32xf32> to vector<32x32xbf16>
    %cst_147 = arith.constant dense<0.000000e+00> : vector<16x32xf32>
    %501 = tpu.matmul %499, %500, %cst_147 {dimension_numbers = #tpu.dot_dimension_numbers<[1], [0], [0], [1], [0, 0, 1, 1], [], []>} : vector<16x32xbf16>, vector<32x32xbf16>, vector<16x32xf32> -> vector<16x32xf32>
    %c376 = arith.constant 376 : index
    %c0_148 = arith.constant 0 : index
    %502 = vector.load %arg4[%c376, %c0_148] : memref<504x128xf32, #tpu.memory_space<vmem>>, vector<1x32xf32>
    %503 = vector.broadcast %502 : vector<1x32xf32> to vector<16x32xf32>
    %504 = arith.addf %501, %503 : vector<16x32xf32>
    %505 = arith.addf %3, %504 : vector<16x32xf32>
    %c384 = arith.constant 384 : index
    %c0_149 = arith.constant 0 : index
    %506 = vector.load %arg4[%c384, %c0_149] : memref<504x128xf32, #tpu.memory_space<vmem>>, vector<2x32xf32>
    %507 = vector.extract_strided_slice %506 {offsets = [0, 0], sizes = [1, 32], strides = [1, 1]} : vector<2x32xf32> to vector<1x32xf32>
    %508 = vector.extract_strided_slice %506 {offsets = [1, 0], sizes = [1, 32], strides = [1, 1]} : vector<2x32xf32> to vector<1x32xf32>
    %cst_150 = arith.constant dense<0.000000e+00> : vector<16xf32>
    %509 = vector.multi_reduction <add>, %505, %cst_150 [1] : vector<16x32xf32> to vector<16xf32>
    %510 = vector.shape_cast %509 : vector<16xf32> to vector<16x1xf32>
    %cst_151 = arith.constant 3.200000e+01 : f32
    %511 = vector.broadcast %cst_151 : f32 to vector<16x1xf32>
    %512 = arith.divf %510, %511 : vector<16x1xf32>
    %513 = vector.broadcast %512 : vector<16x1xf32> to vector<16x32xf32>
    %514 = arith.subf %505, %513 : vector<16x32xf32>
    %515 = arith.mulf %514, %514 : vector<16x32xf32>
    %cst_152 = arith.constant dense<0.000000e+00> : vector<16xf32>
    %516 = vector.multi_reduction <add>, %515, %cst_152 [1] : vector<16x32xf32> to vector<16xf32>
    %517 = vector.shape_cast %516 : vector<16xf32> to vector<16x1xf32>
    %cst_153 = arith.constant 3.200000e+01 : f32
    %518 = vector.broadcast %cst_153 : f32 to vector<16x1xf32>
    %519 = arith.divf %517, %518 : vector<16x1xf32>
    %520 = vector.broadcast %512 : vector<16x1xf32> to vector<16x32xf32>
    %521 = arith.subf %505, %520 : vector<16x32xf32>
    %cst_154 = arith.constant 9.99999974E-6 : f32
    %522 = vector.broadcast %cst_154 : f32 to vector<16x1xf32>
    %523 = arith.addf %519, %522 : vector<16x1xf32>
    %524 = math.rsqrt %523 : vector<16x1xf32>
    %525 = vector.broadcast %524 : vector<16x1xf32> to vector<16x32xf32>
    %526 = arith.mulf %521, %525 : vector<16x32xf32>
    %527 = vector.broadcast %507 : vector<1x32xf32> to vector<16x32xf32>
    %528 = arith.mulf %526, %527 : vector<16x32xf32>
    %529 = vector.broadcast %508 : vector<1x32xf32> to vector<16x32xf32>
    %530 = arith.addf %528, %529 : vector<16x32xf32>
    %c392 = arith.constant 392 : index
    %c0_155 = arith.constant 0 : index
    %531 = vector.load %arg4[%c392, %c0_155] : memref<504x128xf32, #tpu.memory_space<vmem>>, vector<32x64xf32>
    %532 = arith.truncf %530 : vector<16x32xf32> to vector<16x32xbf16>
    %533 = arith.truncf %531 : vector<32x64xf32> to vector<32x64xbf16>
    %cst_156 = arith.constant dense<0.000000e+00> : vector<16x64xf32>
    %534 = tpu.matmul %532, %533, %cst_156 {dimension_numbers = #tpu.dot_dimension_numbers<[1], [0], [0], [1], [0, 0, 1, 1], [], []>} : vector<16x32xbf16>, vector<32x64xbf16>, vector<16x64xf32> -> vector<16x64xf32>
    %c424 = arith.constant 424 : index
    %c0_157 = arith.constant 0 : index
    %535 = vector.load %arg4[%c424, %c0_157] : memref<504x128xf32, #tpu.memory_space<vmem>>, vector<1x64xf32>
    %536 = vector.broadcast %535 : vector<1x64xf32> to vector<16x64xf32>
    %537 = arith.addf %534, %536 : vector<16x64xf32>
    %cst_158 = arith.constant 5.000000e-01 : f32
    %538 = vector.broadcast %cst_158 : f32 to vector<16x64xf32>
    %539 = arith.mulf %538, %537 : vector<16x64xf32>
    %cst_159 = arith.constant 0.707106769 : f32
    %540 = vector.broadcast %cst_159 : f32 to vector<16x64xf32>
    %541 = arith.mulf %537, %540 : vector<16x64xf32>
    %542 = math.absf %541 : vector<16x64xf32>
    %cst_160 = arith.constant 0.327591091 : f32
    %543 = vector.broadcast %cst_160 : f32 to vector<16x64xf32>
    %544 = arith.mulf %543, %542 : vector<16x64xf32>
    %cst_161 = arith.constant 1.000000e+00 : f32
    %545 = vector.broadcast %cst_161 : f32 to vector<16x64xf32>
    %546 = arith.addf %545, %544 : vector<16x64xf32>
    %cst_162 = arith.constant 1.000000e+00 : f32
    %547 = vector.broadcast %cst_162 : f32 to vector<16x64xf32>
    %548 = arith.divf %547, %546 : vector<16x64xf32>
    %cst_163 = arith.constant 1.06140542 : f32
    %549 = vector.broadcast %cst_163 : f32 to vector<16x64xf32>
    %550 = arith.mulf %549, %548 : vector<16x64xf32>
    %cst_164 = arith.constant 1.45315206 : f32
    %551 = vector.broadcast %cst_164 : f32 to vector<16x64xf32>
    %552 = arith.subf %550, %551 : vector<16x64xf32>
    %553 = arith.mulf %552, %548 : vector<16x64xf32>
    %cst_165 = arith.constant 1.42141378 : f32
    %554 = vector.broadcast %cst_165 : f32 to vector<16x64xf32>
    %555 = arith.addf %553, %554 : vector<16x64xf32>
    %556 = arith.mulf %555, %548 : vector<16x64xf32>
    %cst_166 = arith.constant 0.284496725 : f32
    %557 = vector.broadcast %cst_166 : f32 to vector<16x64xf32>
    %558 = arith.subf %556, %557 : vector<16x64xf32>
    %559 = arith.mulf %558, %548 : vector<16x64xf32>
    %cst_167 = arith.constant 0.254829586 : f32
    %560 = vector.broadcast %cst_167 : f32 to vector<16x64xf32>
    %561 = arith.addf %559, %560 : vector<16x64xf32>
    %562 = arith.mulf %561, %548 : vector<16x64xf32>
    %cst_168 = arith.constant 0.000000e+00 : f32
    %563 = vector.broadcast %cst_168 : f32 to vector<16x64xf32>
    %564 = arith.subf %563, %542 : vector<16x64xf32>
    %565 = arith.mulf %564, %542 : vector<16x64xf32>
    %566 = math.exp %565 : vector<16x64xf32>
    %567 = arith.mulf %562, %566 : vector<16x64xf32>
    %cst_169 = arith.constant 1.000000e+00 : f32
    %568 = vector.broadcast %cst_169 : f32 to vector<16x64xf32>
    %569 = arith.subf %568, %567 : vector<16x64xf32>
    %cst_170 = arith.constant 0.000000e+00 : f32
    %570 = vector.broadcast %cst_170 : f32 to vector<16x64xf32>
    %571 = arith.cmpf olt, %541, %570 : vector<16x64xf32>
    %cst_171 = arith.constant 0.000000e+00 : f32
    %572 = vector.broadcast %cst_171 : f32 to vector<16x64xf32>
    %573 = arith.subf %572, %569 : vector<16x64xf32>
    %574 = arith.select %571, %573, %569 : vector<16x64xi1>, vector<16x64xf32>
    %cst_172 = arith.constant 1.000000e+00 : f32
    %575 = vector.broadcast %cst_172 : f32 to vector<16x64xf32>
    %576 = arith.addf %575, %574 : vector<16x64xf32>
    %577 = arith.mulf %539, %576 : vector<16x64xf32>
    %c432 = arith.constant 432 : index
    %c0_173 = arith.constant 0 : index
    %578 = vector.load %arg4[%c432, %c0_173] : memref<504x128xf32, #tpu.memory_space<vmem>>, vector<64x32xf32>
    %579 = arith.truncf %577 : vector<16x64xf32> to vector<16x64xbf16>
    %580 = arith.truncf %578 : vector<64x32xf32> to vector<64x32xbf16>
    %cst_174 = arith.constant dense<0.000000e+00> : vector<16x32xf32>
    %581 = tpu.matmul %579, %580, %cst_174 {dimension_numbers = #tpu.dot_dimension_numbers<[1], [0], [0], [1], [0, 0, 1, 1], [], []>} : vector<16x64xbf16>, vector<64x32xbf16>, vector<16x32xf32> -> vector<16x32xf32>
    %582 = arith.addf %505, %581 : vector<16x32xf32>
    %c496 = arith.constant 496 : index
    %c0_175 = arith.constant 0 : index
    %583 = vector.load %arg4[%c496, %c0_175] : memref<504x128xf32, #tpu.memory_space<vmem>>, vector<1x32xf32>
    %584 = vector.broadcast %583 : vector<1x32xf32> to vector<16x32xf32>
    %585 = arith.addf %582, %584 : vector<16x32xf32>
    %c0_176 = arith.constant 0 : index
    %c0_177 = arith.constant 0 : index
    %c0_178 = arith.constant 0 : index
    %586 = vector.load %arg6[%c0_176, %c0_177, %c0_178] : memref<2x16x32xf32, #tpu.memory_space<vmem>>, vector<1x16x32xf32>
    %587 = vector.shape_cast %586 : vector<1x16x32xf32> to vector<16x32xf32>
    %588 = vector.shape_cast %585 : vector<16x32xf32> to vector<1x16x32xf32>
    tpu.vector_store %arg6[%c0_176, %c0_177, %c0_178], %588 {strides = array<i32>} : memref<2x16x32xf32, #tpu.memory_space<vmem>>, vector<1x16x32xf32>,
    %c1 = arith.constant 1 : index
    %c0_179 = arith.constant 0 : index
    %c0_180 = arith.constant 0 : index
    %589 = vector.load %arg1[%c1, %c0_179, %c0_180] : memref<2x8x32xf32, #tpu.memory_space<vmem>>, vector<1x8x32xf32>
    %590 = vector.shape_cast %589 : vector<1x8x32xf32> to vector<8x32xf32>
    %c1_181 = arith.constant 1 : index
    %c0_182 = arith.constant 0 : index
    %c0_183 = arith.constant 0 : index
    %591 = vector.load %arg2[%c1_181, %c0_182, %c0_183] : memref<2x16x32xf32, #tpu.memory_space<vmem>>, vector<1x16x32xf32>
    %592 = vector.shape_cast %591 : vector<1x16x32xf32> to vector<16x32xf32>
    %c1_184 = arith.constant 1 : index
    %c0_185 = arith.constant 0 : index
    %c0_186 = arith.constant 0 : index
    %593 = vector.load %arg3[%c1_184, %c0_185, %c0_186] : memref<2x8x16xf32, #tpu.memory_space<vmem>>, vector<1x8x16xf32>
    %594 = vector.shape_cast %593 : vector<1x8x16xf32> to vector<8x16xf32>
    %cst_187 = arith.constant dense<0.000000e+00> : vector<8xf32>
    %595 = vector.multi_reduction <add>, %594, %cst_187 [1] : vector<8x16xf32> to vector<8xf32>
    %596 = vector.shape_cast %595 : vector<8xf32> to vector<8x1xf32>
    %cst_188 = arith.constant 1.550000e+01 : f32
    %597 = vector.broadcast %cst_188 : f32 to vector<8x1xf32>
    %598 = arith.cmpf oge, %596, %597 : vector<8x1xf32>
    %cst_189 = arith.constant 5.000000e-01 : f32
    %599 = vector.broadcast %cst_189 : f32 to vector<8x16xf32>
    %600 = arith.cmpf ogt, %594, %599 : vector<8x16xf32>
    %cst_190 = arith.constant dense<true> : vector<8x1xi1>
    %601 = arith.xori %598, %cst_190 : vector<8x1xi1>
    %602 = vector.broadcast %601 : vector<8x1xi1> to vector<8x16xi1>
    %603 = arith.andi %600, %602 : vector<8x16xi1>
    %cst_191 = arith.constant -1.000000e+30 : f32
    %cst_192 = arith.constant 0.000000e+00 : f32
    %604 = vector.broadcast %cst_191 : f32 to vector<8x16xf32>
    %605 = vector.broadcast %cst_192 : f32 to vector<8x16xf32>
    %606 = arith.select %603, %604, %605 : vector<8x16xi1>, vector<8x16xf32>
    %c0_193 = arith.constant 0 : index
    %c0_194 = arith.constant 0 : index
    %607 = vector.load %arg4[%c0_193, %c0_194] : memref<504x128xf32, #tpu.memory_space<vmem>>, vector<2x32xf32>
    %608 = vector.extract_strided_slice %607 {offsets = [0, 0], sizes = [1, 32], strides = [1, 1]} : vector<2x32xf32> to vector<1x32xf32>
    %609 = vector.extract_strided_slice %607 {offsets = [1, 0], sizes = [1, 32], strides = [1, 1]} : vector<2x32xf32> to vector<1x32xf32>
    %cst_195 = arith.constant dense<0.000000e+00> : vector<8xf32>
    %610 = vector.multi_reduction <add>, %590, %cst_195 [1] : vector<8x32xf32> to vector<8xf32>
    %611 = vector.shape_cast %610 : vector<8xf32> to vector<8x1xf32>
    %cst_196 = arith.constant 3.200000e+01 : f32
    %612 = vector.broadcast %cst_196 : f32 to vector<8x1xf32>
    %613 = arith.divf %611, %612 : vector<8x1xf32>
    %614 = vector.broadcast %613 : vector<8x1xf32> to vector<8x32xf32>
    %615 = arith.subf %590, %614 : vector<8x32xf32>
    %616 = arith.mulf %615, %615 : vector<8x32xf32>
    %cst_197 = arith.constant dense<0.000000e+00> : vector<8xf32>
    %617 = vector.multi_reduction <add>, %616, %cst_197 [1] : vector<8x32xf32> to vector<8xf32>
    %618 = vector.shape_cast %617 : vector<8xf32> to vector<8x1xf32>
    %cst_198 = arith.constant 3.200000e+01 : f32
    %619 = vector.broadcast %cst_198 : f32 to vector<8x1xf32>
    %620 = arith.divf %618, %619 : vector<8x1xf32>
    %621 = vector.broadcast %613 : vector<8x1xf32> to vector<8x32xf32>
    %622 = arith.subf %590, %621 : vector<8x32xf32>
    %cst_199 = arith.constant 9.99999974E-6 : f32
    %623 = vector.broadcast %cst_199 : f32 to vector<8x1xf32>
    %624 = arith.addf %620, %623 : vector<8x1xf32>
    %625 = math.rsqrt %624 : vector<8x1xf32>
    %626 = vector.broadcast %625 : vector<8x1xf32> to vector<8x32xf32>
    %627 = arith.mulf %622, %626 : vector<8x32xf32>
    %628 = vector.broadcast %608 : vector<1x32xf32> to vector<8x32xf32>
    %629 = arith.mulf %627, %628 : vector<8x32xf32>
    %630 = vector.broadcast %609 : vector<1x32xf32> to vector<8x32xf32>
    %631 = arith.addf %629, %630 : vector<8x32xf32>
    %c8_200 = arith.constant 8 : index
    %c0_201 = arith.constant 0 : index
    %632 = vector.load %arg4[%c8_200, %c0_201] : memref<504x128xf32, #tpu.memory_space<vmem>>, vector<32x32xf32>
    %633 = arith.truncf %631 : vector<8x32xf32> to vector<8x32xbf16>
    %634 = arith.truncf %632 : vector<32x32xf32> to vector<32x32xbf16>
    %cst_202 = arith.constant dense<0.000000e+00> : vector<8x32xf32>
    %635 = tpu.matmul %633, %634, %cst_202 {dimension_numbers = #tpu.dot_dimension_numbers<[1], [0], [0], [1], [0, 0, 1, 1], [], []>} : vector<8x32xbf16>, vector<32x32xbf16>, vector<8x32xf32> -> vector<8x32xf32>
    %c40_203 = arith.constant 40 : index
    %c0_204 = arith.constant 0 : index
    %636 = vector.load %arg4[%c40_203, %c0_204] : memref<504x128xf32, #tpu.memory_space<vmem>>, vector<1x32xf32>
    %637 = vector.broadcast %636 : vector<1x32xf32> to vector<8x32xf32>
    %638 = arith.addf %635, %637 : vector<8x32xf32>
    %c8_205 = arith.constant 8 : index
    %c32_206 = arith.constant 32 : index
    %639 = vector.load %arg4[%c8_205, %c32_206] : memref<504x128xf32, #tpu.memory_space<vmem>>, vector<32x64xf32>
    %640 = arith.truncf %592 : vector<16x32xf32> to vector<16x32xbf16>
    %641 = arith.truncf %639 : vector<32x64xf32> to vector<32x64xbf16>
    %cst_207 = arith.constant dense<0.000000e+00> : vector<16x64xf32>
    %642 = tpu.matmul %640, %641, %cst_207 {dimension_numbers = #tpu.dot_dimension_numbers<[1], [0], [0], [1], [0, 0, 1, 1], [], []>} : vector<16x32xbf16>, vector<32x64xbf16>, vector<16x64xf32> -> vector<16x64xf32>
    %c40_208 = arith.constant 40 : index
    %c32_209 = arith.constant 32 : index
    %643 = vector.load %arg4[%c40_208, %c32_209] : memref<504x128xf32, #tpu.memory_space<vmem>>, vector<1x64xf32>
    %644 = vector.broadcast %643 : vector<1x64xf32> to vector<16x64xf32>
    %645 = arith.addf %642, %644 : vector<16x64xf32>
    %646 = vector.extract_strided_slice %645 {offsets = [0, 0], sizes = [16, 32], strides = [1, 1]} : vector<16x64xf32> to vector<16x32xf32>
    %647 = vector.extract_strided_slice %645 {offsets = [0, 32], sizes = [16, 32], strides = [1, 1]} : vector<16x64xf32> to vector<16x32xf32>
    %648 = vector.extract_strided_slice %638 {offsets = [0, 0], sizes = [8, 8], strides = [1, 1]} : vector<8x32xf32> to vector<8x8xf32>
    %cst_210 = arith.constant 0.353553385 : f32
    %649 = vector.broadcast %cst_210 : f32 to vector<8x8xf32>
    %650 = arith.mulf %648, %649 : vector<8x8xf32>
    %651 = vector.extract_strided_slice %646 {offsets = [0, 0], sizes = [16, 8], strides = [1, 1]} : vector<16x32xf32> to vector<16x8xf32>
    %652 = vector.extract_strided_slice %647 {offsets = [0, 0], sizes = [16, 8], strides = [1, 1]} : vector<16x32xf32> to vector<16x8xf32>
    %653 = arith.truncf %650 : vector<8x8xf32> to vector<8x8xbf16>
    %654 = arith.truncf %651 : vector<16x8xf32> to vector<16x8xbf16>
    %cst_211 = arith.constant dense<0.000000e+00> : vector<8x16xf32>
    %655 = tpu.matmul %653, %654, %cst_211 {dimension_numbers = #tpu.dot_dimension_numbers<[1], [1], [0], [0], [0, 0, 1, 0], [], []>} : vector<8x8xbf16>, vector<16x8xbf16>, vector<8x16xf32> -> vector<8x16xf32>
    %656 = arith.addf %655, %606 : vector<8x16xf32>
    %cst_212 = arith.constant dense<0xFF800000> : vector<8xf32>
    %657 = vector.multi_reduction <maximumf>, %656, %cst_212 [1] : vector<8x16xf32> to vector<8xf32>
    %658 = vector.shape_cast %657 : vector<8xf32> to vector<8x1xf32>
    %659 = vector.broadcast %658 : vector<8x1xf32> to vector<8x16xf32>
    %660 = arith.subf %656, %659 : vector<8x16xf32>
    %661 = math.exp %660 : vector<8x16xf32>
    %cst_213 = arith.constant dense<0.000000e+00> : vector<8xf32>
    %662 = vector.multi_reduction <add>, %661, %cst_213 [1] : vector<8x16xf32> to vector<8xf32>
    %663 = vector.shape_cast %662 : vector<8xf32> to vector<8x1xf32>
    %664 = tpu.reciprocal %663 {approx = true} : vector<8x1xf32> -> vector<8x1xf32>
    %665 = vector.broadcast %664 : vector<8x1xf32> to vector<8x16xf32>
    %666 = arith.mulf %661, %665 : vector<8x16xf32>
    %667 = arith.truncf %666 : vector<8x16xf32> to vector<8x16xbf16>
    %668 = arith.truncf %652 : vector<16x8xf32> to vector<16x8xbf16>
    %cst_214 = arith.constant dense<0.000000e+00> : vector<8x8xf32>
    %669 = tpu.matmul %667, %668, %cst_214 {dimension_numbers = #tpu.dot_dimension_numbers<[1], [0], [0], [1], [0, 0, 1, 1], [], []>} : vector<8x16xbf16>, vector<16x8xbf16>, vector<8x8xf32> -> vector<8x8xf32>
    %670 = vector.extract_strided_slice %638 {offsets = [0, 8], sizes = [8, 8], strides = [1, 1]} : vector<8x32xf32> to vector<8x8xf32>
    %cst_215 = arith.constant 0.353553385 : f32
    %671 = vector.broadcast %cst_215 : f32 to vector<8x8xf32>
    %672 = arith.mulf %670, %671 : vector<8x8xf32>
    %673 = vector.extract_strided_slice %646 {offsets = [0, 8], sizes = [16, 8], strides = [1, 1]} : vector<16x32xf32> to vector<16x8xf32>
    %674 = vector.extract_strided_slice %647 {offsets = [0, 8], sizes = [16, 8], strides = [1, 1]} : vector<16x32xf32> to vector<16x8xf32>
    %675 = arith.truncf %672 : vector<8x8xf32> to vector<8x8xbf16>
    %676 = arith.truncf %673 : vector<16x8xf32> to vector<16x8xbf16>
    %cst_216 = arith.constant dense<0.000000e+00> : vector<8x16xf32>
    %677 = tpu.matmul %675, %676, %cst_216 {dimension_numbers = #tpu.dot_dimension_numbers<[1], [1], [0], [0], [0, 0, 1, 0], [], []>} : vector<8x8xbf16>, vector<16x8xbf16>, vector<8x16xf32> -> vector<8x16xf32>
    %678 = arith.addf %677, %606 : vector<8x16xf32>
    %cst_217 = arith.constant dense<0xFF800000> : vector<8xf32>
    %679 = vector.multi_reduction <maximumf>, %678, %cst_217 [1] : vector<8x16xf32> to vector<8xf32>
    %680 = vector.shape_cast %679 : vector<8xf32> to vector<8x1xf32>
    %681 = vector.broadcast %680 : vector<8x1xf32> to vector<8x16xf32>
    %682 = arith.subf %678, %681 : vector<8x16xf32>
    %683 = math.exp %682 : vector<8x16xf32>
    %cst_218 = arith.constant dense<0.000000e+00> : vector<8xf32>
    %684 = vector.multi_reduction <add>, %683, %cst_218 [1] : vector<8x16xf32> to vector<8xf32>
    %685 = vector.shape_cast %684 : vector<8xf32> to vector<8x1xf32>
    %686 = tpu.reciprocal %685 {approx = true} : vector<8x1xf32> -> vector<8x1xf32>
    %687 = vector.broadcast %686 : vector<8x1xf32> to vector<8x16xf32>
    %688 = arith.mulf %683, %687 : vector<8x16xf32>
    %689 = arith.truncf %688 : vector<8x16xf32> to vector<8x16xbf16>
    %690 = arith.truncf %674 : vector<16x8xf32> to vector<16x8xbf16>
    %cst_219 = arith.constant dense<0.000000e+00> : vector<8x8xf32>
    %691 = tpu.matmul %689, %690, %cst_219 {dimension_numbers = #tpu.dot_dimension_numbers<[1], [0], [0], [1], [0, 0, 1, 1], [], []>} : vector<8x16xbf16>, vector<16x8xbf16>, vector<8x8xf32> -> vector<8x8xf32>
    %692 = vector.extract_strided_slice %638 {offsets = [0, 16], sizes = [8, 8], strides = [1, 1]} : vector<8x32xf32> to vector<8x8xf32>
    %cst_220 = arith.constant 0.353553385 : f32
    %693 = vector.broadcast %cst_220 : f32 to vector<8x8xf32>
    %694 = arith.mulf %692, %693 : vector<8x8xf32>
    %695 = vector.extract_strided_slice %646 {offsets = [0, 16], sizes = [16, 8], strides = [1, 1]} : vector<16x32xf32> to vector<16x8xf32>
    %696 = vector.extract_strided_slice %647 {offsets = [0, 16], sizes = [16, 8], strides = [1, 1]} : vector<16x32xf32> to vector<16x8xf32>
    %697 = arith.truncf %694 : vector<8x8xf32> to vector<8x8xbf16>
    %698 = arith.truncf %695 : vector<16x8xf32> to vector<16x8xbf16>
    %cst_221 = arith.constant dense<0.000000e+00> : vector<8x16xf32>
    %699 = tpu.matmul %697, %698, %cst_221 {dimension_numbers = #tpu.dot_dimension_numbers<[1], [1], [0], [0], [0, 0, 1, 0], [], []>} : vector<8x8xbf16>, vector<16x8xbf16>, vector<8x16xf32> -> vector<8x16xf32>
    %700 = arith.addf %699, %606 : vector<8x16xf32>
    %cst_222 = arith.constant dense<0xFF800000> : vector<8xf32>
    %701 = vector.multi_reduction <maximumf>, %700, %cst_222 [1] : vector<8x16xf32> to vector<8xf32>
    %702 = vector.shape_cast %701 : vector<8xf32> to vector<8x1xf32>
    %703 = vector.broadcast %702 : vector<8x1xf32> to vector<8x16xf32>
    %704 = arith.subf %700, %703 : vector<8x16xf32>
    %705 = math.exp %704 : vector<8x16xf32>
    %cst_223 = arith.constant dense<0.000000e+00> : vector<8xf32>
    %706 = vector.multi_reduction <add>, %705, %cst_223 [1] : vector<8x16xf32> to vector<8xf32>
    %707 = vector.shape_cast %706 : vector<8xf32> to vector<8x1xf32>
    %708 = tpu.reciprocal %707 {approx = true} : vector<8x1xf32> -> vector<8x1xf32>
    %709 = vector.broadcast %708 : vector<8x1xf32> to vector<8x16xf32>
    %710 = arith.mulf %705, %709 : vector<8x16xf32>
    %711 = arith.truncf %710 : vector<8x16xf32> to vector<8x16xbf16>
    %712 = arith.truncf %696 : vector<16x8xf32> to vector<16x8xbf16>
    %cst_224 = arith.constant dense<0.000000e+00> : vector<8x8xf32>
    %713 = tpu.matmul %711, %712, %cst_224 {dimension_numbers = #tpu.dot_dimension_numbers<[1], [0], [0], [1], [0, 0, 1, 1], [], []>} : vector<8x16xbf16>, vector<16x8xbf16>, vector<8x8xf32> -> vector<8x8xf32>
    %714 = vector.extract_strided_slice %638 {offsets = [0, 24], sizes = [8, 8], strides = [1, 1]} : vector<8x32xf32> to vector<8x8xf32>
    %cst_225 = arith.constant 0.353553385 : f32
    %715 = vector.broadcast %cst_225 : f32 to vector<8x8xf32>
    %716 = arith.mulf %714, %715 : vector<8x8xf32>
    %717 = vector.extract_strided_slice %646 {offsets = [0, 24], sizes = [16, 8], strides = [1, 1]} : vector<16x32xf32> to vector<16x8xf32>
    %718 = vector.extract_strided_slice %647 {offsets = [0, 24], sizes = [16, 8], strides = [1, 1]} : vector<16x32xf32> to vector<16x8xf32>
    %719 = arith.truncf %716 : vector<8x8xf32> to vector<8x8xbf16>
    %720 = arith.truncf %717 : vector<16x8xf32> to vector<16x8xbf16>
    %cst_226 = arith.constant dense<0.000000e+00> : vector<8x16xf32>
    %721 = tpu.matmul %719, %720, %cst_226 {dimension_numbers = #tpu.dot_dimension_numbers<[1], [1], [0], [0], [0, 0, 1, 0], [], []>} : vector<8x8xbf16>, vector<16x8xbf16>, vector<8x16xf32> -> vector<8x16xf32>
    %722 = arith.addf %721, %606 : vector<8x16xf32>
    %cst_227 = arith.constant dense<0xFF800000> : vector<8xf32>
    %723 = vector.multi_reduction <maximumf>, %722, %cst_227 [1] : vector<8x16xf32> to vector<8xf32>
    %724 = vector.shape_cast %723 : vector<8xf32> to vector<8x1xf32>
    %725 = vector.broadcast %724 : vector<8x1xf32> to vector<8x16xf32>
    %726 = arith.subf %722, %725 : vector<8x16xf32>
    %727 = math.exp %726 : vector<8x16xf32>
    %cst_228 = arith.constant dense<0.000000e+00> : vector<8xf32>
    %728 = vector.multi_reduction <add>, %727, %cst_228 [1] : vector<8x16xf32> to vector<8xf32>
    %729 = vector.shape_cast %728 : vector<8xf32> to vector<8x1xf32>
    %730 = tpu.reciprocal %729 {approx = true} : vector<8x1xf32> -> vector<8x1xf32>
    %731 = vector.broadcast %730 : vector<8x1xf32> to vector<8x16xf32>
    %732 = arith.mulf %727, %731 : vector<8x16xf32>
    %733 = arith.truncf %732 : vector<8x16xf32> to vector<8x16xbf16>
    %734 = arith.truncf %718 : vector<16x8xf32> to vector<16x8xbf16>
    %cst_229 = arith.constant dense<0.000000e+00> : vector<8x8xf32>
    %735 = tpu.matmul %733, %734, %cst_229 {dimension_numbers = #tpu.dot_dimension_numbers<[1], [0], [0], [1], [0, 0, 1, 1], [], []>} : vector<8x16xbf16>, vector<16x8xbf16>, vector<8x8xf32> -> vector<8x8xf32>
    %736 = tpu.concatenate %669, %691, %713, %735 in 1 : vector<8x8xf32>, vector<8x8xf32>, vector<8x8xf32>, vector<8x8xf32> -> vector<8x32xf32>
    %c48_230 = arith.constant 48 : index
    %c0_231 = arith.constant 0 : index
    %737 = vector.load %arg4[%c48_230, %c0_231] : memref<504x128xf32, #tpu.memory_space<vmem>>, vector<32x32xf32>
    %738 = arith.truncf %736 : vector<8x32xf32> to vector<8x32xbf16>
    %739 = arith.truncf %737 : vector<32x32xf32> to vector<32x32xbf16>
    %cst_232 = arith.constant dense<0.000000e+00> : vector<8x32xf32>
    %740 = tpu.matmul %738, %739, %cst_232 {dimension_numbers = #tpu.dot_dimension_numbers<[1], [0], [0], [1], [0, 0, 1, 1], [], []>} : vector<8x32xbf16>, vector<32x32xbf16>, vector<8x32xf32> -> vector<8x32xf32>
    %c80_233 = arith.constant 80 : index
    %c0_234 = arith.constant 0 : index
    %741 = vector.load %arg4[%c80_233, %c0_234] : memref<504x128xf32, #tpu.memory_space<vmem>>, vector<1x32xf32>
    %742 = vector.broadcast %741 : vector<1x32xf32> to vector<8x32xf32>
    %743 = arith.addf %740, %742 : vector<8x32xf32>
    %744 = arith.addf %590, %743 : vector<8x32xf32>
    %c88_235 = arith.constant 88 : index
    %c0_236 = arith.constant 0 : index
    %745 = vector.load %arg4[%c88_235, %c0_236] : memref<504x128xf32, #tpu.memory_space<vmem>>, vector<2x32xf32>
    %746 = vector.extract_strided_slice %745 {offsets = [0, 0], sizes = [1, 32], strides = [1, 1]} : vector<2x32xf32> to vector<1x32xf32>
    %747 = vector.extract_strided_slice %745 {offsets = [1, 0], sizes = [1, 32], strides = [1, 1]} : vector<2x32xf32> to vector<1x32xf32>
    %cst_237 = arith.constant dense<0.000000e+00> : vector<8xf32>
    %748 = vector.multi_reduction <add>, %744, %cst_237 [1] : vector<8x32xf32> to vector<8xf32>
    %749 = vector.shape_cast %748 : vector<8xf32> to vector<8x1xf32>
    %cst_238 = arith.constant 3.200000e+01 : f32
    %750 = vector.broadcast %cst_238 : f32 to vector<8x1xf32>
    %751 = arith.divf %749, %750 : vector<8x1xf32>
    %752 = vector.broadcast %751 : vector<8x1xf32> to vector<8x32xf32>
    %753 = arith.subf %744, %752 : vector<8x32xf32>
    %754 = arith.mulf %753, %753 : vector<8x32xf32>
    %cst_239 = arith.constant dense<0.000000e+00> : vector<8xf32>
    %755 = vector.multi_reduction <add>, %754, %cst_239 [1] : vector<8x32xf32> to vector<8xf32>
    %756 = vector.shape_cast %755 : vector<8xf32> to vector<8x1xf32>
    %cst_240 = arith.constant 3.200000e+01 : f32
    %757 = vector.broadcast %cst_240 : f32 to vector<8x1xf32>
    %758 = arith.divf %756, %757 : vector<8x1xf32>
    %759 = vector.broadcast %751 : vector<8x1xf32> to vector<8x32xf32>
    %760 = arith.subf %744, %759 : vector<8x32xf32>
    %cst_241 = arith.constant 9.99999974E-6 : f32
    %761 = vector.broadcast %cst_241 : f32 to vector<8x1xf32>
    %762 = arith.addf %758, %761 : vector<8x1xf32>
    %763 = math.rsqrt %762 : vector<8x1xf32>
    %764 = vector.broadcast %763 : vector<8x1xf32> to vector<8x32xf32>
    %765 = arith.mulf %760, %764 : vector<8x32xf32>
    %766 = vector.broadcast %746 : vector<1x32xf32> to vector<8x32xf32>
    %767 = arith.mulf %765, %766 : vector<8x32xf32>
    %768 = vector.broadcast %747 : vector<1x32xf32> to vector<8x32xf32>
    %769 = arith.addf %767, %768 : vector<8x32xf32>
    %c96_242 = arith.constant 96 : index
    %c0_243 = arith.constant 0 : index
    %770 = vector.load %arg4[%c96_242, %c0_243] : memref<504x128xf32, #tpu.memory_space<vmem>>, vector<32x96xf32>
    %771 = arith.truncf %769 : vector<8x32xf32> to vector<8x32xbf16>
    %772 = arith.truncf %770 : vector<32x96xf32> to vector<32x96xbf16>
    %cst_244 = arith.constant dense<0.000000e+00> : vector<8x96xf32>
    %773 = tpu.matmul %771, %772, %cst_244 {dimension_numbers = #tpu.dot_dimension_numbers<[1], [0], [0], [1], [0, 0, 1, 1], [], []>} : vector<8x32xbf16>, vector<32x96xbf16>, vector<8x96xf32> -> vector<8x96xf32>
    %c128_245 = arith.constant 128 : index
    %c0_246 = arith.constant 0 : index
    %774 = vector.load %arg4[%c128_245, %c0_246] : memref<504x128xf32, #tpu.memory_space<vmem>>, vector<1x96xf32>
    %775 = vector.broadcast %774 : vector<1x96xf32> to vector<8x96xf32>
    %776 = arith.addf %773, %775 : vector<8x96xf32>
    %777 = vector.extract_strided_slice %776 {offsets = [0, 0], sizes = [8, 32], strides = [1, 1]} : vector<8x96xf32> to vector<8x32xf32>
    %778 = vector.extract_strided_slice %776 {offsets = [0, 32], sizes = [8, 32], strides = [1, 1]} : vector<8x96xf32> to vector<8x32xf32>
    %779 = vector.extract_strided_slice %776 {offsets = [0, 64], sizes = [8, 32], strides = [1, 1]} : vector<8x96xf32> to vector<8x32xf32>
    %780 = vector.extract_strided_slice %777 {offsets = [0, 0], sizes = [8, 8], strides = [1, 1]} : vector<8x32xf32> to vector<8x8xf32>
    %cst_247 = arith.constant 0.353553385 : f32
    %781 = vector.broadcast %cst_247 : f32 to vector<8x8xf32>
    %782 = arith.mulf %780, %781 : vector<8x8xf32>
    %783 = vector.extract_strided_slice %778 {offsets = [0, 0], sizes = [8, 8], strides = [1, 1]} : vector<8x32xf32> to vector<8x8xf32>
    %784 = vector.extract_strided_slice %779 {offsets = [0, 0], sizes = [8, 8], strides = [1, 1]} : vector<8x32xf32> to vector<8x8xf32>
    %785 = arith.truncf %782 : vector<8x8xf32> to vector<8x8xbf16>
    %786 = arith.truncf %783 : vector<8x8xf32> to vector<8x8xbf16>
    %cst_248 = arith.constant dense<0.000000e+00> : vector<8x8xf32>
    %787 = tpu.matmul %785, %786, %cst_248 {dimension_numbers = #tpu.dot_dimension_numbers<[1], [1], [0], [0], [0, 0, 1, 0], [], []>} : vector<8x8xbf16>, vector<8x8xbf16>, vector<8x8xf32> -> vector<8x8xf32>
    %cst_249 = arith.constant dense<0xFF800000> : vector<8xf32>
    %788 = vector.multi_reduction <maximumf>, %787, %cst_249 [1] : vector<8x8xf32> to vector<8xf32>
    %789 = vector.shape_cast %788 : vector<8xf32> to vector<8x1xf32>
    %790 = vector.broadcast %789 : vector<8x1xf32> to vector<8x8xf32>
    %791 = arith.subf %787, %790 : vector<8x8xf32>
    %792 = math.exp %791 : vector<8x8xf32>
    %cst_250 = arith.constant dense<0.000000e+00> : vector<8xf32>
    %793 = vector.multi_reduction <add>, %792, %cst_250 [1] : vector<8x8xf32> to vector<8xf32>
    %794 = vector.shape_cast %793 : vector<8xf32> to vector<8x1xf32>
    %795 = tpu.reciprocal %794 {approx = true} : vector<8x1xf32> -> vector<8x1xf32>
    %796 = vector.broadcast %795 : vector<8x1xf32> to vector<8x8xf32>
    %797 = arith.mulf %792, %796 : vector<8x8xf32>
    %798 = arith.truncf %797 : vector<8x8xf32> to vector<8x8xbf16>
    %799 = arith.truncf %784 : vector<8x8xf32> to vector<8x8xbf16>
    %cst_251 = arith.constant dense<0.000000e+00> : vector<8x8xf32>
    %800 = tpu.matmul %798, %799, %cst_251 {dimension_numbers = #tpu.dot_dimension_numbers<[1], [0], [0], [1], [0, 0, 1, 1], [], []>} : vector<8x8xbf16>, vector<8x8xbf16>, vector<8x8xf32> -> vector<8x8xf32>
    %801 = vector.extract_strided_slice %777 {offsets = [0, 8], sizes = [8, 8], strides = [1, 1]} : vector<8x32xf32> to vector<8x8xf32>
    %cst_252 = arith.constant 0.353553385 : f32
    %802 = vector.broadcast %cst_252 : f32 to vector<8x8xf32>
    %803 = arith.mulf %801, %802 : vector<8x8xf32>
    %804 = vector.extract_strided_slice %778 {offsets = [0, 8], sizes = [8, 8], strides = [1, 1]} : vector<8x32xf32> to vector<8x8xf32>
    %805 = vector.extract_strided_slice %779 {offsets = [0, 8], sizes = [8, 8], strides = [1, 1]} : vector<8x32xf32> to vector<8x8xf32>
    %806 = arith.truncf %803 : vector<8x8xf32> to vector<8x8xbf16>
    %807 = arith.truncf %804 : vector<8x8xf32> to vector<8x8xbf16>
    %cst_253 = arith.constant dense<0.000000e+00> : vector<8x8xf32>
    %808 = tpu.matmul %806, %807, %cst_253 {dimension_numbers = #tpu.dot_dimension_numbers<[1], [1], [0], [0], [0, 0, 1, 0], [], []>} : vector<8x8xbf16>, vector<8x8xbf16>, vector<8x8xf32> -> vector<8x8xf32>
    %cst_254 = arith.constant dense<0xFF800000> : vector<8xf32>
    %809 = vector.multi_reduction <maximumf>, %808, %cst_254 [1] : vector<8x8xf32> to vector<8xf32>
    %810 = vector.shape_cast %809 : vector<8xf32> to vector<8x1xf32>
    %811 = vector.broadcast %810 : vector<8x1xf32> to vector<8x8xf32>
    %812 = arith.subf %808, %811 : vector<8x8xf32>
    %813 = math.exp %812 : vector<8x8xf32>
    %cst_255 = arith.constant dense<0.000000e+00> : vector<8xf32>
    %814 = vector.multi_reduction <add>, %813, %cst_255 [1] : vector<8x8xf32> to vector<8xf32>
    %815 = vector.shape_cast %814 : vector<8xf32> to vector<8x1xf32>
    %816 = tpu.reciprocal %815 {approx = true} : vector<8x1xf32> -> vector<8x1xf32>
    %817 = vector.broadcast %816 : vector<8x1xf32> to vector<8x8xf32>
    %818 = arith.mulf %813, %817 : vector<8x8xf32>
    %819 = arith.truncf %818 : vector<8x8xf32> to vector<8x8xbf16>
    %820 = arith.truncf %805 : vector<8x8xf32> to vector<8x8xbf16>
    %cst_256 = arith.constant dense<0.000000e+00> : vector<8x8xf32>
    %821 = tpu.matmul %819, %820, %cst_256 {dimension_numbers = #tpu.dot_dimension_numbers<[1], [0], [0], [1], [0, 0, 1, 1], [], []>} : vector<8x8xbf16>, vector<8x8xbf16>, vector<8x8xf32> -> vector<8x8xf32>
    %822 = vector.extract_strided_slice %777 {offsets = [0, 16], sizes = [8, 8], strides = [1, 1]} : vector<8x32xf32> to vector<8x8xf32>
    %cst_257 = arith.constant 0.353553385 : f32
    %823 = vector.broadcast %cst_257 : f32 to vector<8x8xf32>
    %824 = arith.mulf %822, %823 : vector<8x8xf32>
    %825 = vector.extract_strided_slice %778 {offsets = [0, 16], sizes = [8, 8], strides = [1, 1]} : vector<8x32xf32> to vector<8x8xf32>
    %826 = vector.extract_strided_slice %779 {offsets = [0, 16], sizes = [8, 8], strides = [1, 1]} : vector<8x32xf32> to vector<8x8xf32>
    %827 = arith.truncf %824 : vector<8x8xf32> to vector<8x8xbf16>
    %828 = arith.truncf %825 : vector<8x8xf32> to vector<8x8xbf16>
    %cst_258 = arith.constant dense<0.000000e+00> : vector<8x8xf32>
    %829 = tpu.matmul %827, %828, %cst_258 {dimension_numbers = #tpu.dot_dimension_numbers<[1], [1], [0], [0], [0, 0, 1, 0], [], []>} : vector<8x8xbf16>, vector<8x8xbf16>, vector<8x8xf32> -> vector<8x8xf32>
    %cst_259 = arith.constant dense<0xFF800000> : vector<8xf32>
    %830 = vector.multi_reduction <maximumf>, %829, %cst_259 [1] : vector<8x8xf32> to vector<8xf32>
    %831 = vector.shape_cast %830 : vector<8xf32> to vector<8x1xf32>
    %832 = vector.broadcast %831 : vector<8x1xf32> to vector<8x8xf32>
    %833 = arith.subf %829, %832 : vector<8x8xf32>
    %834 = math.exp %833 : vector<8x8xf32>
    %cst_260 = arith.constant dense<0.000000e+00> : vector<8xf32>
    %835 = vector.multi_reduction <add>, %834, %cst_260 [1] : vector<8x8xf32> to vector<8xf32>
    %836 = vector.shape_cast %835 : vector<8xf32> to vector<8x1xf32>
    %837 = tpu.reciprocal %836 {approx = true} : vector<8x1xf32> -> vector<8x1xf32>
    %838 = vector.broadcast %837 : vector<8x1xf32> to vector<8x8xf32>
    %839 = arith.mulf %834, %838 : vector<8x8xf32>
    %840 = arith.truncf %839 : vector<8x8xf32> to vector<8x8xbf16>
    %841 = arith.truncf %826 : vector<8x8xf32> to vector<8x8xbf16>
    %cst_261 = arith.constant dense<0.000000e+00> : vector<8x8xf32>
    %842 = tpu.matmul %840, %841, %cst_261 {dimension_numbers = #tpu.dot_dimension_numbers<[1], [0], [0], [1], [0, 0, 1, 1], [], []>} : vector<8x8xbf16>, vector<8x8xbf16>, vector<8x8xf32> -> vector<8x8xf32>
    %843 = vector.extract_strided_slice %777 {offsets = [0, 24], sizes = [8, 8], strides = [1, 1]} : vector<8x32xf32> to vector<8x8xf32>
    %cst_262 = arith.constant 0.353553385 : f32
    %844 = vector.broadcast %cst_262 : f32 to vector<8x8xf32>
    %845 = arith.mulf %843, %844 : vector<8x8xf32>
    %846 = vector.extract_strided_slice %778 {offsets = [0, 24], sizes = [8, 8], strides = [1, 1]} : vector<8x32xf32> to vector<8x8xf32>
    %847 = vector.extract_strided_slice %779 {offsets = [0, 24], sizes = [8, 8], strides = [1, 1]} : vector<8x32xf32> to vector<8x8xf32>
    %848 = arith.truncf %845 : vector<8x8xf32> to vector<8x8xbf16>
    %849 = arith.truncf %846 : vector<8x8xf32> to vector<8x8xbf16>
    %cst_263 = arith.constant dense<0.000000e+00> : vector<8x8xf32>
    %850 = tpu.matmul %848, %849, %cst_263 {dimension_numbers = #tpu.dot_dimension_numbers<[1], [1], [0], [0], [0, 0, 1, 0], [], []>} : vector<8x8xbf16>, vector<8x8xbf16>, vector<8x8xf32> -> vector<8x8xf32>
    %cst_264 = arith.constant dense<0xFF800000> : vector<8xf32>
    %851 = vector.multi_reduction <maximumf>, %850, %cst_264 [1] : vector<8x8xf32> to vector<8xf32>
    %852 = vector.shape_cast %851 : vector<8xf32> to vector<8x1xf32>
    %853 = vector.broadcast %852 : vector<8x1xf32> to vector<8x8xf32>
    %854 = arith.subf %850, %853 : vector<8x8xf32>
    %855 = math.exp %854 : vector<8x8xf32>
    %cst_265 = arith.constant dense<0.000000e+00> : vector<8xf32>
    %856 = vector.multi_reduction <add>, %855, %cst_265 [1] : vector<8x8xf32> to vector<8xf32>
    %857 = vector.shape_cast %856 : vector<8xf32> to vector<8x1xf32>
    %858 = tpu.reciprocal %857 {approx = true} : vector<8x1xf32> -> vector<8x1xf32>
    %859 = vector.broadcast %858 : vector<8x1xf32> to vector<8x8xf32>
    %860 = arith.mulf %855, %859 : vector<8x8xf32>
    %861 = arith.truncf %860 : vector<8x8xf32> to vector<8x8xbf16>
    %862 = arith.truncf %847 : vector<8x8xf32> to vector<8x8xbf16>
    %cst_266 = arith.constant dense<0.000000e+00> : vector<8x8xf32>
    %863 = tpu.matmul %861, %862, %cst_266 {dimension_numbers = #tpu.dot_dimension_numbers<[1], [0], [0], [1], [0, 0, 1, 1], [], []>} : vector<8x8xbf16>, vector<8x8xbf16>, vector<8x8xf32> -> vector<8x8xf32>
    %864 = tpu.concatenate %800, %821, %842, %863 in 1 : vector<8x8xf32>, vector<8x8xf32>, vector<8x8xf32>, vector<8x8xf32> -> vector<8x32xf32>
    %c136_267 = arith.constant 136 : index
    %c0_268 = arith.constant 0 : index
    %865 = vector.load %arg4[%c136_267, %c0_268] : memref<504x128xf32, #tpu.memory_space<vmem>>, vector<32x32xf32>
    %866 = arith.truncf %864 : vector<8x32xf32> to vector<8x32xbf16>
    %867 = arith.truncf %865 : vector<32x32xf32> to vector<32x32xbf16>
    %cst_269 = arith.constant dense<0.000000e+00> : vector<8x32xf32>
    %868 = tpu.matmul %866, %867, %cst_269 {dimension_numbers = #tpu.dot_dimension_numbers<[1], [0], [0], [1], [0, 0, 1, 1], [], []>} : vector<8x32xbf16>, vector<32x32xbf16>, vector<8x32xf32> -> vector<8x32xf32>
    %c168_270 = arith.constant 168 : index
    %c0_271 = arith.constant 0 : index
    %869 = vector.load %arg4[%c168_270, %c0_271] : memref<504x128xf32, #tpu.memory_space<vmem>>, vector<1x32xf32>
    %870 = vector.broadcast %869 : vector<1x32xf32> to vector<8x32xf32>
    %871 = arith.addf %868, %870 : vector<8x32xf32>
    %872 = arith.addf %744, %871 : vector<8x32xf32>
    %c176_272 = arith.constant 176 : index
    %c0_273 = arith.constant 0 : index
    %873 = vector.load %arg4[%c176_272, %c0_273] : memref<504x128xf32, #tpu.memory_space<vmem>>, vector<2x32xf32>
    %874 = vector.extract_strided_slice %873 {offsets = [0, 0], sizes = [1, 32], strides = [1, 1]} : vector<2x32xf32> to vector<1x32xf32>
    %875 = vector.extract_strided_slice %873 {offsets = [1, 0], sizes = [1, 32], strides = [1, 1]} : vector<2x32xf32> to vector<1x32xf32>
    %cst_274 = arith.constant dense<0.000000e+00> : vector<8xf32>
    %876 = vector.multi_reduction <add>, %872, %cst_274 [1] : vector<8x32xf32> to vector<8xf32>
    %877 = vector.shape_cast %876 : vector<8xf32> to vector<8x1xf32>
    %cst_275 = arith.constant 3.200000e+01 : f32
    %878 = vector.broadcast %cst_275 : f32 to vector<8x1xf32>
    %879 = arith.divf %877, %878 : vector<8x1xf32>
    %880 = vector.broadcast %879 : vector<8x1xf32> to vector<8x32xf32>
    %881 = arith.subf %872, %880 : vector<8x32xf32>
    %882 = arith.mulf %881, %881 : vector<8x32xf32>
    %cst_276 = arith.constant dense<0.000000e+00> : vector<8xf32>
    %883 = vector.multi_reduction <add>, %882, %cst_276 [1] : vector<8x32xf32> to vector<8xf32>
    %884 = vector.shape_cast %883 : vector<8xf32> to vector<8x1xf32>
    %cst_277 = arith.constant 3.200000e+01 : f32
    %885 = vector.broadcast %cst_277 : f32 to vector<8x1xf32>
    %886 = arith.divf %884, %885 : vector<8x1xf32>
    %887 = vector.broadcast %879 : vector<8x1xf32> to vector<8x32xf32>
    %888 = arith.subf %872, %887 : vector<8x32xf32>
    %cst_278 = arith.constant 9.99999974E-6 : f32
    %889 = vector.broadcast %cst_278 : f32 to vector<8x1xf32>
    %890 = arith.addf %886, %889 : vector<8x1xf32>
    %891 = math.rsqrt %890 : vector<8x1xf32>
    %892 = vector.broadcast %891 : vector<8x1xf32> to vector<8x32xf32>
    %893 = arith.mulf %888, %892 : vector<8x32xf32>
    %894 = vector.broadcast %874 : vector<1x32xf32> to vector<8x32xf32>
    %895 = arith.mulf %893, %894 : vector<8x32xf32>
    %896 = vector.broadcast %875 : vector<1x32xf32> to vector<8x32xf32>
    %897 = arith.addf %895, %896 : vector<8x32xf32>
    %c184_279 = arith.constant 184 : index
    %c0_280 = arith.constant 0 : index
    %898 = vector.load %arg4[%c184_279, %c0_280] : memref<504x128xf32, #tpu.memory_space<vmem>>, vector<32x64xf32>
    %899 = arith.truncf %897 : vector<8x32xf32> to vector<8x32xbf16>
    %900 = arith.truncf %898 : vector<32x64xf32> to vector<32x64xbf16>
    %cst_281 = arith.constant dense<0.000000e+00> : vector<8x64xf32>
    %901 = tpu.matmul %899, %900, %cst_281 {dimension_numbers = #tpu.dot_dimension_numbers<[1], [0], [0], [1], [0, 0, 1, 1], [], []>} : vector<8x32xbf16>, vector<32x64xbf16>, vector<8x64xf32> -> vector<8x64xf32>
    %c216_282 = arith.constant 216 : index
    %c0_283 = arith.constant 0 : index
    %902 = vector.load %arg4[%c216_282, %c0_283] : memref<504x128xf32, #tpu.memory_space<vmem>>, vector<1x64xf32>
    %903 = vector.broadcast %902 : vector<1x64xf32> to vector<8x64xf32>
    %904 = arith.addf %901, %903 : vector<8x64xf32>
    %cst_284 = arith.constant 5.000000e-01 : f32
    %905 = vector.broadcast %cst_284 : f32 to vector<8x64xf32>
    %906 = arith.mulf %905, %904 : vector<8x64xf32>
    %cst_285 = arith.constant 0.707106769 : f32
    %907 = vector.broadcast %cst_285 : f32 to vector<8x64xf32>
    %908 = arith.mulf %904, %907 : vector<8x64xf32>
    %909 = math.absf %908 : vector<8x64xf32>
    %cst_286 = arith.constant 0.327591091 : f32
    %910 = vector.broadcast %cst_286 : f32 to vector<8x64xf32>
    %911 = arith.mulf %910, %909 : vector<8x64xf32>
    %cst_287 = arith.constant 1.000000e+00 : f32
    %912 = vector.broadcast %cst_287 : f32 to vector<8x64xf32>
    %913 = arith.addf %912, %911 : vector<8x64xf32>
    %cst_288 = arith.constant 1.000000e+00 : f32
    %914 = vector.broadcast %cst_288 : f32 to vector<8x64xf32>
    %915 = arith.divf %914, %913 : vector<8x64xf32>
    %cst_289 = arith.constant 1.06140542 : f32
    %916 = vector.broadcast %cst_289 : f32 to vector<8x64xf32>
    %917 = arith.mulf %916, %915 : vector<8x64xf32>
    %cst_290 = arith.constant 1.45315206 : f32
    %918 = vector.broadcast %cst_290 : f32 to vector<8x64xf32>
    %919 = arith.subf %917, %918 : vector<8x64xf32>
    %920 = arith.mulf %919, %915 : vector<8x64xf32>
    %cst_291 = arith.constant 1.42141378 : f32
    %921 = vector.broadcast %cst_291 : f32 to vector<8x64xf32>
    %922 = arith.addf %920, %921 : vector<8x64xf32>
    %923 = arith.mulf %922, %915 : vector<8x64xf32>
    %cst_292 = arith.constant 0.284496725 : f32
    %924 = vector.broadcast %cst_292 : f32 to vector<8x64xf32>
    %925 = arith.subf %923, %924 : vector<8x64xf32>
    %926 = arith.mulf %925, %915 : vector<8x64xf32>
    %cst_293 = arith.constant 0.254829586 : f32
    %927 = vector.broadcast %cst_293 : f32 to vector<8x64xf32>
    %928 = arith.addf %926, %927 : vector<8x64xf32>
    %929 = arith.mulf %928, %915 : vector<8x64xf32>
    %cst_294 = arith.constant 0.000000e+00 : f32
    %930 = vector.broadcast %cst_294 : f32 to vector<8x64xf32>
    %931 = arith.subf %930, %909 : vector<8x64xf32>
    %932 = arith.mulf %931, %909 : vector<8x64xf32>
    %933 = math.exp %932 : vector<8x64xf32>
    %934 = arith.mulf %929, %933 : vector<8x64xf32>
    %cst_295 = arith.constant 1.000000e+00 : f32
    %935 = vector.broadcast %cst_295 : f32 to vector<8x64xf32>
    %936 = arith.subf %935, %934 : vector<8x64xf32>
    %cst_296 = arith.constant 0.000000e+00 : f32
    %937 = vector.broadcast %cst_296 : f32 to vector<8x64xf32>
    %938 = arith.cmpf olt, %908, %937 : vector<8x64xf32>
    %cst_297 = arith.constant 0.000000e+00 : f32
    %939 = vector.broadcast %cst_297 : f32 to vector<8x64xf32>
    %940 = arith.subf %939, %936 : vector<8x64xf32>
    %941 = arith.select %938, %940, %936 : vector<8x64xi1>, vector<8x64xf32>
    %cst_298 = arith.constant 1.000000e+00 : f32
    %942 = vector.broadcast %cst_298 : f32 to vector<8x64xf32>
    %943 = arith.addf %942, %941 : vector<8x64xf32>
    %944 = arith.mulf %906, %943 : vector<8x64xf32>
    %c224_299 = arith.constant 224 : index
    %c0_300 = arith.constant 0 : index
    %945 = vector.load %arg4[%c224_299, %c0_300] : memref<504x128xf32, #tpu.memory_space<vmem>>, vector<64x32xf32>
    %946 = arith.truncf %944 : vector<8x64xf32> to vector<8x64xbf16>
    %947 = arith.truncf %945 : vector<64x32xf32> to vector<64x32xbf16>
    %cst_301 = arith.constant dense<0.000000e+00> : vector<8x32xf32>
    %948 = tpu.matmul %946, %947, %cst_301 {dimension_numbers = #tpu.dot_dimension_numbers<[1], [0], [0], [1], [0, 0, 1, 1], [], []>} : vector<8x64xbf16>, vector<64x32xbf16>, vector<8x32xf32> -> vector<8x32xf32>
    %949 = arith.addf %872, %948 : vector<8x32xf32>
    %c288_302 = arith.constant 288 : index
    %c0_303 = arith.constant 0 : index
    %950 = vector.load %arg4[%c288_302, %c0_303] : memref<504x128xf32, #tpu.memory_space<vmem>>, vector<1x32xf32>
    %951 = vector.broadcast %950 : vector<1x32xf32> to vector<8x32xf32>
    %952 = arith.addf %949, %951 : vector<8x32xf32>
    %c1_304 = arith.constant 1 : index
    %c0_305 = arith.constant 0 : index
    %c0_306 = arith.constant 0 : index
    %953 = vector.load %arg5[%c1_304, %c0_305, %c0_306] : memref<2x8x32xf32, #tpu.memory_space<vmem>>, vector<1x8x32xf32>
    %954 = vector.shape_cast %953 : vector<1x8x32xf32> to vector<8x32xf32>
    %955 = vector.shape_cast %952 : vector<8x32xf32> to vector<1x8x32xf32>
    tpu.vector_store %arg5[%c1_304, %c0_305, %c0_306], %955 {strides = array<i32>} : memref<2x8x32xf32, #tpu.memory_space<vmem>>, vector<1x8x32xf32>,
    %956 = tpu.transpose %606, [1, 0] : vector<8x16xf32> -> vector<16x8xf32>
    %c296_307 = arith.constant 296 : index
    %c0_308 = arith.constant 0 : index
    %957 = vector.load %arg4[%c296_307, %c0_308] : memref<504x128xf32, #tpu.memory_space<vmem>>, vector<2x32xf32>
    %958 = vector.extract_strided_slice %957 {offsets = [0, 0], sizes = [1, 32], strides = [1, 1]} : vector<2x32xf32> to vector<1x32xf32>
    %959 = vector.extract_strided_slice %957 {offsets = [1, 0], sizes = [1, 32], strides = [1, 1]} : vector<2x32xf32> to vector<1x32xf32>
    %cst_309 = arith.constant dense<0.000000e+00> : vector<16xf32>
    %960 = vector.multi_reduction <add>, %592, %cst_309 [1] : vector<16x32xf32> to vector<16xf32>
    %961 = vector.shape_cast %960 : vector<16xf32> to vector<16x1xf32>
    %cst_310 = arith.constant 3.200000e+01 : f32
    %962 = vector.broadcast %cst_310 : f32 to vector<16x1xf32>
    %963 = arith.divf %961, %962 : vector<16x1xf32>
    %964 = vector.broadcast %963 : vector<16x1xf32> to vector<16x32xf32>
    %965 = arith.subf %592, %964 : vector<16x32xf32>
    %966 = arith.mulf %965, %965 : vector<16x32xf32>
    %cst_311 = arith.constant dense<0.000000e+00> : vector<16xf32>
    %967 = vector.multi_reduction <add>, %966, %cst_311 [1] : vector<16x32xf32> to vector<16xf32>
    %968 = vector.shape_cast %967 : vector<16xf32> to vector<16x1xf32>
    %cst_312 = arith.constant 3.200000e+01 : f32
    %969 = vector.broadcast %cst_312 : f32 to vector<16x1xf32>
    %970 = arith.divf %968, %969 : vector<16x1xf32>
    %971 = vector.broadcast %963 : vector<16x1xf32> to vector<16x32xf32>
    %972 = arith.subf %592, %971 : vector<16x32xf32>
    %cst_313 = arith.constant 9.99999974E-6 : f32
    %973 = vector.broadcast %cst_313 : f32 to vector<16x1xf32>
    %974 = arith.addf %970, %973 : vector<16x1xf32>
    %975 = math.rsqrt %974 : vector<16x1xf32>
    %976 = vector.broadcast %975 : vector<16x1xf32> to vector<16x32xf32>
    %977 = arith.mulf %972, %976 : vector<16x32xf32>
    %978 = vector.broadcast %958 : vector<1x32xf32> to vector<16x32xf32>
    %979 = arith.mulf %977, %978 : vector<16x32xf32>
    %980 = vector.broadcast %959 : vector<1x32xf32> to vector<16x32xf32>
    %981 = arith.addf %979, %980 : vector<16x32xf32>
    %c304_314 = arith.constant 304 : index
    %c0_315 = arith.constant 0 : index
    %982 = vector.load %arg4[%c304_314, %c0_315] : memref<504x128xf32, #tpu.memory_space<vmem>>, vector<32x32xf32>
    %983 = arith.truncf %981 : vector<16x32xf32> to vector<16x32xbf16>
    %984 = arith.truncf %982 : vector<32x32xf32> to vector<32x32xbf16>
    %cst_316 = arith.constant dense<0.000000e+00> : vector<16x32xf32>
    %985 = tpu.matmul %983, %984, %cst_316 {dimension_numbers = #tpu.dot_dimension_numbers<[1], [0], [0], [1], [0, 0, 1, 1], [], []>} : vector<16x32xbf16>, vector<32x32xbf16>, vector<16x32xf32> -> vector<16x32xf32>
    %c336_317 = arith.constant 336 : index
    %c0_318 = arith.constant 0 : index
    %986 = vector.load %arg4[%c336_317, %c0_318] : memref<504x128xf32, #tpu.memory_space<vmem>>, vector<1x32xf32>
    %987 = vector.broadcast %986 : vector<1x32xf32> to vector<16x32xf32>
    %988 = arith.addf %985, %987 : vector<16x32xf32>
    %c304_319 = arith.constant 304 : index
    %c32_320 = arith.constant 32 : index
    %989 = vector.load %arg4[%c304_319, %c32_320] : memref<504x128xf32, #tpu.memory_space<vmem>>, vector<32x64xf32>
    %990 = arith.truncf %952 : vector<8x32xf32> to vector<8x32xbf16>
    %991 = arith.truncf %989 : vector<32x64xf32> to vector<32x64xbf16>
    %cst_321 = arith.constant dense<0.000000e+00> : vector<8x64xf32>
    %992 = tpu.matmul %990, %991, %cst_321 {dimension_numbers = #tpu.dot_dimension_numbers<[1], [0], [0], [1], [0, 0, 1, 1], [], []>} : vector<8x32xbf16>, vector<32x64xbf16>, vector<8x64xf32> -> vector<8x64xf32>
    %c336_322 = arith.constant 336 : index
    %c32_323 = arith.constant 32 : index
    %993 = vector.load %arg4[%c336_322, %c32_323] : memref<504x128xf32, #tpu.memory_space<vmem>>, vector<1x64xf32>
    %994 = vector.broadcast %993 : vector<1x64xf32> to vector<8x64xf32>
    %995 = arith.addf %992, %994 : vector<8x64xf32>
    %996 = vector.extract_strided_slice %995 {offsets = [0, 0], sizes = [8, 32], strides = [1, 1]} : vector<8x64xf32> to vector<8x32xf32>
    %997 = vector.extract_strided_slice %995 {offsets = [0, 32], sizes = [8, 32], strides = [1, 1]} : vector<8x64xf32> to vector<8x32xf32>
    %998 = vector.extract_strided_slice %988 {offsets = [0, 0], sizes = [16, 8], strides = [1, 1]} : vector<16x32xf32> to vector<16x8xf32>
    %cst_324 = arith.constant 0.353553385 : f32
    %999 = vector.broadcast %cst_324 : f32 to vector<16x8xf32>
    %1000 = arith.mulf %998, %999 : vector<16x8xf32>
    %1001 = vector.extract_strided_slice %996 {offsets = [0, 0], sizes = [8, 8], strides = [1, 1]} : vector<8x32xf32> to vector<8x8xf32>
    %1002 = vector.extract_strided_slice %997 {offsets = [0, 0], sizes = [8, 8], strides = [1, 1]} : vector<8x32xf32> to vector<8x8xf32>
    %1003 = arith.truncf %1000 : vector<16x8xf32> to vector<16x8xbf16>
    %1004 = arith.truncf %1001 : vector<8x8xf32> to vector<8x8xbf16>
    %cst_325 = arith.constant dense<0.000000e+00> : vector<16x8xf32>
    %1005 = tpu.matmul %1003, %1004, %cst_325 {dimension_numbers = #tpu.dot_dimension_numbers<[1], [1], [0], [0], [0, 0, 1, 0], [], []>} : vector<16x8xbf16>, vector<8x8xbf16>, vector<16x8xf32> -> vector<16x8xf32>
    %1006 = arith.addf %1005, %956 : vector<16x8xf32>
    %cst_326 = arith.constant dense<0xFF800000> : vector<16xf32>
    %1007 = vector.multi_reduction <maximumf>, %1006, %cst_326 [1] : vector<16x8xf32> to vector<16xf32>
    %1008 = vector.shape_cast %1007 : vector<16xf32> to vector<16x1xf32>
    %1009 = vector.broadcast %1008 : vector<16x1xf32> to vector<16x8xf32>
    %1010 = arith.subf %1006, %1009 : vector<16x8xf32>
    %1011 = math.exp %1010 : vector<16x8xf32>
    %cst_327 = arith.constant dense<0.000000e+00> : vector<16xf32>
    %1012 = vector.multi_reduction <add>, %1011, %cst_327 [1] : vector<16x8xf32> to vector<16xf32>
    %1013 = vector.shape_cast %1012 : vector<16xf32> to vector<16x1xf32>
    %1014 = tpu.reciprocal %1013 {approx = true} : vector<16x1xf32> -> vector<16x1xf32>
    %1015 = vector.broadcast %1014 : vector<16x1xf32> to vector<16x8xf32>
    %1016 = arith.mulf %1011, %1015 : vector<16x8xf32>
    %1017 = arith.truncf %1016 : vector<16x8xf32> to vector<16x8xbf16>
    %1018 = arith.truncf %1002 : vector<8x8xf32> to vector<8x8xbf16>
    %cst_328 = arith.constant dense<0.000000e+00> : vector<16x8xf32>
    %1019 = tpu.matmul %1017, %1018, %cst_328 {dimension_numbers = #tpu.dot_dimension_numbers<[1], [0], [0], [1], [0, 0, 1, 1], [], []>} : vector<16x8xbf16>, vector<8x8xbf16>, vector<16x8xf32> -> vector<16x8xf32>
    %1020 = vector.extract_strided_slice %988 {offsets = [0, 8], sizes = [16, 8], strides = [1, 1]} : vector<16x32xf32> to vector<16x8xf32>
    %cst_329 = arith.constant 0.353553385 : f32
    %1021 = vector.broadcast %cst_329 : f32 to vector<16x8xf32>
    %1022 = arith.mulf %1020, %1021 : vector<16x8xf32>
    %1023 = vector.extract_strided_slice %996 {offsets = [0, 8], sizes = [8, 8], strides = [1, 1]} : vector<8x32xf32> to vector<8x8xf32>
    %1024 = vector.extract_strided_slice %997 {offsets = [0, 8], sizes = [8, 8], strides = [1, 1]} : vector<8x32xf32> to vector<8x8xf32>
    %1025 = arith.truncf %1022 : vector<16x8xf32> to vector<16x8xbf16>
    %1026 = arith.truncf %1023 : vector<8x8xf32> to vector<8x8xbf16>
    %cst_330 = arith.constant dense<0.000000e+00> : vector<16x8xf32>
    %1027 = tpu.matmul %1025, %1026, %cst_330 {dimension_numbers = #tpu.dot_dimension_numbers<[1], [1], [0], [0], [0, 0, 1, 0], [], []>} : vector<16x8xbf16>, vector<8x8xbf16>, vector<16x8xf32> -> vector<16x8xf32>
    %1028 = arith.addf %1027, %956 : vector<16x8xf32>
    %cst_331 = arith.constant dense<0xFF800000> : vector<16xf32>
    %1029 = vector.multi_reduction <maximumf>, %1028, %cst_331 [1] : vector<16x8xf32> to vector<16xf32>
    %1030 = vector.shape_cast %1029 : vector<16xf32> to vector<16x1xf32>
    %1031 = vector.broadcast %1030 : vector<16x1xf32> to vector<16x8xf32>
    %1032 = arith.subf %1028, %1031 : vector<16x8xf32>
    %1033 = math.exp %1032 : vector<16x8xf32>
    %cst_332 = arith.constant dense<0.000000e+00> : vector<16xf32>
    %1034 = vector.multi_reduction <add>, %1033, %cst_332 [1] : vector<16x8xf32> to vector<16xf32>
    %1035 = vector.shape_cast %1034 : vector<16xf32> to vector<16x1xf32>
    %1036 = tpu.reciprocal %1035 {approx = true} : vector<16x1xf32> -> vector<16x1xf32>
    %1037 = vector.broadcast %1036 : vector<16x1xf32> to vector<16x8xf32>
    %1038 = arith.mulf %1033, %1037 : vector<16x8xf32>
    %1039 = arith.truncf %1038 : vector<16x8xf32> to vector<16x8xbf16>
    %1040 = arith.truncf %1024 : vector<8x8xf32> to vector<8x8xbf16>
    %cst_333 = arith.constant dense<0.000000e+00> : vector<16x8xf32>
    %1041 = tpu.matmul %1039, %1040, %cst_333 {dimension_numbers = #tpu.dot_dimension_numbers<[1], [0], [0], [1], [0, 0, 1, 1], [], []>} : vector<16x8xbf16>, vector<8x8xbf16>, vector<16x8xf32> -> vector<16x8xf32>
    %1042 = vector.extract_strided_slice %988 {offsets = [0, 16], sizes = [16, 8], strides = [1, 1]} : vector<16x32xf32> to vector<16x8xf32>
    %cst_334 = arith.constant 0.353553385 : f32
    %1043 = vector.broadcast %cst_334 : f32 to vector<16x8xf32>
    %1044 = arith.mulf %1042, %1043 : vector<16x8xf32>
    %1045 = vector.extract_strided_slice %996 {offsets = [0, 16], sizes = [8, 8], strides = [1, 1]} : vector<8x32xf32> to vector<8x8xf32>
    %1046 = vector.extract_strided_slice %997 {offsets = [0, 16], sizes = [8, 8], strides = [1, 1]} : vector<8x32xf32> to vector<8x8xf32>
    %1047 = arith.truncf %1044 : vector<16x8xf32> to vector<16x8xbf16>
    %1048 = arith.truncf %1045 : vector<8x8xf32> to vector<8x8xbf16>
    %cst_335 = arith.constant dense<0.000000e+00> : vector<16x8xf32>
    %1049 = tpu.matmul %1047, %1048, %cst_335 {dimension_numbers = #tpu.dot_dimension_numbers<[1], [1], [0], [0], [0, 0, 1, 0], [], []>} : vector<16x8xbf16>, vector<8x8xbf16>, vector<16x8xf32> -> vector<16x8xf32>
    %1050 = arith.addf %1049, %956 : vector<16x8xf32>
    %cst_336 = arith.constant dense<0xFF800000> : vector<16xf32>
    %1051 = vector.multi_reduction <maximumf>, %1050, %cst_336 [1] : vector<16x8xf32> to vector<16xf32>
    %1052 = vector.shape_cast %1051 : vector<16xf32> to vector<16x1xf32>
    %1053 = vector.broadcast %1052 : vector<16x1xf32> to vector<16x8xf32>
    %1054 = arith.subf %1050, %1053 : vector<16x8xf32>
    %1055 = math.exp %1054 : vector<16x8xf32>
    %cst_337 = arith.constant dense<0.000000e+00> : vector<16xf32>
    %1056 = vector.multi_reduction <add>, %1055, %cst_337 [1] : vector<16x8xf32> to vector<16xf32>
    %1057 = vector.shape_cast %1056 : vector<16xf32> to vector<16x1xf32>
    %1058 = tpu.reciprocal %1057 {approx = true} : vector<16x1xf32> -> vector<16x1xf32>
    %1059 = vector.broadcast %1058 : vector<16x1xf32> to vector<16x8xf32>
    %1060 = arith.mulf %1055, %1059 : vector<16x8xf32>
    %1061 = arith.truncf %1060 : vector<16x8xf32> to vector<16x8xbf16>
    %1062 = arith.truncf %1046 : vector<8x8xf32> to vector<8x8xbf16>
    %cst_338 = arith.constant dense<0.000000e+00> : vector<16x8xf32>
    %1063 = tpu.matmul %1061, %1062, %cst_338 {dimension_numbers = #tpu.dot_dimension_numbers<[1], [0], [0], [1], [0, 0, 1, 1], [], []>} : vector<16x8xbf16>, vector<8x8xbf16>, vector<16x8xf32> -> vector<16x8xf32>
    %1064 = vector.extract_strided_slice %988 {offsets = [0, 24], sizes = [16, 8], strides = [1, 1]} : vector<16x32xf32> to vector<16x8xf32>
    %cst_339 = arith.constant 0.353553385 : f32
    %1065 = vector.broadcast %cst_339 : f32 to vector<16x8xf32>
    %1066 = arith.mulf %1064, %1065 : vector<16x8xf32>
    %1067 = vector.extract_strided_slice %996 {offsets = [0, 24], sizes = [8, 8], strides = [1, 1]} : vector<8x32xf32> to vector<8x8xf32>
    %1068 = vector.extract_strided_slice %997 {offsets = [0, 24], sizes = [8, 8], strides = [1, 1]} : vector<8x32xf32> to vector<8x8xf32>
    %1069 = arith.truncf %1066 : vector<16x8xf32> to vector<16x8xbf16>
    %1070 = arith.truncf %1067 : vector<8x8xf32> to vector<8x8xbf16>
    %cst_340 = arith.constant dense<0.000000e+00> : vector<16x8xf32>
    %1071 = tpu.matmul %1069, %1070, %cst_340 {dimension_numbers = #tpu.dot_dimension_numbers<[1], [1], [0], [0], [0, 0, 1, 0], [], []>} : vector<16x8xbf16>, vector<8x8xbf16>, vector<16x8xf32> -> vector<16x8xf32>
    %1072 = arith.addf %1071, %956 : vector<16x8xf32>
    %cst_341 = arith.constant dense<0xFF800000> : vector<16xf32>
    %1073 = vector.multi_reduction <maximumf>, %1072, %cst_341 [1] : vector<16x8xf32> to vector<16xf32>
    %1074 = vector.shape_cast %1073 : vector<16xf32> to vector<16x1xf32>
    %1075 = vector.broadcast %1074 : vector<16x1xf32> to vector<16x8xf32>
    %1076 = arith.subf %1072, %1075 : vector<16x8xf32>
    %1077 = math.exp %1076 : vector<16x8xf32>
    %cst_342 = arith.constant dense<0.000000e+00> : vector<16xf32>
    %1078 = vector.multi_reduction <add>, %1077, %cst_342 [1] : vector<16x8xf32> to vector<16xf32>
    %1079 = vector.shape_cast %1078 : vector<16xf32> to vector<16x1xf32>
    %1080 = tpu.reciprocal %1079 {approx = true} : vector<16x1xf32> -> vector<16x1xf32>
    %1081 = vector.broadcast %1080 : vector<16x1xf32> to vector<16x8xf32>
    %1082 = arith.mulf %1077, %1081 : vector<16x8xf32>
    %1083 = arith.truncf %1082 : vector<16x8xf32> to vector<16x8xbf16>
    %1084 = arith.truncf %1068 : vector<8x8xf32> to vector<8x8xbf16>
    %cst_343 = arith.constant dense<0.000000e+00> : vector<16x8xf32>
    %1085 = tpu.matmul %1083, %1084, %cst_343 {dimension_numbers = #tpu.dot_dimension_numbers<[1], [0], [0], [1], [0, 0, 1, 1], [], []>} : vector<16x8xbf16>, vector<8x8xbf16>, vector<16x8xf32> -> vector<16x8xf32>
    %1086 = tpu.concatenate %1019, %1041, %1063, %1085 in 1 : vector<16x8xf32>, vector<16x8xf32>, vector<16x8xf32>, vector<16x8xf32> -> vector<16x32xf32>
    %c344_344 = arith.constant 344 : index
    %c0_345 = arith.constant 0 : index
    %1087 = vector.load %arg4[%c344_344, %c0_345] : memref<504x128xf32, #tpu.memory_space<vmem>>, vector<32x32xf32>
    %1088 = arith.truncf %1086 : vector<16x32xf32> to vector<16x32xbf16>
    %1089 = arith.truncf %1087 : vector<32x32xf32> to vector<32x32xbf16>
    %cst_346 = arith.constant dense<0.000000e+00> : vector<16x32xf32>
    %1090 = tpu.matmul %1088, %1089, %cst_346 {dimension_numbers = #tpu.dot_dimension_numbers<[1], [0], [0], [1], [0, 0, 1, 1], [], []>} : vector<16x32xbf16>, vector<32x32xbf16>, vector<16x32xf32> -> vector<16x32xf32>
    %c376_347 = arith.constant 376 : index
    %c0_348 = arith.constant 0 : index
    %1091 = vector.load %arg4[%c376_347, %c0_348] : memref<504x128xf32, #tpu.memory_space<vmem>>, vector<1x32xf32>
    %1092 = vector.broadcast %1091 : vector<1x32xf32> to vector<16x32xf32>
    %1093 = arith.addf %1090, %1092 : vector<16x32xf32>
    %1094 = arith.addf %592, %1093 : vector<16x32xf32>
    %c384_349 = arith.constant 384 : index
    %c0_350 = arith.constant 0 : index
    %1095 = vector.load %arg4[%c384_349, %c0_350] : memref<504x128xf32, #tpu.memory_space<vmem>>, vector<2x32xf32>
    %1096 = vector.extract_strided_slice %1095 {offsets = [0, 0], sizes = [1, 32], strides = [1, 1]} : vector<2x32xf32> to vector<1x32xf32>
    %1097 = vector.extract_strided_slice %1095 {offsets = [1, 0], sizes = [1, 32], strides = [1, 1]} : vector<2x32xf32> to vector<1x32xf32>
    %cst_351 = arith.constant dense<0.000000e+00> : vector<16xf32>
    %1098 = vector.multi_reduction <add>, %1094, %cst_351 [1] : vector<16x32xf32> to vector<16xf32>
    %1099 = vector.shape_cast %1098 : vector<16xf32> to vector<16x1xf32>
    %cst_352 = arith.constant 3.200000e+01 : f32
    %1100 = vector.broadcast %cst_352 : f32 to vector<16x1xf32>
    %1101 = arith.divf %1099, %1100 : vector<16x1xf32>
    %1102 = vector.broadcast %1101 : vector<16x1xf32> to vector<16x32xf32>
    %1103 = arith.subf %1094, %1102 : vector<16x32xf32>
    %1104 = arith.mulf %1103, %1103 : vector<16x32xf32>
    %cst_353 = arith.constant dense<0.000000e+00> : vector<16xf32>
    %1105 = vector.multi_reduction <add>, %1104, %cst_353 [1] : vector<16x32xf32> to vector<16xf32>
    %1106 = vector.shape_cast %1105 : vector<16xf32> to vector<16x1xf32>
    %cst_354 = arith.constant 3.200000e+01 : f32
    %1107 = vector.broadcast %cst_354 : f32 to vector<16x1xf32>
    %1108 = arith.divf %1106, %1107 : vector<16x1xf32>
    %1109 = vector.broadcast %1101 : vector<16x1xf32> to vector<16x32xf32>
    %1110 = arith.subf %1094, %1109 : vector<16x32xf32>
    %cst_355 = arith.constant 9.99999974E-6 : f32
    %1111 = vector.broadcast %cst_355 : f32 to vector<16x1xf32>
    %1112 = arith.addf %1108, %1111 : vector<16x1xf32>
    %1113 = math.rsqrt %1112 : vector<16x1xf32>
    %1114 = vector.broadcast %1113 : vector<16x1xf32> to vector<16x32xf32>
    %1115 = arith.mulf %1110, %1114 : vector<16x32xf32>
    %1116 = vector.broadcast %1096 : vector<1x32xf32> to vector<16x32xf32>
    %1117 = arith.mulf %1115, %1116 : vector<16x32xf32>
    %1118 = vector.broadcast %1097 : vector<1x32xf32> to vector<16x32xf32>
    %1119 = arith.addf %1117, %1118 : vector<16x32xf32>
    %c392_356 = arith.constant 392 : index
    %c0_357 = arith.constant 0 : index
    %1120 = vector.load %arg4[%c392_356, %c0_357] : memref<504x128xf32, #tpu.memory_space<vmem>>, vector<32x64xf32>
    %1121 = arith.truncf %1119 : vector<16x32xf32> to vector<16x32xbf16>
    %1122 = arith.truncf %1120 : vector<32x64xf32> to vector<32x64xbf16>
    %cst_358 = arith.constant dense<0.000000e+00> : vector<16x64xf32>
    %1123 = tpu.matmul %1121, %1122, %cst_358 {dimension_numbers = #tpu.dot_dimension_numbers<[1], [0], [0], [1], [0, 0, 1, 1], [], []>} : vector<16x32xbf16>, vector<32x64xbf16>, vector<16x64xf32> -> vector<16x64xf32>
    %c424_359 = arith.constant 424 : index
    %c0_360 = arith.constant 0 : index
    %1124 = vector.load %arg4[%c424_359, %c0_360] : memref<504x128xf32, #tpu.memory_space<vmem>>, vector<1x64xf32>
    %1125 = vector.broadcast %1124 : vector<1x64xf32> to vector<16x64xf32>
    %1126 = arith.addf %1123, %1125 : vector<16x64xf32>
    %cst_361 = arith.constant 5.000000e-01 : f32
    %1127 = vector.broadcast %cst_361 : f32 to vector<16x64xf32>
    %1128 = arith.mulf %1127, %1126 : vector<16x64xf32>
    %cst_362 = arith.constant 0.707106769 : f32
    %1129 = vector.broadcast %cst_362 : f32 to vector<16x64xf32>
    %1130 = arith.mulf %1126, %1129 : vector<16x64xf32>
    %1131 = math.absf %1130 : vector<16x64xf32>
    %cst_363 = arith.constant 0.327591091 : f32
    %1132 = vector.broadcast %cst_363 : f32 to vector<16x64xf32>
    %1133 = arith.mulf %1132, %1131 : vector<16x64xf32>
    %cst_364 = arith.constant 1.000000e+00 : f32
    %1134 = vector.broadcast %cst_364 : f32 to vector<16x64xf32>
    %1135 = arith.addf %1134, %1133 : vector<16x64xf32>
    %cst_365 = arith.constant 1.000000e+00 : f32
    %1136 = vector.broadcast %cst_365 : f32 to vector<16x64xf32>
    %1137 = arith.divf %1136, %1135 : vector<16x64xf32>
    %cst_366 = arith.constant 1.06140542 : f32
    %1138 = vector.broadcast %cst_366 : f32 to vector<16x64xf32>
    %1139 = arith.mulf %1138, %1137 : vector<16x64xf32>
    %cst_367 = arith.constant 1.45315206 : f32
    %1140 = vector.broadcast %cst_367 : f32 to vector<16x64xf32>
    %1141 = arith.subf %1139, %1140 : vector<16x64xf32>
    %1142 = arith.mulf %1141, %1137 : vector<16x64xf32>
    %cst_368 = arith.constant 1.42141378 : f32
    %1143 = vector.broadcast %cst_368 : f32 to vector<16x64xf32>
    %1144 = arith.addf %1142, %1143 : vector<16x64xf32>
    %1145 = arith.mulf %1144, %1137 : vector<16x64xf32>
    %cst_369 = arith.constant 0.284496725 : f32
    %1146 = vector.broadcast %cst_369 : f32 to vector<16x64xf32>
    %1147 = arith.subf %1145, %1146 : vector<16x64xf32>
    %1148 = arith.mulf %1147, %1137 : vector<16x64xf32>
    %cst_370 = arith.constant 0.254829586 : f32
    %1149 = vector.broadcast %cst_370 : f32 to vector<16x64xf32>
    %1150 = arith.addf %1148, %1149 : vector<16x64xf32>
    %1151 = arith.mulf %1150, %1137 : vector<16x64xf32>
    %cst_371 = arith.constant 0.000000e+00 : f32
    %1152 = vector.broadcast %cst_371 : f32 to vector<16x64xf32>
    %1153 = arith.subf %1152, %1131 : vector<16x64xf32>
    %1154 = arith.mulf %1153, %1131 : vector<16x64xf32>
    %1155 = math.exp %1154 : vector<16x64xf32>
    %1156 = arith.mulf %1151, %1155 : vector<16x64xf32>
    %cst_372 = arith.constant 1.000000e+00 : f32
    %1157 = vector.broadcast %cst_372 : f32 to vector<16x64xf32>
    %1158 = arith.subf %1157, %1156 : vector<16x64xf32>
    %cst_373 = arith.constant 0.000000e+00 : f32
    %1159 = vector.broadcast %cst_373 : f32 to vector<16x64xf32>
    %1160 = arith.cmpf olt, %1130, %1159 : vector<16x64xf32>
    %cst_374 = arith.constant 0.000000e+00 : f32
    %1161 = vector.broadcast %cst_374 : f32 to vector<16x64xf32>
    %1162 = arith.subf %1161, %1158 : vector<16x64xf32>
    %1163 = arith.select %1160, %1162, %1158 : vector<16x64xi1>, vector<16x64xf32>
    %cst_375 = arith.constant 1.000000e+00 : f32
    %1164 = vector.broadcast %cst_375 : f32 to vector<16x64xf32>
    %1165 = arith.addf %1164, %1163 : vector<16x64xf32>
    %1166 = arith.mulf %1128, %1165 : vector<16x64xf32>
    %c432_376 = arith.constant 432 : index
    %c0_377 = arith.constant 0 : index
    %1167 = vector.load %arg4[%c432_376, %c0_377] : memref<504x128xf32, #tpu.memory_space<vmem>>, vector<64x32xf32>
    %1168 = arith.truncf %1166 : vector<16x64xf32> to vector<16x64xbf16>
    %1169 = arith.truncf %1167 : vector<64x32xf32> to vector<64x32xbf16>
    %cst_378 = arith.constant dense<0.000000e+00> : vector<16x32xf32>
    %1170 = tpu.matmul %1168, %1169, %cst_378 {dimension_numbers = #tpu.dot_dimension_numbers<[1], [0], [0], [1], [0, 0, 1, 1], [], []>} : vector<16x64xbf16>, vector<64x32xbf16>, vector<16x32xf32> -> vector<16x32xf32>
    %1171 = arith.addf %1094, %1170 : vector<16x32xf32>
    %c496_379 = arith.constant 496 : index
    %c0_380 = arith.constant 0 : index
    %1172 = vector.load %arg4[%c496_379, %c0_380] : memref<504x128xf32, #tpu.memory_space<vmem>>, vector<1x32xf32>
    %1173 = vector.broadcast %1172 : vector<1x32xf32> to vector<16x32xf32>
    %1174 = arith.addf %1171, %1173 : vector<16x32xf32>
    %c1_381 = arith.constant 1 : index
    %c0_382 = arith.constant 0 : index
    %c0_383 = arith.constant 0 : index
    %1175 = vector.load %arg6[%c1_381, %c0_382, %c0_383] : memref<2x16x32xf32, #tpu.memory_space<vmem>>, vector<1x16x32xf32>
    %1176 = vector.shape_cast %1175 : vector<1x16x32xf32> to vector<16x32xf32>
    %1177 = vector.shape_cast %1174 : vector<16x32xf32> to vector<1x16x32xf32>
    tpu.vector_store %arg6[%c1_381, %c0_382, %c0_383], %1177 {strides = array<i32>} : memref<2x16x32xf32, #tpu.memory_space<vmem>>, vector<1x16x32xf32>,
    return
  }
  func.func @transform_0(%arg0: i32) -> (i32, i32, i32) {
    %c0_i32 = arith.constant 0 : i32
    %c0_i32_0 = arith.constant 0 : i32
    %c0_i32_1 = arith.constant 0 : i32
    return %arg0, %c0_i32, %c0_i32_0 : i32, i32, i32
  }
  func.func @transform_1(%arg0: i32) -> (i32, i32, i32) {
    %c0_i32 = arith.constant 0 : i32
    %c0_i32_0 = arith.constant 0 : i32
    %c0_i32_1 = arith.constant 0 : i32
    return %arg0, %c0_i32, %c0_i32_0 : i32, i32, i32
  }
  func.func @transform_2(%arg0: i32) -> (i32, i32, i32) {
    %c0_i32 = arith.constant 0 : i32
    %c0_i32_0 = arith.constant 0 : i32
    %c0_i32_1 = arith.constant 0 : i32
    return %arg0, %c0_i32, %c0_i32_0 : i32, i32, i32
  }
  func.func @transform_3(%arg0: i32) -> (i32, i32) {
    %c0_i32 = arith.constant 0 : i32
    %c0_i32_0 = arith.constant 0 : i32
    %c0_i32_1 = arith.constant 0 : i32
    return %c0_i32, %c0_i32_0 : i32, i32
  }
  func.func @transform_4(%arg0: i32) -> (i32, i32, i32) {
    %c0_i32 = arith.constant 0 : i32
    %c0_i32_0 = arith.constant 0 : i32
    %c0_i32_1 = arith.constant 0 : i32
    return %arg0, %c0_i32, %c0_i32_0 : i32, i32, i32
  }
  func.func @transform_5(%arg0: i32) -> (i32, i32, i32) {
    %c0_i32 = arith.constant 0 : i32
    %c0_i32_0 = arith.constant 0 : i32
    %c0_i32_1 = arith.constant 0 : i32
    return %arg0, %c0_i32, %c0_i32_0 : i32, i32, i32
  }
}

</mosaic_0001>

<bundles_post_ra>
// kernel: maskformer_decoder_layer.1
= control target key start
LH: loop header
LB: loop body
LE: loop exit
PB: predicated region body
PF: predicated region fallthrough
CT: control target
= control target key end

     0   :  { %11 = vsyncpa [#allocation3], 0  ;;  %vm38_vm0 = vcmask 261120   ;;  %s7183_s0 = inlined_call_operand.vmem [shape: f32[2,8,32], index: 0, kind: input, shape index: {}]   ;;  %s7184_s1 = inlined_call_operand.vmem [shape: f32[2,16,32], index: 1, kind: input, shape index: {}]   ;;  %s7185_s2 = inlined_call_operand.vmem [shape: f32[2,8,16], index: 2, kind: input, shape index: {}]   ;;  %s7186_s3 = inlined_call_operand.vmem [shape: f32[504,128], index: 3, kind: input, shape index: {}]   ;;  %s7187_s4 = inlined_call_operand.hbm [shape: f32[2,8,32], index: 4, kind: output, shape index: {0}]   ;;  %s7188_s5 = inlined_call_operand.hbm [shape: f32[2,16,32], index: 5, kind: output, shape index: {1}]  }
   0x1   :  { %v5975_v0 = vld [vmem:[%s7183_s0] sm:$0xff] }
   0x2   :  { %12 = vsyncpa [#allocation5], 0  ;;  %v39_v1 = vsel %vm38_vm0, %v5975_v0, 0.0  ;;  %v65_v2 = vld [vmem:[%s7186_s3 + $0x18] sm:$0xff]  ;;  %v66_v3 = vld [vmem:[%s7186_s3 + $0x20] sm:$0xff]  ;;  %s5922_s28 = smov 96   ;;  %v53_v18 = vlaneseq }
   0x3   :  { %40 = vadd.xlane.f32.xlu0 %v39_v1  ;;  %v63_v4 = vld [vmem:[%s7186_s3 + $0x8] sm:$0xff]  ;;  %v69_v5 = vpack.c.bf16 %v66_v3, %v65_v2  ;;  %v64_v6 = vld [vmem:[%s7186_s3 + $0x10] sm:$0xff]  ;;  %v5923_v13 = vmov 0.0   ;;  %vm5924_vm1 = vmmov 0   ;;  %v37_v21 = vld [vmem:[%s7186_s3] sm:$0x3] }
   0x4   :  { %v68_v7 = vpack.c.bf16 %v64_v6, %v63_v4  ;;  %5148 = vmatprep.subr.bf16.mxu1 %v5923_v13  ;;  %5152 = vmatprep.mubr.msk.bf16.mxu1 %vm5924_vm1, %v5923_v13  ;;  %v4864_v14 = vld [vmem:[%s7186_s3 + $0x28] ss:$0 sm:$0xff]  ;;  %v54_v19 = vshrl.u32 %v53_v18, 7  ;;  %v6022_v31 = vld [vmem:[%s7184_s1] sm:$0xff]  ;;  %vm26_vm2 = vcmask 130048   ;;  %vm178_vm3 = vcmask 64512  }
   0x5   :  { %123 = vrot.lane.b32.xlu1 %v69_v5, %s5922_s28  ;;  %5149 = vmatpush3.bf16.msra.mxu1 %v69_v5  ;;  %v6027_v32 = vld [vmem:[%s7184_s1 + $0x8] sm:$0xff]  ;;  %v25_v35 = vld [vmem:[%s7185_s2] sm:$0xff]  ;;  %s5925_s14 = smov 120   ;;  %s5926_s15 = smov 112   ;;  %vm5928_vm6 = vmmov 1   ;;  %vm623_vm9 = vcmask 195584  }
   0x6   :  { %5164 = vmatprep.subr.bf16.mxu0 %v5923_v13  ;;  %5150 = vmatprep.subr.bf16.mxu1 %v5923_v13  ;;  %v6007_v20 = vsub.s32 0, %v54_v19  ;;  %v6012_v22 = vsub.s32 1, %v54_v19  ;;  %v118_v34 = vpack.c.bf16 %v6027_v32, %v6022_v31  ;;  %v27_v36 = vsel %vm26_vm2, %v25_v35, 0.0  ;;  %s5927_s16 = smov 104   ;;  %s5929_s17 = smov 88  }
   0x7   :  { %5166 = vmatprep.mubr.msk.bf16.mxu0 %vm5924_vm1, %v5923_v13  ;;  %vm31_vm5 = vcmp.gt.f32.partialorder %v25_v35, 0.5  ;;  %s5930_s18 = smov 72   ;;  %s5931_s19 = smov 80   ;;  %vm829_vm10 = vcmask 1043456   ;;  %vm1394_vm12 = vcmask 523264  }
   0x8   :  { %v56_v23 = vrot.slane %v37_v21, %v6007_v20  ;;  %v61_v26 = vrot.slane %v37_v21, %v6012_v22  ;;  %s5932_s20 = smov 8   ;;  %s5933_s30 = smov 16  }
   0x9   :  { %121 = vrot.lane.b32.xlu1 %v68_v7, %s5922_s28  ;;  %5151 = vmatpush3.bf16.msra.mxu1 %v68_v7  ;;  %s5934_s6 = smov 24   ;;  %s5935_s29 = smov 56  }
   0xa   :  { %5156 = vmatprep.subr.bf16.mxu1 %v5923_v13  ;;  %s5936_s7 = smov 64   ;;  %s5937_s8 = smov 40  }
   0xb   :  { %s5938_s9 = smov 48   ;;  %s5939_s26 = smov [#allocation2]  }
   0xc   :  { %s4837_s27 = sshll.u32 %s5939_s26, 4  ;;  %s4838_s27 = int_to_ptr.vmem [resolvable:$true] %s4837_s27 }
   0xd   :  { %p5883_p1 = scmp.lt.s32.totalorder %s4838_s27, %s4838_s27 }
  0x77   :  { %v124_v28 = vpop.permute.xlu1 %123 }
  0x7b   :  { %v122_v33 = vpop.permute.xlu1 %121 }
  0x8c   :  { %v41_v8 = vpop.xlane.xlu0 %40 }
  0x8d   :  { %v43_v9 = vmul.f32 0.03125, %v41_v8 }
  0x8f   :  { %v44_v10 = vsub.f32 %v5975_v0, %v43_v9 }
  0x91   :  { %v45_v11 = vmul.f32 %v44_v10, %v44_v10 }
  0x93   :  { %v46_v12 = vsel %vm38_vm0, %v45_v11, 0.0 }
  0x94   :  { %47 = vadd.xlane.f32.xlu0 %v46_v12 }
  0xaa   :  { %128 = vrot.lane.b32.xlu0 %v4864_v14, %s5922_s28 }
  0xc9   :  { %28 = vadd.xlane.f32.xlu0 %v27_v36 }
 0x11d   :  { %v48_v15 = vpop.xlane.xlu0 %47 }
 0x11e   :  { %v49_v16 = vmul.f32 0.03125, %v48_v15 }
 0x120   :  { %v50_v17 = vadd.f32 1e-05, %v49_v16 }
 0x121   :  { %v129_v42 = vpop.permute.xlu0 %128 }
 0x122   :  { %5694 = vrsqrt.f32 %v50_v17 }
 0x12f   :  { %v5695_v24 = vpop.eup %5694 }
 0x130   :  { %v52_v25 = vmul.f32 %v5695_v24, %v44_v10 }
 0x132   :  { %v57_v27 = vmul.f32 %v56_v23, %v52_v25 }
 0x134   :  { %v62_v29 = vadd.f32 %v61_v26, %v57_v27 }
 0x136   :  { %v67_v30 = vpack.c.bf16 %v62_v29, %v62_v29 }
 0x138   :  { %5153 = vmatmul.mubr.msk.bf16.vlgmr.msra.gmra.mxu1 %vm38_vm0, %v67_v30 }
 0x139   :  { %5157 = vmatpush3.bf16.msra.mxu1 %v124_v28  ;;  %5160 = vmatprep.mubr.msk.bf16.mxu1 %vm5924_vm1, %v5923_v13 }
 0x13a   :  { %5158 = vmatprep.subr.bf16.mxu1 %v5923_v13 }
 0x13d   :  { %5159 = vmatpush3.bf16.msra.mxu1 %v122_v33 }
 0x13e   :  { %5170 = vmatprep.subr.bf16.mxu1 %v5923_v13 }
 0x140   :  { %5161 = vmatmul.mubr.msk.bf16.vlgmr.msra.gmra.mxu1 %vm38_vm0, %v118_v34 }
 0x141   :  { %5172 = vmatprep.mubr.msk.bf16.mxu1 %vm5924_vm1, %v5923_v13 }
 0x152   :  { %v29_v62 = vpop.xlane.xlu0 %28 }
 0x153   :  { %vm30_vm4 = vcmp.ge.f32.partialorder %v29_v62, 15.5 }
 0x154   :  { %vm32_vm7 = vmxor %vm30_vm4, %vm5928_vm6 }
 0x155   :  { %vm35_vm8 = vmand %vm31_vm5, %vm32_vm7 }
 0x156   :  { %v6074_v63 = vsel %vm35_vm8, -1e+30, %v5923_v13 }
 0x1f8   :  { %v112_v37 = vpop.f32.mrf.mxu1 }
 0x1f9   :  { %v113_v44 = vadd.f32 %v4864_v14, %v112_v37 }
 0x1fa   :  { %v5154_v38 = vpop.f32.mrf.mxu1 }
 0x1fb   :  { %v175_v49 = vmul.f32 0.35355338, %v113_v44 }
 0x1fc   :  { %v115_v39 = vpop.f32.mrf.mxu1 }
 0x1fd   :  { %v176_v52 = vpack.c.bf16 %v175_v49, %v175_v49 }
 0x1fe   :  { %v5155_v40 = vpop.f32.mrf.mxu1 }
 0x200   :  { %v168_v41 = vpop.f32.mrf.mxu1 }
 0x201   :  { %v169_v46 = vadd.f32 %v168_v41, %v129_v42 }
 0x202   :  { %v5162_v43 = vpop.f32.mrf.mxu1 }
 0x204   :  { %v171_v45 = vpop.f32.mrf.mxu1 }
 0x205   :  { %v172_v47 = vadd.f32 %v171_v45, %v129_v42 }
 0x206   :  { %v5163_v48 = vpop.f32.mrf.mxu1 }
 0x207   :  { %v6040_v50 = vpack.c.bf16 %v172_v47, %v169_v46 }
 0x209   :  { %287 = vrot.lane.b32.xlu1 %v6040_v50, %s5925_s14  ;;  %v183_v51 = vsel %vm178_vm3, %v6040_v50, 0 }
 0x20a   :  { %5165 = vmatpush3.bf16.xpose.msra.mxu0 %v183_v51 }
 0x20b   :  { %5176 = vmatprep.subr.bf16.mxu0 %v5923_v13 }
 0x20d   :  { %285 = vrot.lane.b32.xlu1 %v176_v52, %s5925_s14 }
 0x211   :  { %395 = vrot.lane.b32.xlu1 %v6040_v50, %s5926_s15  ;;  %5167 = vmatmul.mubr.msk.bf16.vlgmr.msra.gmra.mxu0 %vm178_vm3, %v176_v52 }
 0x212   :  { %5178 = vmatprep.mubr.msk.bf16.mxu0 %vm5924_vm1, %v5923_v13 }
 0x215   :  { %393 = vrot.lane.b32.xlu1 %v176_v52, %s5926_s15 }
 0x219   :  { %503 = vrot.lane.b32.xlu1 %v6040_v50, %s5927_s16 }
 0x21d   :  { %501 = vrot.lane.b32.xlu1 %v176_v52, %s5927_s16 }
 0x27b   :  { %v288_v53 = vpop.permute.xlu1 %287 }
 0x27c   :  { %v293_v54 = vsel %vm178_vm3, %v288_v53, 0 }
 0x27d   :  { %5177 = vmatpush3.bf16.xpose.msra.mxu0 %v293_v54 }
 0x27e   :  { %5188 = vmatprep.subr.bf16.mxu0 %v5923_v13 }
 0x27f   :  { %v286_v55 = vpop.permute.xlu1 %285 }
 0x283   :  { %v396_v56 = vpop.permute.xlu1 %395 }
 0x284   :  { %v401_v57 = vsel %vm178_vm3, %v396_v56, 0  ;;  %5179 = vmatmul.mubr.msk.bf16.vlgmr.msra.gmra.mxu0 %vm178_vm3, %v286_v55 }
 0x285   :  { %5189 = vmatpush3.bf16.xpose.msra.mxu0 %v401_v57  ;;  %5190 = vmatprep.mubr.msk.bf16.mxu0 %vm5924_vm1, %v5923_v13 }
 0x286   :  { %5200 = vmatprep.subr.bf16.mxu0 %v5923_v13 }
 0x287   :  { %v394_v58 = vpop.permute.xlu1 %393 }
 0x28b   :  { %v504_v59 = vpop.permute.xlu1 %503 }
 0x28c   :  { %v509_v60 = vsel %vm178_vm3, %v504_v59, 0  ;;  %5191 = vmatmul.mubr.msk.bf16.vlgmr.msra.gmra.mxu0 %vm178_vm3, %v394_v58 }
 0x28d   :  { %5201 = vmatpush3.bf16.xpose.msra.mxu0 %v509_v60  ;;  %5202 = vmatprep.mubr.msk.bf16.mxu0 %vm5924_vm1, %v5923_v13 }
 0x28e   :  { %5212 = vmatprep.subr.bf16.mxu0 %v5923_v13 }
 0x28f   :  { %v502_v61 = vpop.permute.xlu1 %501 }
 0x294   :  { %5203 = vmatmul.mubr.msk.bf16.vlgmr.msra.gmra.mxu0 %vm178_vm3, %v502_v61 }
 0x295   :  { %5216 = vmatprep.mubr.msk.bf16.mxu0 %vm5924_vm1, %v5923_v13 }
 0x2d1   :  { %v219_v1 = vpop.f32.mrf.mxu0 }
 0x2d2   :  { %v220_v2 = vadd.f32 %v219_v1, %v6074_v63 }
 0x2d3   :  { %v5168_v3 = vpop.f32.mrf.mxu0 }
 0x2d4   :  { %v225_v4 = vsel %vm26_vm2, %v220_v2, -inf }
 0x2d5   :  { %v222_v5 = vpop.f32.mrf.mxu0  ;;  %226 = vmax.xlane.f32.xlu1 %v225_v4 }
 0x2d7   :  { %v5169_v6 = vpop.f32.mrf.mxu0 }
 0x344   :  { %v329_v7 = vpop.f32.mrf.mxu0 }
 0x345   :  { %v330_v8 = vadd.f32 %v329_v7, %v6074_v63 }
 0x346   :  { %v5180_v9 = vpop.f32.mrf.mxu0 }
 0x347   :  { %v335_v10 = vsel %vm26_vm2, %v330_v8, -inf }
 0x348   :  { %v332_v11 = vpop.f32.mrf.mxu0  ;;  %336 = vmax.xlane.f32.xlu0 %v335_v10 }
 0x34a   :  { %v5181_v12 = vpop.f32.mrf.mxu0 }
 0x34c   :  { %v437_v14 = vpop.f32.mrf.mxu0 }
 0x34d   :  { %v438_v15 = vadd.f32 %v437_v14, %v6074_v63 }
 0x34e   :  { %v5192_v16 = vpop.f32.mrf.mxu0 }
 0x34f   :  { %v443_v17 = vsel %vm26_vm2, %v438_v15, -inf }
 0x350   :  { %v440_v18 = vpop.f32.mrf.mxu0  ;;  %444 = vmax.xlane.f32.xlu0 %v443_v17  ;;  %v627_v17 = vld [vmem:[%s7186_s3 + $0x40] sm:$0xff] }
 0x351   :  { %v628_v18 = vld [vmem:[%s7186_s3 + $0x48] sm:$0xff] }
 0x352   :  { %v5193_v19 = vpop.f32.mrf.mxu0 }
 0x353   :  { %v631_v19 = vpack.c.bf16 %v628_v18, %v627_v17 }
 0x354   :  { %v545_v21 = vpop.f32.mrf.mxu0 }
 0x355   :  { %v546_v23 = vadd.f32 %v545_v21, %v6074_v63  ;;  %5213 = vmatpush3.bf16.msra.mxu0 %v631_v19  ;;  %v625_v21 = vld [vmem:[%s7186_s3 + $0x30] sm:$0xff] }
 0x356   :  { %v5204_v24 = vpop.f32.mrf.mxu0  ;;  %5214 = vmatprep.subr.bf16.mxu0 %v5923_v13 }
 0x357   :  { %v551_v25 = vsel %vm26_vm2, %v546_v23, -inf }
 0x358   :  { %v548_v26 = vpop.f32.mrf.mxu0  ;;  %552 = vmax.xlane.f32.xlu1 %v551_v25 }
 0x35a   :  { %v5205_v27 = vpop.f32.mrf.mxu0 }
 0x35e   :  { %v227_v28 = vpop.xlane.xlu1 %226 }
 0x35f   :  { %v228_v29 = vsub.f32 %v220_v2, %v227_v28 }
 0x361   :  { %v229_v30 = vmul.f32 1.442695, %v228_v29 }
 0x363   :  { %5696 = vpow2.f32 %v229_v30 }
 0x370   :  { %v5697_v33 = vpop.eup %5696 }
 0x371   :  { %v231_v34 = vsel %vm26_vm2, %v5697_v33, 0.0 }
 0x372   :  { %232 = vadd.xlane.f32.xlu0 %v231_v34 }
 0x3d1   :  { %v337_v35 = vpop.xlane.xlu0 %336 }
 0x3d2   :  { %v338_v36 = vsub.f32 %v330_v8, %v337_v35 }
 0x3d4   :  { %v339_v37 = vmul.f32 1.442695, %v338_v36 }
 0x3d6   :  { %5698 = vpow2.f32 %v339_v37 }
 0x3d9   :  { %v445_v38 = vpop.xlane.xlu0 %444 }
 0x3da   :  { %v446_v39 = vsub.f32 %v438_v15, %v445_v38 }
 0x3dc   :  { %v447_v40 = vmul.f32 1.442695, %v446_v39 }
 0x3de   :  { %5700 = vpow2.f32 %v447_v40 }
 0x3e1   :  { %v553_v45 = vpop.xlane.xlu1 %552 }
 0x3e2   :  { %v554_v46 = vsub.f32 %v546_v23, %v553_v45  ;;  %v626_v23 = vld [vmem:[%s7186_s3 + $0x38] sm:$0xff] }
 0x3e3   :  { %v5699_v41 = vpop.eup %5698  ;;  %v630_v24 = vpack.c.bf16 %v626_v23, %v625_v21 }
 0x3e4   :  { %v341_v42 = vsel %vm26_vm2, %v5699_v41, 0.0  ;;  %v555_v47 = vmul.f32 1.442695, %v554_v46 }
 0x3e5   :  { %342 = vadd.xlane.f32.xlu1 %v341_v42  ;;  %5215 = vmatpush3.bf16.msra.mxu0 %v630_v24  ;;  %v4875_v42 = vld [vmem:[%s7186_s3 + $0x50] ss:$0 sm:$0xff] }
 0x3e6   :  { %5702 = vpow2.f32 %v555_v47  ;;  %5228 = vmatprep.subr.bf16.mxu0 %v5923_v13 }
 0x3eb   :  { %v5701_v43 = vpop.eup %5700 }
 0x3ec   :  { %v449_v44 = vsel %vm26_vm2, %v5701_v43, 0.0 }
 0x3ed   :  { %450 = vadd.xlane.f32.xlu0 %v449_v44 }
 0x3f3   :  { %v5703_v48 = vpop.eup %5702 }
 0x3f4   :  { %v557_v49 = vsel %vm26_vm2, %v5703_v48, 0.0 }
 0x3f6   :  { %347 = vrot.lane.b32.xlu1 %v6040_v50, %s5929_s17 }
 0x3fb   :  { %v233_v51 = vpop.xlane.xlu0 %232 }
 0x3fc   :  { %5704 = vrcp.f32 %v233_v51 }
 0x403   :  { %238 = vrot.lane.b32.xlu0 %v6040_v50, %s5922_s28 }
 0x407   :  { %563 = vrot.lane.b32.xlu0 %v6040_v50, %s5930_s18 }
 0x409   :  { %v5705_v53 = vpop.eup %5704 }
 0x40a   :  { %v235_v55 = vmul.f32 %v5705_v53, %v5697_v33 }
 0x40c   :  { %v236_v57 = vpack.c.bf16 %v235_v55, %v235_v55 }
 0x41a   :  { %558 = vadd.xlane.f32.xlu1 %v557_v49 }
 0x42b   :  { %455 = vrot.lane.b32.xlu1 %v6040_v50, %s5931_s19 }
 0x46e   :  { %v343_v52 = vpop.xlane.xlu1 %342 }
 0x46f   :  { %5706 = vrcp.f32 %v343_v52 }
 0x472   :  { %v348_v59 = vpop.permute.xlu1 %347 }
 0x476   :  { %v451_v54 = vpop.xlane.xlu0 %450 }
 0x477   :  { %5708 = vrcp.f32 %v451_v54 }
 0x47a   :  { %v239_v56 = vpop.permute.xlu0 %238 }
 0x47b   :  { %5171 = vmatpush3.bf16.msra.mxu1 %v239_v56  ;;  %v707_v56 = vld [vmem:[%s7186_s3 + $0x70] sm:$0xff] }
 0x47c   :  { %5182 = vmatprep.subr.bf16.mxu1 %v5923_v13  ;;  %v5707_v58 = vpop.eup %5706 }
 0x47d   :  { %v345_v50 = vmul.f32 %v5707_v58, %v5699_v41 }
 0x47e   :  { %5173 = vmatmul.mubr.msk.bf16.vlgmr.msra.gmra.mxu1 %vm26_vm2, %v236_v57  ;;  %v564_v4 = vpop.permute.xlu0 %563  ;;  %v705_v57 = vld [vmem:[%s7186_s3 + $0x60] sm:$0xff] }
 0x47f   :  { %5183 = vmatpush3.bf16.msra.mxu1 %v348_v59  ;;  %5184 = vmatprep.mubr.msk.bf16.mxu1 %vm5924_vm1, %v5923_v13  ;;  %v346_v60 = vpack.c.bf16 %v345_v50, %v345_v50  ;;  %v706_v59 = vld [vmem:[%s7186_s3 + $0x68] sm:$0xff] }
 0x480   :  { %5194 = vmatprep.subr.bf16.mxu1 %v5923_v13  ;;  %v710_v50 = vpack.c.bf16 %v706_v59, %v705_v57 }
 0x484   :  { %v5709_v61 = vpop.eup %5708 }
 0x485   :  { %v453_v1 = vmul.f32 %v5709_v61, %v5701_v43 }
 0x486   :  { %5185 = vmatmul.mubr.msk.bf16.vlgmr.msra.gmra.mxu1 %vm26_vm2, %v346_v60 }
 0x487   :  { %5196 = vmatprep.mubr.msk.bf16.mxu1 %vm5924_vm1, %v5923_v13  ;;  %v454_v3 = vpack.c.bf16 %v453_v1, %v453_v1  ;;  %v681_v1 = vld [vmem:[%s7186_s3 + $0x58] sm:$0x3] }
 0x4a3   :  { %v559_v62 = vpop.xlane.xlu1 %558 }
 0x4a4   :  { %5710 = vrcp.f32 %v559_v62 }
 0x4a7   :  { %v456_v2 = vpop.permute.xlu1 %455 }
 0x4a8   :  { %5195 = vmatpush3.bf16.msra.mxu1 %v456_v2  ;;  %v698_v2 = vrot.slane %v681_v1, %v6007_v20 }
 0x4a9   :  { %5206 = vmatprep.subr.bf16.mxu1 %v5923_v13 }
 0x4ab   :  { %5197 = vmatmul.mubr.msk.bf16.vlgmr.msra.gmra.mxu1 %vm26_vm2, %v454_v3 }
 0x4ac   :  { %5207 = vmatpush3.bf16.msra.mxu1 %v564_v4  ;;  %5208 = vmatprep.mubr.msk.bf16.mxu1 %vm5924_vm1, %v5923_v13 }
 0x4ad   :  { %5220 = vmatprep.subr.bf16.mxu1 %v5923_v13 }
 0x4b1   :  { %v5711_v5 = vpop.eup %5710 }
 0x4b2   :  { %v561_v6 = vmul.f32 %v5711_v5, %v5703_v48  ;;  %v703_v5 = vrot.slane %v681_v1, %v6012_v22 }
 0x4b4   :  { %v562_v7 = vpack.c.bf16 %v561_v6, %v561_v6 }
 0x4b6   :  { %5209 = vmatmul.mubr.msk.bf16.vlgmr.msra.gmra.mxu1 %vm26_vm2, %v562_v7 }
 0x4b7   :  { %5224 = vmatprep.mubr.msk.bf16.mxu1 %vm5924_vm1, %v5923_v13 }
 0x53e   :  { %v278_v8 = vpop.f32.mrf.mxu1 }
 0x540   :  { %v5174_v9 = vpop.f32.mrf.mxu1 }
 0x541   :  { %v4877_v9 = vld [vmem:[%s7186_s3 + $0x80] ss:$0 sm:$0xff] }
 0x542   :  { %v281_v10 = vpop.f32.mrf.mxu1 }
 0x544   :  { %v5175_v11 = vpop.f32.mrf.mxu1 }
 0x546   :  { %v387_v12 = vpop.f32.mrf.mxu1 }
 0x547   :  { %610 = vrot.lane.b32.xlu1 %v387_v12, %s5932_s20 }
 0x548   :  { %v5186_v14 = vpop.f32.mrf.mxu1 }
 0x54a   :  { %v390_v15 = vpop.f32.mrf.mxu1 }
 0x54c   :  { %v5187_v16 = vpop.f32.mrf.mxu1 }
 0x56b   :  { %v495_v25 = vpop.f32.mrf.mxu1 }
 0x56c   :  { %614 = vrot.lane.b32.xlu0 %v495_v25, %s5933_s30 }
 0x56d   :  { %v5198_v26 = vpop.f32.mrf.mxu1 }
 0x56f   :  { %v498_v27 = vpop.f32.mrf.mxu1 }
 0x571   :  { %v5199_v28 = vpop.f32.mrf.mxu1 }
 0x576   :  { %v603_v29 = vpop.f32.mrf.mxu1 }
 0x577   :  { %618 = vrot.lane.b32.xlu1 %v603_v29, %s5934_s6 }
 0x578   :  { %v5210_v30 = vpop.f32.mrf.mxu1 }
 0x57a   :  { %v606_v33 = vpop.f32.mrf.mxu1 }
 0x57c   :  { %v5211_v34 = vpop.f32.mrf.mxu1 }
 0x5b9   :  { %v611_v35 = vpop.permute.xlu1 %610 }
 0x5ba   :  { %v621_v37 = vsel %vm178_vm3, %v278_v8, %v611_v35 }
 0x5de   :  { %v615_v36 = vpop.permute.xlu0 %614 }
 0x5df   :  { %v622_v38 = vsel %vm26_vm2, %v621_v37, %v615_v36 }
 0x5e9   :  { %v619_v39 = vpop.permute.xlu1 %618 }
 0x5ea   :  { %v624_v40 = vsel %vm623_vm9, %v622_v38, %v619_v39 }
 0x5eb   :  { %v629_v41 = vpack.c.bf16 %v624_v40, %v624_v40 }
 0x5ed   :  { %5217 = vmatmul.mubr.msk.bf16.vlgmr.msra.gmra.mxu0 %vm38_vm0, %v629_v41 }
 0x5ee   :  { %5230 = vmatprep.mubr.msk.bf16.mxu0 %vm5924_vm1, %v5923_v13 }
 0x6ad   :  { %v674_v43 = vpop.f32.mrf.mxu0 }
 0x6ae   :  { %v675_v44 = vadd.f32 %v4875_v42, %v674_v43 }
 0x6af   :  { %v5218_v45 = vpop.f32.mrf.mxu0 }
 0x6b0   :  { %v6139_v46 = vadd.f32 %v675_v44, %v5975_v0  ;;  %v708_v0 = vld [vmem:[%s7186_s3 + $0x78] sm:$0xff] }
 0x6b1   :  { %v677_v47 = vpop.f32.mrf.mxu0  ;;  %v711_v58 = vpack.c.bf16 %v708_v0, %v707_v56 }
 0x6b2   :  { %v682_v48 = vsel %vm38_vm0, %v6139_v46, 0.0 }
 0x6b3   :  { %683 = vadd.xlane.f32.xlu0 %v682_v48  ;;  %v5219_v49 = vpop.f32.mrf.mxu0  ;;  %5221 = vmatpush3.bf16.msra.mxu1 %v711_v58 }
 0x6b4   :  { %5222 = vmatprep.subr.bf16.mxu1 %v5923_v13 }
 0x6b7   :  { %5223 = vmatpush3.bf16.msra.mxu1 %v710_v50 }
 0x6b8   :  { %5234 = vmatprep.subr.bf16.mxu1 %v5923_v13 }
 0x73c   :  { %v684_v51 = vpop.xlane.xlu0 %683 }
 0x73d   :  { %v685_v52 = vmul.f32 0.03125, %v684_v51 }
 0x73f   :  { %v686_v53 = vsub.f32 %v6139_v46, %v685_v52 }
 0x741   :  { %v687_v54 = vmul.f32 %v686_v53, %v686_v53 }
 0x743   :  { %v688_v55 = vsel %vm38_vm0, %v687_v54, 0.0 }
 0x744   :  { %689 = vadd.xlane.f32.xlu1 %v688_v55 }
 0x7cd   :  { %v690_v60 = vpop.xlane.xlu1 %689 }
 0x7ce   :  { %v691_v61 = vmul.f32 0.03125, %v690_v60 }
 0x7d0   :  { %v692_v62 = vadd.f32 1e-05, %v691_v61 }
 0x7d2   :  { %5712 = vrsqrt.f32 %v692_v62 }
 0x7df   :  { %v5713_v3 = vpop.eup %5712 }
 0x7e0   :  { %v694_v4 = vmul.f32 %v5713_v3, %v686_v53 }
 0x7e2   :  { %v699_v6 = vmul.f32 %v698_v2, %v694_v4 }
 0x7e4   :  { %v704_v7 = vadd.f32 %v703_v5, %v699_v6 }
 0x7e6   :  { %v709_v8 = vpack.c.bf16 %v704_v7, %v704_v7 }
 0x7e8   :  { %5225 = vmatmul.mubr.msk.bf16.vlgmr.msra.gmra.mxu1 %vm38_vm0, %v709_v8 }
 0x7e9   :  { %5236 = vmatprep.mubr.msk.bf16.mxu1 %vm5924_vm1, %v5923_v13 }
 0x8a8   :  { %v754_v10 = vpop.f32.mrf.mxu1 }
 0x8a9   :  { %v755_v11 = vadd.f32 %v4877_v9, %v754_v10 }
 0x8aa   :  { %v5226_v12 = vpop.f32.mrf.mxu1 }
 0x8ab   :  { %v760_v14 = vmul.f32 0.35355338, %v755_v11  ;;  %v6170_v15 = vpack.c.bf16 %v755_v11, %v755_v11 }
 0x8ac   :  { %v757_v16 = vpop.f32.mrf.mxu1 }
 0x8ad   :  { %876 = vrot.lane.b32.xlu1 %v6170_v15, %s5929_s17  ;;  %764 = vrot.lane.b32.xlu0 %v6170_v15, %s5922_s28  ;;  %v761_v18 = vpack.c.bf16 %v760_v14, %v760_v14 }
 0x8ae   :  { %v5227_v17 = vpop.f32.mrf.mxu1 }
 0x8b1   :  { %986 = vrot.lane.b32.xlu1 %v6170_v15, %s5931_s19  ;;  %874 = vrot.lane.b32.xlu0 %v761_v18, %s5925_s14 }
 0x8b5   :  { %1096 = vrot.lane.b32.xlu1 %v6170_v15, %s5930_s18  ;;  %984 = vrot.lane.b32.xlu0 %v761_v18, %s5926_s15 }
 0x8b9   :  { %1094 = vrot.lane.b32.xlu0 %v761_v18, %s5927_s16 }
 0x91f   :  { %v765_v19 = vpop.permute.xlu0 %764  ;;  %v877_v23 = vpop.permute.xlu1 %876 }
 0x920   :  { %v770_v21 = vsel %vm178_vm3, %v765_v19, 0  ;;  %v882_v24 = vsel %vm178_vm3, %v877_v23, 0 }
 0x921   :  { %5229 = vmatpush3.bf16.xpose.msra.mxu0 %v770_v21 }
 0x922   :  { %5240 = vmatprep.subr.bf16.mxu0 %v5923_v13 }
 0x923   :  { %v987_v25 = vpop.permute.xlu1 %986  ;;  %v875_v26 = vpop.permute.xlu0 %874 }
 0x924   :  { %v992_v27 = vsel %vm178_vm3, %v987_v25, 0 }
 0x927   :  { %v1097_v28 = vpop.permute.xlu1 %1096  ;;  %v985_v29 = vpop.permute.xlu0 %984 }
 0x928   :  { %5231 = vmatmul.mubr.msk.bf16.vlgmr.msra.gmra.mxu0 %vm178_vm3, %v761_v18  ;;  %v1102_v30 = vsel %vm178_vm3, %v1097_v28, 0 }
 0x929   :  { %5241 = vmatpush3.bf16.xpose.msra.mxu0 %v882_v24  ;;  %5242 = vmatprep.mubr.msk.bf16.mxu0 %vm5924_vm1, %v5923_v13 }
 0x92a   :  { %5252 = vmatprep.subr.bf16.mxu0 %v5923_v13 }
 0x92b   :  { %v1095_v33 = vpop.permute.xlu0 %1094 }
 0x930   :  { %5243 = vmatmul.mubr.msk.bf16.vlgmr.msra.gmra.mxu0 %vm178_vm3, %v875_v26 }
 0x931   :  { %5253 = vmatpush3.bf16.xpose.msra.mxu0 %v992_v27  ;;  %5254 = vmatprep.mubr.msk.bf16.mxu0 %vm5924_vm1, %v5923_v13 }
 0x932   :  { %5264 = vmatprep.subr.bf16.mxu0 %v5923_v13 }
 0x938   :  { %5255 = vmatmul.mubr.msk.bf16.vlgmr.msra.gmra.mxu0 %vm178_vm3, %v985_v29 }
 0x939   :  { %5265 = vmatpush3.bf16.xpose.msra.mxu0 %v1102_v30  ;;  %5266 = vmatprep.mubr.msk.bf16.mxu0 %vm5924_vm1, %v5923_v13 }
 0x93a   :  { %5276 = vmatprep.subr.bf16.mxu0 %v5923_v13 }
 0x940   :  { %5267 = vmatmul.mubr.msk.bf16.vlgmr.msra.gmra.mxu0 %vm178_vm3, %v1095_v33 }
 0x941   :  { %5280 = vmatprep.mubr.msk.bf16.mxu0 %vm5924_vm1, %v5923_v13 }
 0x9e8   :  { %v806_v34 = vpop.f32.mrf.mxu0 }
 0x9e9   :  { %v812_v35 = vsel %vm178_vm3, %v806_v34, -inf }
 0x9ea   :  { %813 = vmax.xlane.f32.xlu1 %v812_v35  ;;  %v5232_v36 = vpop.f32.mrf.mxu0 }
 0x9ec   :  { %v809_v37 = vpop.f32.mrf.mxu0 }
 0x9ee   :  { %v5233_v38 = vpop.f32.mrf.mxu0 }
 0x9f0   :  { %v918_v39 = vpop.f32.mrf.mxu0 }
 0x9f1   :  { %v924_v40 = vsel %vm178_vm3, %v918_v39, -inf }
 0x9f2   :  { %925 = vmax.xlane.f32.xlu0 %v924_v40  ;;  %v5244_v41 = vpop.f32.mrf.mxu0 }
 0x9f4   :  { %v921_v42 = vpop.f32.mrf.mxu0 }
 0x9f6   :  { %v5245_v43 = vpop.f32.mrf.mxu0 }
 0x9f8   :  { %v1028_v44 = vpop.f32.mrf.mxu0 }
 0x9f9   :  { %v1034_v45 = vsel %vm178_vm3, %v1028_v44, -inf }
 0x9fa   :  { %1035 = vmax.xlane.f32.xlu0 %v1034_v45  ;;  %v5256_v47 = vpop.f32.mrf.mxu0 }
 0x9fc   :  { %v1031_v48 = vpop.f32.mrf.mxu0 }
 0x9fe   :  { %v5257_v49 = vpop.f32.mrf.mxu0 }
 0xa00   :  { %v1138_v51 = vpop.f32.mrf.mxu0 }
 0xa01   :  { %v1144_v52 = vsel %vm178_vm3, %v1138_v51, -inf }
 0xa02   :  { %1145 = vmax.xlane.f32.xlu1 %v1144_v52  ;;  %v5268_v53 = vpop.f32.mrf.mxu0  ;;  %v1222_v52 = vld [vmem:[%s7186_s3 + $0xa0] sm:$0xff] }
 0xa04   :  { %v1141_v54 = vpop.f32.mrf.mxu0 }
 0xa05   :  { %v1219_v54 = vld [vmem:[%s7186_s3 + $0x88] sm:$0xff] }
 0xa06   :  { %v5269_v55 = vpop.f32.mrf.mxu0 }
 0xa07   :  { %v1220_v55 = vld [vmem:[%s7186_s3 + $0x90] sm:$0xff] }
 0xa73   :  { %v814_v56 = vpop.xlane.xlu1 %813 }
 0xa74   :  { %v815_v0 = vsub.f32 %v806_v34, %v814_v56  ;;  %v1224_v56 = vpack.c.bf16 %v1220_v55, %v1219_v54  ;;  %v1387_v54 = vld [vmem:[%s7186_s3 + $0x110] sm:$0xff]  ;;  %v1388_v55 = vld [vmem:[%s7186_s3 + $0x118] sm:$0xff] }
 0xa76   :  { %v816_v57 = vmul.f32 1.442695, %v815_v0 }
 0xa78   :  { %5714 = vpow2.f32 %v816_v57 }
 0xa7b   :  { %v926_v58 = vpop.xlane.xlu0 %925 }
 0xa7c   :  { %v927_v59 = vsub.f32 %v918_v39, %v926_v58 }
 0xa7e   :  { %v928_v50 = vmul.f32 1.442695, %v927_v59 }
 0xa80   :  { %5716 = vpow2.f32 %v928_v50 }
 0xa83   :  { %v1036_v60 = vpop.xlane.xlu0 %1035 }
 0xa84   :  { %v1037_v61 = vsub.f32 %v1028_v44, %v1036_v60 }
 0xa85   :  { %v5715_v62 = vpop.eup %5714 }
 0xa86   :  { %v1038_v1 = vmul.f32 1.442695, %v1037_v61  ;;  %v818_v2 = vsel %vm178_vm3, %v5715_v62, 0.0 }
 0xa87   :  { %819 = vadd.xlane.f32.xlu0 %v818_v2 }
 0xa88   :  { %5718 = vpow2.f32 %v1038_v1 }
 0xa8b   :  { %v1146_v7 = vpop.xlane.xlu1 %1145 }
 0xa8c   :  { %v1147_v8 = vsub.f32 %v1138_v51, %v1146_v7  ;;  %v1221_v51 = vld [vmem:[%s7186_s3 + $0x98] sm:$0xff] }
 0xa8d   :  { %v5717_v3 = vpop.eup %5716  ;;  %v1225_v53 = vpack.c.bf16 %v1222_v52, %v1221_v51 }
 0xa8e   :  { %v930_v4 = vsel %vm178_vm3, %v5717_v3, 0.0  ;;  %v1148_v9 = vmul.f32 1.442695, %v1147_v8  ;;  %v4887_v8 = vld [vmem:[%s7186_s3 + $0xa8] ss:$0 sm:$0xff] }
 0xa8f   :  { %931 = vadd.xlane.f32.xlu1 %v930_v4  ;;  %5277 = vmatpush3.bf16.msra.mxu0 %v1225_v53 }
 0xa90   :  { %5720 = vpow2.f32 %v1148_v9  ;;  %5278 = vmatprep.subr.bf16.mxu0 %v5923_v13 }
 0xa93   :  { %5279 = vmatpush3.bf16.msra.mxu0 %v1224_v56  ;;  %v1393_v56 = vpack.c.bf16 %v1388_v55, %v1387_v54 }
 0xa94   :  { %5292 = vmatprep.subr.bf16.mxu0 %v5923_v13 }
 0xa95   :  { %v5719_v5 = vpop.eup %5718 }
 0xa96   :  { %v1040_v6 = vsel %vm178_vm3, %v5719_v5, 0.0 }
 0xa97   :  { %1041 = vadd.xlane.f32.xlu0 %v1040_v6 }
 0xa9d   :  { %v5721_v10 = vpop.eup %5720 }
 0xa9e   :  { %v1150_v11 = vsel %vm178_vm3, %v5721_v10, 0.0 }
 0xaa0   :  { %936 = vrot.lane.b32.xlu1 %v6170_v15, %s5935_s29 }
 0xaad   :  { %824 = vrot.lane.b32.xlu0 %v6170_v15, %s5936_s7 }
 0xab1   :  { %1156 = vrot.lane.b32.xlu0 %v6170_v15, %s5937_s8 }
 0xac4   :  { %1151 = vadd.xlane.f32.xlu1 %v1150_v11 }
 0xad5   :  { %1046 = vrot.lane.b32.xlu1 %v6170_v15, %s5938_s9 }
 0xb10   :  { %v820_v12 = vpop.xlane.xlu0 %819 }
 0xb11   :  { %5722 = vrcp.f32 %v820_v12 }
 0xb18   :  { %v932_v14 = vpop.xlane.xlu1 %931 }
 0xb19   :  { %5724 = vrcp.f32 %v932_v14 }
 0xb1c   :  { %v937_v23 = vpop.permute.xlu1 %936 }
 0xb1d   :  { %v942_v26 = vsel %vm829_vm10, %v937_v23, 0 }
 0xb1e   :  { %v5723_v16 = vpop.eup %5722 }
 0xb1f   :  { %v822_v18 = vmul.f32 %v5723_v16, %v5715_v62 }
 0xb20   :  { %v1042_v17 = vpop.xlane.xlu0 %1041 }
 0xb21   :  { %v823_v24 = vpack.c.bf16 %v822_v18, %v822_v18  ;;  %5726 = vrcp.f32 %v1042_v17  ;;  %v1479_v18 = vsel %vm38_vm0, %v6022_v31, 0.0 }
 0xb24   :  { %v825_v19 = vpop.permute.xlu0 %824 }
 0xb25   :  { %v831_v21 = vsel %vm829_vm10, %v825_v19, 0  ;;  %v1482_v19 = vsel %vm38_vm0, %v6027_v32, 0.0 }
 0xb26   :  { %5235 = vmatpush3.bf16.msra.mxu1 %v831_v21  ;;  %v5725_v25 = vpop.eup %5724 }
 0xb27   :  { %5246 = vmatprep.subr.bf16.mxu1 %v5923_v13  ;;  %v934_v15 = vmul.f32 %v5725_v25, %v5717_v3 }
 0xb28   :  { %v1157_v35 = vpop.permute.xlu0 %1156 }
 0xb29   :  { %5237 = vmatmul.mubr.msk.bf16.vlgmr.msra.gmra.mxu1 %vm178_vm3, %v823_v24  ;;  %v935_v27 = vpack.c.bf16 %v934_v15, %v934_v15  ;;  %v1162_v37 = vsel %vm829_vm10, %v1157_v35, 0  ;;  %v1302_v15 = vld [vmem:[%s7186_s3 + $0xd0] sm:$0xff] }
 0xb2a   :  { %5247 = vmatpush3.bf16.msra.mxu1 %v942_v26  ;;  %5248 = vmatprep.mubr.msk.bf16.mxu1 %vm5924_vm1, %v5923_v13  ;;  %v1301_v26 = vld [vmem:[%s7186_s3 + $0xc8] sm:$0xff] }
 0xb2b   :  { %5258 = vmatprep.subr.bf16.mxu1 %v5923_v13 }
 0xb2e   :  { %v5727_v28 = vpop.eup %5726 }
 0xb2f   :  { %v1044_v30 = vmul.f32 %v5727_v28, %v5719_v5  ;;  %v1305_v28 = vpack.c.bf16 %v1302_v15, %v1301_v26 }
 0xb31   :  { %5249 = vmatmul.mubr.msk.bf16.vlgmr.msra.gmra.mxu1 %vm178_vm3, %v935_v27  ;;  %v1045_v36 = vpack.c.bf16 %v1044_v30, %v1044_v30  ;;  %v1299_v27 = vld [vmem:[%s7186_s3 + $0xb8] sm:$0xff] }
 0xb32   :  { %5260 = vmatprep.mubr.msk.bf16.mxu1 %vm5924_vm1, %v5923_v13 }
 0xb4d   :  { %v1152_v29 = vpop.xlane.xlu1 %1151 }
 0xb4e   :  { %5728 = vrcp.f32 %v1152_v29  ;;  %v1300_v29 = vld [vmem:[%s7186_s3 + $0xc0] sm:$0xff] }
 0xb4f   :  { %v1304_v30 = vpack.c.bf16 %v1300_v29, %v1299_v27  ;;  %v4889_v29 = vld [vmem:[%s7186_s3 + $0xd8] ss:$0 sm:$0xff] }
 0xb51   :  { %v1047_v33 = vpop.permute.xlu1 %1046 }
 0xb52   :  { %v1052_v34 = vsel %vm829_vm10, %v1047_v33, 0 }
 0xb53   :  { %5259 = vmatpush3.bf16.msra.mxu1 %v1052_v34 }
 0xb54   :  { %5270 = vmatprep.subr.bf16.mxu1 %v5923_v13 }
 0xb56   :  { %5261 = vmatmul.mubr.msk.bf16.vlgmr.msra.gmra.mxu1 %vm178_vm3, %v1045_v36 }
 0xb57   :  { %5271 = vmatpush3.bf16.msra.mxu1 %v1162_v37  ;;  %5272 = vmatprep.mubr.msk.bf16.mxu1 %vm5924_vm1, %v5923_v13 }
 0xb58   :  { %5284 = vmatprep.subr.bf16.mxu1 %v5923_v13 }
 0xb5b   :  { %v5729_v38 = vpop.eup %5728 }
 0xb5c   :  { %v1154_v39 = vmul.f32 %v5729_v38, %v5721_v10 }
 0xb5e   :  { %v1155_v40 = vpack.c.bf16 %v1154_v39, %v1154_v39 }
 0xb60   :  { %5273 = vmatmul.mubr.msk.bf16.vlgmr.msra.gmra.mxu1 %vm178_vm3, %v1155_v40 }
 0xb61   :  { %5288 = vmatprep.mubr.msk.bf16.mxu1 %vm5924_vm1, %v5923_v13  ;;  %5285 = vmatpush3.bf16.msra.mxu1 %v1305_v28 }
 0xb62   :  { %5286 = vmatprep.subr.bf16.mxu1 %v5923_v13 }
 0xb65   :  { %5287 = vmatpush3.bf16.msra.mxu1 %v1304_v30 }
 0xb66   :  { %5304 = vmatprep.subr.bf16.mxu1 %v5923_v13 }
 0xbe9   :  { %v867_v41 = vpop.f32.mrf.mxu1 }
 0xbeb   :  { %v5238_v42 = vpop.f32.mrf.mxu1 }
 0xbed   :  { %v870_v43 = vpop.f32.mrf.mxu1 }
 0xbef   :  { %v5239_v44 = vpop.f32.mrf.mxu1 }
 0xbf1   :  { %v978_v45 = vpop.f32.mrf.mxu1 }
 0xbf2   :  { %1205 = vrot.lane.b32.xlu1 %v978_v45, %s5932_s20  ;;  %v1275_v45 = vld [vmem:[%s7186_s3 + $0xb0] sm:$0x3] }
 0xbf3   :  { %v5250_v47 = vpop.f32.mrf.mxu1 }
 0xbf5   :  { %v981_v48 = vpop.f32.mrf.mxu1 }
 0xbf7   :  { %v5251_v49 = vpop.f32.mrf.mxu1 }
 0xbf8   :  { %v1297_v49 = vrot.slane %v1275_v45, %v6012_v22 }
 0xc16   :  { %v1088_v0 = vpop.f32.mrf.mxu1 }
 0xc17   :  { %1209 = vrot.lane.b32.xlu0 %v1088_v0, %s5933_s30  ;;  %v1385_v0 = vld [vmem:[%s7186_s3 + $0x100] sm:$0xff] }
 0xc18   :  { %v5262_v57 = vpop.f32.mrf.mxu1 }
 0xc19   :  { %v1386_v57 = vld [vmem:[%s7186_s3 + $0x108] sm:$0xff] }
 0xc1a   :  { %v1091_v58 = vpop.f32.mrf.mxu1 }
 0xc1b   :  { %v1392_v58 = vpack.c.bf16 %v1386_v57, %v1385_v0 }
 0xc1c   :  { %v5263_v59 = vpop.f32.mrf.mxu1 }
 0xc20   :  { %v1198_v50 = vpop.f32.mrf.mxu1 }
 0xc21   :  { %1213 = vrot.lane.b32.xlu1 %v1198_v50, %s5934_s6 }
 0xc22   :  { %v5274_v60 = vpop.f32.mrf.mxu1 }
 0xc24   :  { %v1201_v61 = vpop.f32.mrf.mxu1 }
 0xc26   :  { %v5275_v62 = vpop.f32.mrf.mxu1 }
 0xc27   :  { %v1383_v62 = vld [vmem:[%s7186_s3 + $0xf0] sm:$0xff] }
 0xc64   :  { %v1206_v1 = vpop.permute.xlu1 %1205 }
 0xc65   :  { %v1216_v3 = vsel %vm178_vm3, %v867_v41, %v1206_v1  ;;  %v1384_v1 = vld [vmem:[%s7186_s3 + $0xf8] sm:$0xff] }
 0xc89   :  { %v1210_v2 = vpop.permute.xlu0 %1209 }
 0xc8a   :  { %v1217_v4 = vsel %vm26_vm2, %v1216_v3, %v1210_v2  ;;  %v1391_v2 = vpack.c.bf16 %v1384_v1, %v1383_v62  ;;  %v4895_v1 = vld [vmem:[%s7186_s3 + $0x150] ss:$0 sm:$0xff] }
 0xc93   :  { %v1214_v5 = vpop.permute.xlu1 %1213 }
 0xc94   :  { %v1218_v6 = vsel %vm623_vm9, %v1217_v4, %v1214_v5  ;;  %v1381_v5 = vld [vmem:[%s7186_s3 + $0xe0] sm:$0xff] }
 0xc95   :  { %v1223_v7 = vpack.c.bf16 %v1218_v6, %v1218_v6  ;;  %v1382_v6 = vld [vmem:[%s7186_s3 + $0xe8] sm:$0xff] }
 0xc97   :  { %5281 = vmatmul.mubr.msk.bf16.vlgmr.msra.gmra.mxu0 %vm38_vm0, %v1223_v7  ;;  %v1390_v7 = vpack.c.bf16 %v1382_v6, %v1381_v5 }
 0xc98   :  { %5300 = vmatprep.mubr.msk.bf16.mxu0 %vm5924_vm1, %v5923_v13  ;;  %5293 = vmatpush3.bf16.msra.mxu0 %v1393_v56 }
 0xc99   :  { %5294 = vmatprep.subr.bf16.mxu0 %v5923_v13 }
 0xc9c   :  { %5295 = vmatpush3.bf16.msra.mxu0 %v1392_v58 }
 0xc9d   :  { %5296 = vmatprep.subr.bf16.mxu0 %v5923_v13 }
 0xca0   :  { %5297 = vmatpush3.bf16.msra.mxu0 %v1391_v2 }
 0xca1   :  { %5298 = vmatprep.subr.bf16.mxu0 %v5923_v13 }
 0xca4   :  { %5299 = vmatpush3.bf16.msra.mxu0 %v1390_v7 }
 0xca5   :  { %5320 = vmatprep.subr.bf16.mxu0 %v5923_v13 }
 0xd57   :  { %v1268_v9 = vpop.f32.mrf.mxu0 }
 0xd58   :  { %v1269_v10 = vadd.f32 %v4887_v8, %v1268_v9  ;;  %v1519_v8 = vld [vmem:[%s7186_s3 + $0x140] sm:$0xff]  ;;  %v1520_v9 = vld [vmem:[%s7186_s3 + $0x148] sm:$0xff] }
 0xd59   :  { %v5282_v11 = vpop.f32.mrf.mxu0 }
 0xd5a   :  { %v6266_v12 = vadd.f32 %v1269_v10, %v6139_v46  ;;  %v1517_v10 = vld [vmem:[%s7186_s3 + $0x130] sm:$0xff]  ;;  %v1523_v11 = vpack.c.bf16 %v1520_v9, %v1519_v8 }
 0xd5b   :  { %v1271_v14 = vpop.f32.mrf.mxu0 }
 0xd5c   :  { %v1276_v16 = vsel %vm38_vm0, %v6266_v12, 0.0  ;;  %v1518_v14 = vld [vmem:[%s7186_s3 + $0x138] sm:$0xff] }
 0xd5d   :  { %1277 = vadd.xlane.f32.xlu0 %v1276_v16  ;;  %v5283_v17 = vpop.f32.mrf.mxu0  ;;  %v1522_v16 = vpack.c.bf16 %v1518_v14, %v1517_v10  ;;  %v4894_v14 = vld [vmem:[%s7186_s3 + $0x120] ss:$0 sm:$0xff] }
 0xd5e   :  { %v1478_v17 = vld [vmem:[%s7186_s3 + $0x128] sm:$0x3] }
 0xd61   :  { %1480 = vadd.xlane.f32.xlu0 %v1479_v18  ;;  %v1508_v18 = vrot.slane %v1478_v17, %v6007_v20 }
 0xd65   :  { %1483 = vadd.xlane.f32.xlu0 %v1482_v19 }
 0xde6   :  { %v1278_v21 = vpop.xlane.xlu0 %1277 }
 0xde7   :  { %v1279_v23 = vmul.f32 0.03125, %v1278_v21 }
 0xde9   :  { %v1280_v24 = vsub.f32 %v6266_v12, %v1279_v23 }
 0xdea   :  { %v1481_v33 = vpop.xlane.xlu0 %1480 }
 0xdeb   :  { %v1281_v46 = vmul.f32 %v1280_v24, %v1280_v24  ;;  %v1485_v34 = vmul.f32 0.03125, %v1481_v33 }
 0xded   :  { %v1282_v25 = vsel %vm38_vm0, %v1281_v46, 0.0  ;;  %v6291_v35 = vsub.f32 %v6022_v31, %v1485_v34 }
 0xdee   :  { %1283 = vadd.xlane.f32.xlu1 %v1282_v25  ;;  %v1484_v36 = vpop.xlane.xlu0 %1483 }
 0xdef   :  { %v1486_v37 = vmul.f32 0.03125, %v1484_v36  ;;  %v1489_v38 = vmul.f32 %v6291_v35, %v6291_v35 }
 0xdf1   :  { %v6296_v39 = vsub.f32 %v6027_v32, %v1486_v37  ;;  %v1491_v40 = vsel %vm38_vm0, %v1489_v38, 0.0  ;;  %v1292_v32 = vrot.slane %v1275_v45, %v6007_v20 }
 0xdf2   :  { %1492 = vadd.xlane.f32.xlu1 %v1491_v40 }
 0xdf3   :  { %v1490_v41 = vmul.f32 %v6296_v39, %v6296_v39 }
 0xdf5   :  { %v1494_v42 = vsel %vm38_vm0, %v1490_v41, 0.0 }
 0xdf6   :  { %1495 = vadd.xlane.f32.xlu0 %v1494_v42 }
 0xe03   :  { %1578 = vrot.lane.b32.xlu1 %v1523_v11, %s5922_s28 }
 0xe07   :  { %1583 = vrot.lane.b32.xlu1 %v4895_v1, %s5922_s28 }
 0xe0c   :  { %1576 = vrot.lane.b32.xlu0 %v1522_v16, %s5922_s28 }
 0xe77   :  { %v1284_v43 = vpop.xlane.xlu1 %1283 }
 0xe78   :  { %v1285_v31 = vmul.f32 0.03125, %v1284_v43 }
 0xe7a   :  { %v1286_v44 = vadd.f32 1e-05, %v1285_v31 }
 0xe7b   :  { %v1493_v59 = vpop.xlane.xlu1 %1492 }
 0xe7c   :  { %5730 = vrsqrt.f32 %v1286_v44  ;;  %v1497_v60 = vmul.f32 0.03125, %v1493_v59 }
 0xe7e   :  { %v1499_v3 = vadd.f32 1e-05, %v1497_v60 }
 0xe7f   :  { %v1496_v50 = vpop.xlane.xlu0 %1495  ;;  %v1579_v0 = vpop.permute.xlu1 %1578 }
 0xe80   :  { %v1498_v61 = vmul.f32 0.03125, %v1496_v50  ;;  %5732 = vrsqrt.f32 %v1499_v3 }
 0xe82   :  { %v1500_v4 = vadd.f32 1e-05, %v1498_v61 }
 0xe83   :  { %v1577_v62 = vpop.permute.xlu0 %1576 }
 0xe84   :  { %5734 = vrsqrt.f32 %v1500_v4 }
 0xe89   :  { %v5731_v47 = vpop.eup %5730 }
 0xe8a   :  { %v1288_v48 = vmul.f32 %v5731_v47, %v1280_v24  ;;  %v1514_v24 = vrot.slane %v1478_v17, %v6012_v22 }
 0xe8c   :  { %v1293_v51 = vmul.f32 %v1292_v32, %v1288_v48 }
 0xe8d   :  { %v5733_v19 = vpop.eup %5732 }
 0xe8e   :  { %v1298_v52 = vadd.f32 %v1297_v49, %v1293_v51  ;;  %v1503_v23 = vmul.f32 %v5733_v19, %v6291_v35 }
 0xe90   :  { %v1303_v53 = vpack.c.bf16 %v1298_v52, %v1298_v52  ;;  %v1509_v25 = vmul.f32 %v1508_v18, %v1503_v23 }
 0xe91   :  { %v5735_v21 = vpop.eup %5734 }
 0xe92   :  { %5289 = vmatmul.mubr.msk.bf16.vlgmr.msra.gmra.mxu1 %vm38_vm0, %v1303_v53  ;;  %v1504_v46 = vmul.f32 %v5735_v21, %v6296_v39  ;;  %v1515_v15 = vadd.f32 %v1514_v24, %v1509_v25 }
 0xe93   :  { %5308 = vmatprep.mubr.msk.bf16.mxu1 %vm5924_vm1, %v5923_v13  ;;  %5305 = vmatpush3.bf16.msra.mxu1 %v1523_v11 }
 0xe94   :  { %5306 = vmatprep.subr.bf16.mxu1 %v5923_v13  ;;  %v1510_v26 = vmul.f32 %v1508_v18, %v1504_v46 }
 0xe96   :  { %v1516_v27 = vadd.f32 %v1514_v24, %v1510_v26  ;;  %v1584_v24 = vpop.permute.xlu1 %1583 }
 0xe97   :  { %5307 = vmatpush3.bf16.msra.mxu1 %v1522_v16 }
 0xe98   :  { %5312 = vmatprep.subr.bf16.mxu1 %v5923_v13  ;;  %v1521_v28 = vpack.c.bf16 %v1516_v27, %v1515_v15 }
 0xe9a   :  { %5309 = vmatmul.mubr.msk.bf16.vlgmr.msra.gmra.mxu1 %vm38_vm0, %v1521_v28 }
 0xe9b   :  { %5316 = vmatprep.mubr.msk.bf16.mxu1 %vm5924_vm1, %v5923_v13  ;;  %5313 = vmatpush3.bf16.msra.mxu1 %v1579_v0 }
 0xe9c   :  { %5314 = vmatprep.subr.bf16.mxu1 %v5923_v13 }
 0xe9f   :  { %5315 = vmatpush3.bf16.msra.mxu1 %v1577_v62 }
 0xea0   :  { %5326 = vmatprep.subr.bf16.mxu1 %v5923_v13 }
 0xf52   :  { %v1348_v30 = vpop.f32.mrf.mxu1 }
 0xf53   :  { %v1349_v33 = vadd.f32 %v4889_v29, %v1348_v30 }
 0xf54   :  { %v5290_v34 = vpop.f32.mrf.mxu1 }
 0xf55   :  { %v1355_v35 = vmul.f32 0.70710677, %v1349_v33  ;;  %v1354_v59 = vmul.f32 0.5, %v1349_v33 }
 0xf56   :  { %v1351_v36 = vpop.f32.mrf.mxu1 }
 0xf57   :  { %v1356_v37 = vand.u32 2147483647, %v1355_v35  ;;  %vm1376_vm11 = vcmp.lt.f32.partialorder %v1355_v35, 0.0 }
 0xf58   :  { %v5291_v38 = vpop.f32.mrf.mxu1 }
 0xf59   :  { %v1357_v39 = vmul.f32 0.3275911, %v1356_v37  ;;  %v1370_v41 = vsub.f32 0.0, %v1356_v37 }
 0xf5a   :  { %v1566_v2 = vpop.f32.mrf.mxu1 }
 0xf5b   :  { %v1358_v40 = vadd.f32 1.0, %v1357_v39  ;;  %v1371_v42 = vmul.f32 %v1370_v41, %v1356_v37  ;;  %v1567_v3 = vadd.f32 %v4895_v1, %v1566_v2 }
 0xf5c   :  { %v5310_v4 = vpop.f32.mrf.mxu1 }
 0xf5d   :  { %5736 = vrcp.f32 %v1358_v40  ;;  %v1372_v44 = vmul.f32 1.442695, %v1371_v42  ;;  %v1629_v6 = vmul.f32 0.35355338, %v1567_v3 }
 0xf5e   :  { %v1569_v5 = vpop.f32.mrf.mxu1 }
 0xf5f   :  { %5738 = vpow2.f32 %v1372_v44  ;;  %v1570_v7 = vadd.f32 %v4895_v1, %v1569_v5 }
 0xf60   :  { %v5311_v8 = vpop.f32.mrf.mxu1 }
 0xf61   :  { %v1630_v9 = vmul.f32 0.35355338, %v1570_v7 }
 0xf63   :  { %v1631_v10 = vpack.c.bf16 %v1630_v9, %v1629_v6 }
 0xf65   :  { %1754 = vrot.lane.b32.xlu0 %v1631_v10, %s5925_s14 }
 0xf69   :  { %1877 = vrot.lane.b32.xlu0 %v1631_v10, %s5926_s15 }
 0xf6a   :  { %v5737_v43 = vpop.eup %5736 }
 0xf6b   :  { %v1361_v31 = vmul.f32 1.0614054, %v5737_v43 }
 0xf6c   :  { %v5739_v54 = vpop.eup %5738 }
 0xf6d   :  { %v4891_v45 = vadd.f32 -1.4531521, %v1361_v31  ;;  %2000 = vrot.lane.b32.xlu0 %v1631_v10, %s5927_s16 }
 0xf6f   :  { %v1363_v32 = vmul.f32 %v5737_v43, %v4891_v45 }
 0xf71   :  { %v1364_v47 = vadd.f32 1.4214138, %v1363_v32 }
 0xf73   :  { %v1365_v48 = vmul.f32 %v5737_v43, %v1364_v47 }
 0xf75   :  { %v4892_v49 = vadd.f32 -0.28449672, %v1365_v48 }
 0xf77   :  { %v1367_v51 = vmul.f32 %v5737_v43, %v4892_v49 }
 0xf79   :  { %v1368_v52 = vadd.f32 0.2548296, %v1367_v51 }
 0xf7b   :  { %v1369_v53 = vmul.f32 %v5737_v43, %v1368_v52 }
 0xf7d   :  { %v1374_v55 = vmul.f32 %v5739_v54, %v1369_v53 }
 0xf7f   :  { %v1375_v56 = vsub.f32 1.0, %v1374_v55 }
 0xf81   :  { %v1377_v57 = vsub.f32 0.0, %v1375_v56 }
 0xf83   :  { %v1378_v58 = vsel %vm1376_vm11, %v1377_v57, %v1375_v56 }
 0xf84   :  { %v1379_v50 = vadd.f32 1.0, %v1378_v58 }
 0xf86   :  { %v1380_v60 = vmul.f32 %v1379_v50, %v1354_v59 }
 0xf88   :  { %v1389_v61 = vpack.c.bf16 %v1380_v60, %v1380_v60 }
 0xf8a   :  { %5301 = vmatmul.mubr.msk.bf16.vlgmr.msra.gmra.mxu0 %vm1394_vm12, %v1389_v61 }
 0xf8b   :  { %5322 = vmatprep.mubr.msk.bf16.mxu0 %vm5924_vm1, %v5923_v13 }
 0xfd7   :  { %v1755_v34 = vpop.permute.xlu0 %1754 }
0x104a   :  { %v1432_v11 = vpop.f32.mrf.mxu0 }
0x104b   :  { %v1438_v16 = vadd.f32 %v1432_v11, %v6266_v12 }
0x104c   :  { %v5302_v17 = vpop.f32.mrf.mxu0 }
0x104d   :  { %v1444_v18 = vadd.f32 %v4894_v14, %v1438_v16 }
0x104e   :  { %v1435_v19 = vpop.f32.mrf.mxu0 }
0x104f   :  { %1445 = vst.msk [vmem:[#allocation2] sm:$0xff] %vm38_vm0, %v1444_v18  ;;  %v1573_v21 = vpack.c.bf16 %v1444_v18, %v1444_v18 }
0x1050   :  { %v5303_v23 = vpop.f32.mrf.mxu0 }
0x1051   :  { %5317 = vmatmul.mubr.msk.bf16.vlgmr.msra.gmra.mxu1 %vm38_vm0, %v1573_v21 }
0x1052   :  { %5328 = vmatprep.mubr.msk.bf16.mxu1 %vm5924_vm1, %v5923_v13 }
0x1111   :  { %v1623_v46 = vpop.f32.mrf.mxu1 }
0x1112   :  { %v1624_v25 = vadd.f32 %v1623_v46, %v1584_v24 }
0x1113   :  { %v5318_v26 = vpop.f32.mrf.mxu1 }
0x1114   :  { %v6387_v15 = vpack.c.bf16 %v1624_v25, %v1624_v25 }
0x1115   :  { %v1626_v27 = vpop.f32.mrf.mxu1 }
0x1116   :  { %1756 = vrot.lane.b32.xlu1 %v6387_v15, %s5925_s14  ;;  %v1637_v12 = vsel %vm178_vm3, %v6387_v15, 0 }
0x1117   :  { %v5319_v28 = vpop.f32.mrf.mxu1  ;;  %5321 = vmatpush3.bf16.xpose.msra.mxu0 %v1637_v12 }
0x1118   :  { %5332 = vmatprep.subr.bf16.mxu0 %v5923_v13 }
0x111a   :  { %1879 = vrot.lane.b32.xlu1 %v6387_v15, %s5926_s15 }
0x111e   :  { %2002 = vrot.lane.b32.xlu1 %v6387_v15, %s5927_s16  ;;  %5323 = vmatmul.mubr.msk.bf16.vlgmr.msra.gmra.mxu0 %vm178_vm3, %v1631_v10 }
0x111f   :  { %5334 = vmatprep.mubr.msk.bf16.mxu0 %vm5924_vm1, %v5923_v13 }
0x1147   :  { %1446 = vxpose.xlu1.b32.start.end [1/1] (short) (narrow) %v6074_v63, 16  ;;  %v1878_v63 = vpop.permute.xlu0 %1877 }
0x114b   :  { %v2001_v38 = vpop.permute.xlu0 %2000 }
0x1188   :  { %v1757_v29 = vpop.permute.xlu1 %1756 }
0x1189   :  { %v1762_v30 = vsel %vm178_vm3, %v1757_v29, 0 }
0x118a   :  { %5333 = vmatpush3.bf16.xpose.msra.mxu0 %v1762_v30 }
0x118b   :  { %5344 = vmatprep.subr.bf16.mxu0 %v5923_v13 }
0x118c   :  { %v1880_v33 = vpop.permute.xlu1 %1879 }
0x118d   :  { %v1885_v35 = vsel %vm178_vm3, %v1880_v33, 0 }
0x1190   :  { %v2003_v36 = vpop.permute.xlu1 %2002 }
0x1191   :  { %5335 = vmatmul.mubr.msk.bf16.vlgmr.msra.gmra.mxu0 %vm178_vm3, %v1755_v34  ;;  %v2008_v37 = vsel %vm178_vm3, %v2003_v36, 0 }
0x1192   :  { %5345 = vmatpush3.bf16.xpose.msra.mxu0 %v1885_v35  ;;  %5346 = vmatprep.mubr.msk.bf16.mxu0 %vm5924_vm1, %v5923_v13 }
0x1193   :  { %5356 = vmatprep.subr.bf16.mxu0 %v5923_v13 }
0x1199   :  { %5347 = vmatmul.mubr.msk.bf16.vlgmr.msra.gmra.mxu0 %vm178_vm3, %v1878_v63 }
0x119a   :  { %5357 = vmatpush3.bf16.xpose.msra.mxu0 %v2008_v37  ;;  %5358 = vmatprep.mubr.msk.bf16.mxu0 %vm5924_vm1, %v5923_v13 }
0x119b   :  { %5368 = vmatprep.subr.bf16.mxu0 %v5923_v13 }
0x11a1   :  { %5359 = vmatmul.mubr.msk.bf16.vlgmr.msra.gmra.mxu0 %vm178_vm3, %v2001_v38 }
0x11a2   :  { %5372 = vmatprep.mubr.msk.bf16.mxu0 %vm5924_vm1, %v5923_v13 }
0x11c3   :  { %v1462_v39 = vpop.trf.xlu1 }
0x11c7   :  { %v1463_v43 = vpop.trf.xlu1 }
0x11de   :  { %v1673_v40 = vpop.f32.mrf.mxu0 }
0x11df   :  { %v1674_v41 = vadd.f32 %v1673_v40, %v1462_v39 }
0x11e0   :  { %v5324_v42 = vpop.f32.mrf.mxu0 }
0x11e1   :  { %v1680_v31 = vsel %vm178_vm3, %v1674_v41, -inf }
0x11e2   :  { %1681 = vmax.xlane.f32.xlu0 %v1680_v31  ;;  %v1676_v44 = vpop.f32.mrf.mxu0 }
0x11e3   :  { %v1677_v45 = vadd.f32 %v1676_v44, %v1463_v43 }
0x11e4   :  { %v5325_v32 = vpop.f32.mrf.mxu0 }
0x11e5   :  { %v1683_v47 = vsel %vm178_vm3, %v1677_v45, -inf }
0x11e6   :  { %1684 = vmax.xlane.f32.xlu0 %v1683_v47 }
0x1251   :  { %v1798_v48 = vpop.f32.mrf.mxu0 }
0x1252   :  { %v1799_v49 = vadd.f32 %v1798_v48, %v1462_v39 }
0x1253   :  { %v5336_v51 = vpop.f32.mrf.mxu0 }
0x1254   :  { %v1805_v52 = vsel %vm178_vm3, %v1799_v49, -inf }
0x1255   :  { %1806 = vmax.xlane.f32.xlu0 %v1805_v52  ;;  %v1801_v53 = vpop.f32.mrf.mxu0 }
0x1256   :  { %v1802_v54 = vadd.f32 %v1801_v53, %v1463_v43 }
0x1257   :  { %v5337_v55 = vpop.f32.mrf.mxu0 }
0x1258   :  { %v1808_v56 = vsel %vm178_vm3, %v1802_v54, -inf }
0x1259   :  { %1809 = vmax.xlane.f32.xlu0 %v1808_v56  ;;  %v1921_v0 = vpop.f32.mrf.mxu0 }
0x125a   :  { %v1922_v57 = vadd.f32 %v1921_v0, %v1462_v39 }
0x125b   :  { %v5348_v58 = vpop.f32.mrf.mxu0 }
0x125c   :  { %v1928_v59 = vsel %vm178_vm3, %v1922_v57, -inf }
0x125d   :  { %1929 = vmax.xlane.f32.xlu1 %v1928_v59  ;;  %v1924_v50 = vpop.f32.mrf.mxu0 }
0x125e   :  { %v1925_v60 = vadd.f32 %v1924_v50, %v1463_v43 }
0x125f   :  { %v5349_v61 = vpop.f32.mrf.mxu0 }
0x1260   :  { %v1931_v62 = vsel %vm178_vm3, %v1925_v60, -inf }
0x1261   :  { %1932 = vmax.xlane.f32.xlu0 %v1931_v62  ;;  %v2044_v1 = vpop.f32.mrf.mxu0 }
0x1262   :  { %v2045_v2 = vadd.f32 %v2044_v1, %v1462_v39 }
0x1263   :  { %v5360_v3 = vpop.f32.mrf.mxu0 }
0x1264   :  { %v2051_v4 = vsel %vm178_vm3, %v2045_v2, -inf }
0x1265   :  { %2052 = vmax.xlane.f32.xlu0 %v2051_v4  ;;  %v2047_v5 = vpop.f32.mrf.mxu0 }
0x1266   :  { %v2048_v6 = vadd.f32 %v2047_v5, %v1463_v43 }
0x1267   :  { %v5361_v7 = vpop.f32.mrf.mxu0 }
0x1268   :  { %v2054_v8 = vsel %vm178_vm3, %v2048_v6, -inf }
0x1269   :  { %2055 = vmax.xlane.f32.xlu0 %v2054_v8 }
0x126b   :  { %v1682_v9 = vpop.xlane.xlu0 %1681 }
0x126c   :  { %v1686_v10 = vsub.f32 %v1674_v41, %v1682_v9 }
0x126e   :  { %1828 = vrot.lane.b32.xlu1 %v6387_v15, %s5929_s17  ;;  %v1688_v14 = vmul.f32 1.442695, %v1686_v10 }
0x126f   :  { %v1685_v11 = vpop.xlane.xlu0 %1684 }
0x1270   :  { %v1687_v16 = vsub.f32 %v1677_v45, %v1685_v11  ;;  %5740 = vpow2.f32 %v1688_v14 }
0x1272   :  { %v1690_v17 = vmul.f32 1.442695, %v1687_v16 }
0x1274   :  { %5742 = vpow2.f32 %v1690_v17 }
0x127d   :  { %v5741_v18 = vpop.eup %5740 }
0x127e   :  { %v1692_v19 = vsel %vm178_vm3, %v5741_v18, 0.0 }
0x127f   :  { %1704 = vrot.lane.b32.xlu0 %v6387_v15, %s5922_s28 }
0x1281   :  { %v5743_v21 = vpop.eup %5742 }
0x1282   :  { %v1695_v23 = vsel %vm178_vm3, %v5743_v21, 0.0 }
0x129e   :  { %1693 = vadd.xlane.f32.xlu0 %v1692_v19 }
0x12a2   :  { %1696 = vadd.xlane.f32.xlu0 %v1695_v23 }
0x12de   :  { %v1807_v24 = vpop.xlane.xlu0 %1806 }
0x12df   :  { %v1811_v46 = vsub.f32 %v1799_v49, %v1807_v24 }
0x12e1   :  { %v1813_v25 = vmul.f32 1.442695, %v1811_v46 }
0x12e2   :  { %v1810_v26 = vpop.xlane.xlu0 %1809 }
0x12e3   :  { %5744 = vpow2.f32 %v1813_v25  ;;  %v1812_v27 = vsub.f32 %v1802_v54, %v1810_v26 }
0x12e5   :  { %v1815_v12 = vmul.f32 1.442695, %v1812_v27 }
0x12e6   :  { %v1930_v28 = vpop.xlane.xlu1 %1929 }
0x12e7   :  { %5746 = vpow2.f32 %v1815_v12  ;;  %v1934_v29 = vsub.f32 %v1922_v57, %v1930_v28 }
0x12e9   :  { %v1936_v30 = vmul.f32 1.442695, %v1934_v29 }
0x12ea   :  { %v1933_v33 = vpop.xlane.xlu0 %1932  ;;  %v1829_v50 = vpop.permute.xlu1 %1828 }
0x12eb   :  { %5748 = vpow2.f32 %v1936_v30  ;;  %v1935_v34 = vsub.f32 %v1925_v60, %v1933_v33  ;;  %v1834_v61 = vsel %vm829_vm10, %v1829_v50, 0 }
0x12ed   :  { %v1938_v35 = vmul.f32 1.442695, %v1935_v34 }
0x12ee   :  { %v2053_v36 = vpop.xlane.xlu0 %2052 }
0x12ef   :  { %5750 = vpow2.f32 %v1938_v35  ;;  %v2057_v63 = vsub.f32 %v2045_v2, %v2053_v36  ;;  %v2155_v36 = vld [vmem:[%s7186_s3 + $0x168] sm:$0xff] }
0x12f0   :  { %v5745_v37 = vpop.eup %5744 }
0x12f1   :  { %v2059_v38 = vmul.f32 1.442695, %v2057_v63  ;;  %v1817_v39 = vsel %vm178_vm3, %v5745_v37, 0.0  ;;  %v2156_v63 = vld [vmem:[%s7186_s3 + $0x170] sm:$0xff] }
0x12f2   :  { %1818 = vadd.xlane.f32.xlu0 %v1817_v39  ;;  %v2056_v40 = vpop.xlane.xlu0 %2055 }
0x12f3   :  { %5752 = vpow2.f32 %v2059_v38  ;;  %v2058_v41 = vsub.f32 %v2048_v6, %v2056_v40  ;;  %v2159_v38 = vpack.c.bf16 %v2156_v63, %v2155_v36 }
0x12f4   :  { %v5747_v42 = vpop.eup %5746 }
0x12f5   :  { %v2061_v43 = vmul.f32 1.442695, %v2058_v41  ;;  %v1820_v31 = vsel %vm178_vm3, %v5747_v42, 0.0  ;;  %5369 = vmatpush3.bf16.msra.mxu0 %v2159_v38  ;;  %v2471_v38 = vld [vmem:[%s7186_s3 + $0x18] sm:$0xff] }
0x12f6   :  { %1821 = vadd.xlane.f32.xlu0 %v1820_v31  ;;  %v1705_v44 = vpop.permute.xlu0 %1704  ;;  %5370 = vmatprep.subr.bf16.mxu0 %v5923_v13 }
0x12f7   :  { %5754 = vpow2.f32 %v2061_v43  ;;  %v1710_v45 = vsel %vm829_vm10, %v1705_v44, 0  ;;  %v2154_v43 = vld [vmem:[%s7186_s3 + $0x160] sm:$0xff] }
0x12f8   :  { %v5749_v32 = vpop.eup %5748  ;;  %5327 = vmatpush3.bf16.msra.mxu1 %v1710_v45 }
0x12f9   :  { %v1940_v47 = vsel %vm178_vm3, %v5749_v32, 0.0  ;;  %5338 = vmatprep.subr.bf16.mxu1 %v5923_v13 }
0x12fa   :  { %1941 = vadd.xlane.f32.xlu0 %v1940_v47 }
0x12fc   :  { %v5751_v48 = vpop.eup %5750 }
0x12fd   :  { %v1943_v49 = vsel %vm178_vm3, %v5751_v48, 0.0 }
0x12fe   :  { %1944 = vadd.xlane.f32.xlu0 %v1943_v49 }
0x1300   :  { %v5753_v51 = vpop.eup %5752 }
0x1301   :  { %v2063_v52 = vsel %vm178_vm3, %v5753_v51, 0.0 }
0x1302   :  { %2064 = vadd.xlane.f32.xlu0 %v2063_v52 }
0x1304   :  { %v5755_v53 = vpop.eup %5754 }
0x1305   :  { %v2066_v54 = vsel %vm178_vm3, %v5755_v53, 0.0 }
0x1306   :  { %2067 = vadd.xlane.f32.xlu1 %v2066_v54 }
0x1317   :  { %1951 = vrot.lane.b32.xlu1 %v6387_v15, %s5931_s19 }
0x1318   :  { %2074 = vrot.lane.b32.xlu0 %v6387_v15, %s5930_s18 }
0x1327   :  { %v1694_v55 = vpop.xlane.xlu0 %1693 }
0x1328   :  { %5756 = vrcp.f32 %v1694_v55 }
0x132b   :  { %v1697_v56 = vpop.xlane.xlu0 %1696 }
0x132c   :  { %5758 = vrcp.f32 %v1697_v56 }
0x1335   :  { %v5757_v0 = vpop.eup %5756 }
0x1336   :  { %v1700_v58 = vmul.f32 %v5757_v0, %v5741_v18 }
0x1339   :  { %v5759_v57 = vpop.eup %5758 }
0x133a   :  { %v1701_v59 = vmul.f32 %v5759_v57, %v5743_v21 }
0x133c   :  { %v1702_v60 = vpack.c.bf16 %v1701_v59, %v1700_v58 }
0x133e   :  { %5329 = vmatmul.mubr.msk.bf16.vlgmr.msra.gmra.mxu1 %vm178_vm3, %v1702_v60 }
0x133f   :  { %5339 = vmatpush3.bf16.msra.mxu1 %v1834_v61  ;;  %5340 = vmatprep.mubr.msk.bf16.mxu1 %vm5924_vm1, %v5923_v13 }
0x1340   :  { %5350 = vmatprep.subr.bf16.mxu1 %v5923_v13 }
0x137b   :  { %v1819_v15 = vpop.xlane.xlu0 %1818 }
0x137c   :  { %5760 = vrcp.f32 %v1819_v15 }
0x137f   :  { %v1822_v62 = vpop.xlane.xlu0 %1821 }
0x1380   :  { %5762 = vrcp.f32 %v1822_v62 }
0x1383   :  { %v1942_v1 = vpop.xlane.xlu0 %1941 }
0x1384   :  { %5764 = vrcp.f32 %v1942_v1 }
0x1387   :  { %v1945_v2 = vpop.xlane.xlu0 %1944 }
0x1388   :  { %5766 = vrcp.f32 %v1945_v2 }
0x1389   :  { %v5761_v3 = vpop.eup %5760 }
0x138a   :  { %v1825_v6 = vmul.f32 %v5761_v3, %v5745_v37 }
0x138b   :  { %v2065_v4 = vpop.xlane.xlu0 %2064 }
0x138c   :  { %5768 = vrcp.f32 %v2065_v4  ;;  %v4906_v4 = vld [vmem:[%s7186_s3 + $0x178] ss:$0 sm:$0xff] }
0x138d   :  { %v5763_v5 = vpop.eup %5762 }
0x138e   :  { %v1826_v7 = vmul.f32 %v5763_v5, %v5747_v42  ;;  %v2153_v42 = vld [vmem:[%s7186_s3 + $0x158] sm:$0xff] }
0x138f   :  { %v2068_v8 = vpop.xlane.xlu1 %2067  ;;  %v2075_v19 = vpop.permute.xlu0 %2074  ;;  %v2158_v31 = vpack.c.bf16 %v2154_v43, %v2153_v42  ;;  %v2470_v42 = vld [vmem:[%s7186_s3 + $0x10] sm:$0xff] }
0x1390   :  { %5770 = vrcp.f32 %v2068_v8  ;;  %v1827_v9 = vpack.c.bf16 %v1826_v7, %v1825_v6  ;;  %v2080_v23 = vsel %vm829_vm10, %v2075_v19, 0  ;;  %v5874_v8 = vld [vmem:[%s7184_s1] sm:$0xff] }
0x1391   :  { %v5765_v10 = vpop.eup %5764  ;;  %5371 = vmatpush3.bf16.msra.mxu0 %v2158_v31  ;;  %v2252_v31 = vld [vmem:[%s7186_s3 + $0x198] sm:$0xff] }
0x1392   :  { %5341 = vmatmul.mubr.msk.bf16.vlgmr.msra.gmra.mxu1 %vm178_vm3, %v1827_v9  ;;  %v1948_v17 = vmul.f32 %v5765_v10, %v5749_v32  ;;  %5384 = vmatprep.subr.bf16.mxu0 %v5923_v13 }
0x1393   :  { %v1952_v11 = vpop.permute.xlu1 %1951  ;;  %5352 = vmatprep.mubr.msk.bf16.mxu1 %vm5924_vm1, %v5923_v13 }
0x1394   :  { %v1957_v14 = vsel %vm829_vm10, %v1952_v11, 0  ;;  %v6498_v11 = vld [vmem:[%s7183_s0 + $0x8] sm:$0xff] }
0x1395   :  { %v5767_v16 = vpop.eup %5766  ;;  %5351 = vmatpush3.bf16.msra.mxu1 %v1957_v14 }
0x1396   :  { %5362 = vmatprep.subr.bf16.mxu1 %v5923_v13  ;;  %v1949_v18 = vmul.f32 %v5767_v16, %v5751_v48 }
0x1398   :  { %v1950_v21 = vpack.c.bf16 %v1949_v18, %v1948_v17  ;;  %v5875_v18 = vld [vmem:[%s7184_s1 + $0x8] sm:$0xff] }
0x1399   :  { %v5769_v24 = vpop.eup %5768 }
0x139a   :  { %5353 = vmatmul.mubr.msk.bf16.vlgmr.msra.gmra.mxu1 %vm178_vm3, %v1950_v21  ;;  %v2071_v25 = vmul.f32 %v5769_v24, %v5753_v51  ;;  %v2446_v21 = vsel %vm38_vm0, %v6498_v11, 0.0 }
0x139b   :  { %5363 = vmatpush3.bf16.msra.mxu1 %v2080_v23  ;;  %5364 = vmatprep.mubr.msk.bf16.mxu1 %vm5924_vm1, %v5923_v13 }
0x139c   :  { %5376 = vmatprep.subr.bf16.mxu1 %v5923_v13 }
0x139d   :  { %v5771_v46 = vpop.eup %5770 }
0x139e   :  { %v2072_v26 = vmul.f32 %v5771_v46, %v5755_v53 }
0x13a0   :  { %v2073_v27 = vpack.c.bf16 %v2072_v26, %v2071_v25 }
0x13a2   :  { %5365 = vmatmul.mubr.msk.bf16.vlgmr.msra.gmra.mxu1 %vm178_vm3, %v2073_v27 }
0x13a3   :  { %5380 = vmatprep.mubr.msk.bf16.mxu1 %vm5924_vm1, %v5923_v13 }
0x13fe   :  { %v1746_v12 = vpop.f32.mrf.mxu1 }
0x1400   :  { %v5330_v28 = vpop.f32.mrf.mxu1 }
0x1402   :  { %v1749_v29 = vpop.f32.mrf.mxu1 }
0x1404   :  { %v5331_v30 = vpop.f32.mrf.mxu1 }
0x1452   :  { %v1870_v33 = vpop.f32.mrf.mxu1 }
0x1454   :  { %v5342_v34 = vpop.f32.mrf.mxu1 }
0x1456   :  { %v1873_v35 = vpop.f32.mrf.mxu1 }
0x1457   :  { %v5664_v37 = vpack.i.bf16 %v1873_v35, %v1870_v33 }
0x1458   :  { %v5343_v39 = vpop.f32.mrf.mxu1 }
0x1459   :  { %5665 = vrot.lane.b32.xlu1 %v5664_v37, %s5932_s20  ;;  %v2472_v39 = vld [vmem:[%s7186_s3 + $0x20] sm:$0xff] }
0x145a   :  { %v1993_v40 = vpop.f32.mrf.mxu1 }
0x145c   :  { %v5354_v41 = vpop.f32.mrf.mxu1 }
0x145d   :  { %v2469_v41 = vld [vmem:[%s7186_s3 + $0x8] sm:$0xff] }
0x145e   :  { %v1996_v44 = vpop.f32.mrf.mxu1  ;;  %v2474_v43 = vpack.c.bf16 %v2470_v42, %v2469_v41 }
0x145f   :  { %v5669_v45 = vpack.i.bf16 %v1996_v44, %v1993_v40  ;;  %v2475_v40 = vpack.c.bf16 %v2472_v39, %v2471_v38  ;;  %v2253_v44 = vld [vmem:[%s7186_s3 + $0x1a0] sm:$0xff]  ;;  %v4908_v39 = vld [vmem:[%s7186_s3 + $0x1a8] ss:$0 sm:$0xff] }
0x1460   :  { %v5355_v32 = vpop.f32.mrf.mxu1 }
0x1461   :  { %5670 = vrot.lane.b32.xlu0 %v5669_v45, %s5933_s30  ;;  %v2256_v45 = vpack.c.bf16 %v2253_v44, %v2252_v31  ;;  %v2250_v32 = vld [vmem:[%s7186_s3 + $0x188] sm:$0xff] }
0x1462   :  { %v2116_v47 = vpop.f32.mrf.mxu1 }
0x1463   :  { %5377 = vmatpush3.bf16.msra.mxu1 %v2256_v45 }
0x1464   :  { %v5366_v48 = vpop.f32.mrf.mxu1  ;;  %5378 = vmatprep.subr.bf16.mxu1 %v5923_v13 }
0x1466   :  { %v2119_v49 = vpop.f32.mrf.mxu1 }
0x1467   :  { %v5674_v51 = vpack.i.bf16 %v2119_v49, %v2116_v47  ;;  %v2251_v47 = vld [vmem:[%s7186_s3 + $0x190] sm:$0xff]  ;;  %v6548_v49 = vld [vmem:[%s7186_s3 + $0x28] ss:$0 sm:$0xff] }
0x1468   :  { %v5367_v52 = vpop.f32.mrf.mxu1  ;;  %v2255_v48 = vpack.c.bf16 %v2251_v47, %v2250_v32 }
0x1469   :  { %5675 = vrot.lane.b32.xlu1 %v5674_v51, %s5934_s6 }
0x146a   :  { %5379 = vmatpush3.bf16.msra.mxu1 %v2255_v48 }
0x146b   :  { %5396 = vmatprep.subr.bf16.mxu1 %v5923_v13 }
0x14cb   :  { %v5666_v53 = vpop.permute.xlu1 %5665 }
0x14cc   :  { %v5668_v55 = vunpack.i.h.bf16 %v5666_v53  ;;  %v5667_v56 = vunpack.i.l.bf16 %v5666_v53 }
0x14ce   :  { %v2148_v59 = vsel %vm178_vm3, %v1749_v29, %v5668_v55  ;;  %v2147_v50 = vsel %vm178_vm3, %v1746_v12, %v5667_v56 }
0x14d3   :  { %v5671_v54 = vpop.permute.xlu0 %5670 }
0x14d4   :  { %v5673_v0 = vunpack.i.h.bf16 %v5671_v54  ;;  %v5672_v57 = vunpack.i.l.bf16 %v5671_v54 }
0x14d6   :  { %v2150_v15 = vsel %vm26_vm2, %v2148_v59, %v5673_v0  ;;  %v2149_v62 = vsel %vm26_vm2, %v2147_v50, %v5672_v57  ;;  %v2211_v59 = vld [vmem:[%s7186_s3 + $0x180] sm:$0x3] }
0x14db   :  { %v5676_v58 = vpop.permute.xlu1 %5675 }
0x14dc   :  { %v5678_v60 = vunpack.i.h.bf16 %v5676_v58  ;;  %v5677_v61 = vunpack.i.l.bf16 %v5676_v58 }
0x14de   :  { %v2151_v1 = vsel %vm623_vm9, %v2149_v62, %v5677_v61  ;;  %v2152_v2 = vsel %vm623_vm9, %v2150_v15, %v5678_v60  ;;  %v2241_v61 = vrot.slane %v2211_v59, %v6007_v20 }
0x14df   :  { %v2157_v3 = vpack.c.bf16 %v2152_v2, %v2151_v1  ;;  %v2445_v1 = vld [vmem:[%s7186_s3] sm:$0x3] }
0x14e1   :  { %5373 = vmatmul.mubr.msk.bf16.vlgmr.msra.gmra.mxu0 %vm38_vm0, %v2157_v3 }
0x14e2   :  { %5392 = vmatprep.mubr.msk.bf16.mxu0 %vm5924_vm1, %v5923_v13 }
0x15a1   :  { %v2202_v5 = vpop.f32.mrf.mxu0 }
0x15a2   :  { %v2203_v6 = vadd.f32 %v4906_v4, %v2202_v5 }
0x15a3   :  { %v5374_v7 = vpop.f32.mrf.mxu0 }
0x15a4   :  { %v6493_v9 = vadd.f32 %v5874_v8, %v2203_v6  ;;  %v2462_v7 = vrot.slane %v2445_v1, %v6007_v20 }
0x15a5   :  { %v2205_v10 = vpop.f32.mrf.mxu0 }
0x15a6   :  { %v2206_v14 = vadd.f32 %v4906_v4, %v2205_v10  ;;  %v2212_v16 = vsel %vm38_vm0, %v6493_v9, 0.0  ;;  %v2247_v4 = vrot.slane %v2211_v59, %v6012_v22 }
0x15a7   :  { %2213 = vadd.xlane.f32.xlu0 %v2212_v16  ;;  %v5375_v17 = vpop.f32.mrf.mxu0 }
0x15a8   :  { %v6505_v19 = vadd.f32 %v5875_v18, %v2206_v14  ;;  %v2467_v17 = vrot.slane %v2445_v1, %v6012_v22 }
0x15aa   :  { %v2215_v23 = vsel %vm38_vm0, %v6505_v19, 0.0 }
0x15ab   :  { %2447 = vadd.xlane.f32.xlu0 %v2446_v21  ;;  %2216 = vadd.xlane.f32.xlu1 %v2215_v23 }
0x1630   :  { %v2214_v24 = vpop.xlane.xlu0 %2213 }
0x1631   :  { %v2218_v46 = vmul.f32 0.03125, %v2214_v24  ;;  %v4917_v24 = vld [vmem:[%s7184_s1 + $0x10] sm:$0xff] }
0x1633   :  { %v2220_v25 = vsub.f32 %v6493_v9, %v2218_v46  ;;  %v4918_v46 = vld [vmem:[%s7184_s1 + $0x18] sm:$0xff] }
0x1634   :  { %v2448_v26 = vpop.xlane.xlu0 %2447  ;;  %v2217_v27 = vpop.xlane.xlu1 %2216 }
0x1635   :  { %v2449_v12 = vmul.f32 0.03125, %v2448_v26  ;;  %v2219_v28 = vmul.f32 0.03125, %v2217_v27  ;;  %v2222_v29 = vmul.f32 %v2220_v25, %v2220_v25  ;;  %v2524_v26 = vpack.c.bf16 %v4918_v46, %v4917_v24  ;;  %v2366_v27 = vld [vmem:[%s7186_s3 + $0x1e0] sm:$0xff] }
0x1637   :  { %v2450_v30 = vsub.f32 %v6498_v11, %v2449_v12  ;;  %v2221_v33 = vsub.f32 %v6505_v19, %v2219_v28  ;;  %v2224_v34 = vsel %vm38_vm0, %v2222_v29, 0.0  ;;  %v2367_v12 = vld [vmem:[%s7186_s3 + $0x1e8] sm:$0xff]  ;;  %v2364_v29 = vld [vmem:[%s7186_s3 + $0x1d0] sm:$0xff] }
0x1638   :  { %2225 = vadd.xlane.f32.xlu0 %v2224_v34  ;;  %v2372_v28 = vpack.c.bf16 %v2367_v12, %v2366_v27  ;;  %v2362_v34 = vld [vmem:[%s7186_s3 + $0x1c0] sm:$0xff] }
0x1639   :  { %v2451_v35 = vmul.f32 %v2450_v30, %v2450_v30  ;;  %v2223_v36 = vmul.f32 %v2221_v33, %v2221_v33 }
0x163a   :  { %5385 = vmatpush3.bf16.msra.mxu0 %v2372_v28 }
0x163b   :  { %v2452_v63 = vsel %vm38_vm0, %v2451_v35, 0.0  ;;  %v2227_v37 = vsel %vm38_vm0, %v2223_v36, 0.0  ;;  %5386 = vmatprep.subr.bf16.mxu0 %v5923_v13  ;;  %v2363_v35 = vld [vmem:[%s7186_s3 + $0x1c8] sm:$0xff] }
0x163c   :  { %2453 = vadd.xlane.f32.xlu0 %v2452_v63  ;;  %2228 = vadd.xlane.f32.xlu1 %v2227_v37  ;;  %v2370_v36 = vpack.c.bf16 %v2363_v35, %v2362_v34  ;;  %v2360_v63 = vld [vmem:[%s7186_s3 + $0x1b0] sm:$0xff]  ;;  %v2361_v37 = vld [vmem:[%s7186_s3 + $0x1b8] sm:$0xff] }
0x163d   :  { %v2369_v38 = vpack.c.bf16 %v2361_v37, %v2360_v63 }
0x164d   :  { %2529 = vrot.lane.b32.xlu1 %v2475_v40, %s5922_s28 }
0x1651   :  { %2534 = vrot.lane.b32.xlu1 %v6548_v49, %s5922_s28 }
0x1652   :  { %2527 = vrot.lane.b32.xlu0 %v2474_v43, %s5922_s28 }
0x16c1   :  { %v2226_v51 = vpop.xlane.xlu0 %2225 }
0x16c2   :  { %v2230_v52 = vmul.f32 0.03125, %v2226_v51 }
0x16c4   :  { %v2232_v53 = vadd.f32 1e-05, %v2230_v52 }
0x16c5   :  { %v2454_v54 = vpop.xlane.xlu0 %2453  ;;  %v2229_v55 = vpop.xlane.xlu1 %2228 }
0x16c6   :  { %5772 = vrsqrt.f32 %v2232_v53  ;;  %v2455_v56 = vmul.f32 0.03125, %v2454_v54  ;;  %v2231_v0 = vmul.f32 0.03125, %v2229_v55 }
0x16c8   :  { %v2456_v57 = vadd.f32 1e-05, %v2455_v56  ;;  %v2233_v58 = vadd.f32 1e-05, %v2231_v0 }
0x16c9   :  { %v2530_v23 = vpop.permute.xlu1 %2529 }
0x16ca   :  { %5774 = vrsqrt.f32 %v2456_v57 }
0x16cb   :  { %5776 = vrsqrt.f32 %v2233_v58 }
0x16d3   :  { %v5773_v50 = vpop.eup %5772 }
0x16d4   :  { %v2236_v60 = vmul.f32 %v5773_v50, %v2220_v25  ;;  %v2528_v25 = vpop.permute.xlu0 %2527 }
0x16d6   :  { %v2242_v3 = vmul.f32 %v2241_v61, %v2236_v60 }
0x16d7   :  { %v5775_v15 = vpop.eup %5774 }
0x16d8   :  { %v5777_v62 = vpop.eup %5776  ;;  %v2458_v5 = vmul.f32 %v5775_v15, %v2450_v30  ;;  %v2248_v8 = vadd.f32 %v2247_v4, %v2242_v3  ;;  %v2365_v30 = vld [vmem:[%s7186_s3 + $0x1d8] sm:$0xff]  ;;  %v2535_v15 = vpop.permute.xlu1 %2534 }
0x16d9   :  { %v2237_v2 = vmul.f32 %v5777_v62, %v2221_v33  ;;  %v2371_v33 = vpack.c.bf16 %v2365_v30, %v2364_v29 }
0x16da   :  { %v2463_v16 = vmul.f32 %v2462_v7, %v2458_v5 }
0x16db   :  { %v2243_v6 = vmul.f32 %v2241_v61, %v2237_v2  ;;  %5387 = vmatpush3.bf16.msra.mxu0 %v2371_v33 }
0x16dc   :  { %v2468_v18 = vadd.f32 %v2467_v17, %v2463_v16  ;;  %5388 = vmatprep.subr.bf16.mxu0 %v5923_v13 }
0x16dd   :  { %v2249_v10 = vadd.f32 %v2247_v4, %v2243_v6 }
0x16de   :  { %v2473_v21 = vpack.c.bf16 %v2468_v18, %v2468_v18 }
0x16df   :  { %v2254_v14 = vpack.c.bf16 %v2249_v10, %v2248_v8  ;;  %5389 = vmatpush3.bf16.msra.mxu0 %v2370_v36 }
0x16e0   :  { %5390 = vmatprep.subr.bf16.mxu0 %v5923_v13 }
0x16e1   :  { %5381 = vmatmul.mubr.msk.bf16.vlgmr.msra.gmra.mxu1 %vm38_vm0, %v2254_v14 }
0x16e2   :  { %5397 = vmatpush3.bf16.msra.mxu1 %v2475_v40  ;;  %5400 = vmatprep.mubr.msk.bf16.mxu1 %vm5924_vm1, %v5923_v13 }
0x16e3   :  { %5398 = vmatprep.subr.bf16.mxu1 %v5923_v13  ;;  %5391 = vmatpush3.bf16.msra.mxu0 %v2369_v38 }
0x16e4   :  { %5412 = vmatprep.subr.bf16.mxu0 %v5923_v13 }
0x16e6   :  { %5399 = vmatpush3.bf16.msra.mxu1 %v2474_v43 }
0x16e7   :  { %5404 = vmatprep.subr.bf16.mxu1 %v5923_v13 }
0x16e9   :  { %5401 = vmatmul.mubr.msk.bf16.vlgmr.msra.gmra.mxu1 %vm38_vm0, %v2473_v21 }
0x16ea   :  { %5405 = vmatpush3.bf16.msra.mxu1 %v2530_v23  ;;  %5408 = vmatprep.mubr.msk.bf16.mxu1 %vm5924_vm1, %v5923_v13 }
0x16eb   :  { %5406 = vmatprep.subr.bf16.mxu1 %v5923_v13 }
0x16ee   :  { %5407 = vmatpush3.bf16.msra.mxu1 %v2528_v25 }
0x16ef   :  { %5418 = vmatprep.subr.bf16.mxu1 %v5923_v13 }
0x16f1   :  { %5409 = vmatmul.mubr.msk.bf16.vlgmr.msra.gmra.mxu1 %vm38_vm0, %v2524_v26 }
0x16f2   :  { %5420 = vmatprep.mubr.msk.bf16.mxu1 %vm5924_vm1, %v5923_v13 }
0x17a1   :  { %v2299_v40 = vpop.f32.mrf.mxu1 }
0x17a2   :  { %v6612_v41 = vadd.f32 %v4908_v39, %v2299_v40 }
0x17a3   :  { %v5382_v42 = vpop.f32.mrf.mxu1 }
0x17a4   :  { %v6615_v43 = vmul.f32 0.70710677, %v6612_v41 }
0x17a5   :  { %v2302_v31 = vpop.f32.mrf.mxu1 }
0x17a6   :  { %v2310_v44 = vand.u32 2147483647, %v6615_v43  ;;  %v6618_v45 = vadd.f32 %v4908_v39, %v2302_v31  ;;  %vm2350_vm13 = vcmp.lt.f32.partialorder %v6615_v43, 0.0 }
0x17a7   :  { %v5383_v32 = vpop.f32.mrf.mxu1 }
0x17a8   :  { %v2312_v47 = vmul.f32 0.3275911, %v2310_v44  ;;  %v6621_v48 = vmul.f32 0.70710677, %v6618_v45  ;;  %v2338_v61 = vsub.f32 0.0, %v2310_v44 }
0x17a9   :  { %v2518_v51 = vpop.f32.mrf.mxu1 }
0x17aa   :  { %v2314_v52 = vadd.f32 1.0, %v2312_v47  ;;  %v2311_v53 = vand.u32 2147483647, %v6621_v48  ;;  %v2519_v54 = vadd.f32 %v6548_v49, %v2518_v51  ;;  %v2340_v1 = vmul.f32 %v2338_v61, %v2310_v44 }
0x17ab   :  { %v5402_v55 = vpop.f32.mrf.mxu1  ;;  %vm2351_vm14 = vcmp.lt.f32.partialorder %v6621_v48, 0.0 }
0x17ac   :  { %5778 = vrcp.f32 %v2314_v52  ;;  %v2313_v56 = vmul.f32 0.3275911, %v2311_v53  ;;  %v2581_v0 = vmul.f32 0.35355338, %v2519_v54  ;;  %v2339_v2 = vsub.f32 0.0, %v2311_v53 }
0x17ad   :  { %v2521_v57 = vpop.f32.mrf.mxu1  ;;  %v2342_v10 = vmul.f32 1.442695, %v2340_v1  ;;  %v2307_v54 = vmul.f32 0.5, %v6618_v45 }
0x17ae   :  { %v2315_v58 = vadd.f32 1.0, %v2313_v56  ;;  %v6625_v59 = vpack.c.bf16 %v2581_v0, %v2581_v0  ;;  %v2341_v14 = vmul.f32 %v2339_v2, %v2311_v53  ;;  %v2306_v53 = vmul.f32 0.5, %v6612_v41  ;;  %v4919_v41 = vld [vmem:[%s7185_s2 + $0x8] sm:$0xff]  ;;  %s5878_s2 = scalar_lea.vmem %s4838_s27, 256 }
0x17af   :  { %v5403_v50 = vpop.f32.mrf.mxu1  ;;  %v2435_v45 = vsel %vm26_vm2, %v4919_v41, 0.0  ;;  %vm2439_vm4 = vcmp.gt.f32.partialorder %v4919_v41, 0.5  ;;  %p5879_p0 = scmp.ne.s32.totalorder %s4838_s27, %s5878_s2  ;;  %p5884_p2 = scmp.lt.s32.totalorder %s5878_s2, %s5878_s2 }
0x17b0   :  { %5780 = vrcp.f32 %v2315_v58  ;;  %2690 = vrot.lane.b32.xlu0 %v6625_v59, %s5925_s14  ;;  %v2344_v23 = vmul.f32 1.442695, %v2341_v14 }
0x17b1   :  { %v2574_v60 = vpop.f32.mrf.mxu1  ;;  %5782 = vpow2.f32 %v2342_v10  ;;  %p5885_p3 = por %p5884_p2, %p5883_p1 }
0x17b2   :  { %v2575_v3 = vadd.f32 %v2574_v60, %v2535_v15  ;;  %5784 = vpow2.f32 %v2344_v23 }
0x17b3   :  { %v5410_v62 = vpop.f32.mrf.mxu1  ;;  %p5886_p4 = pnand %p5885_p3, %p5879_p0 }
0x17b4   :  { %2798 = vrot.lane.b32.xlu0 %v6625_v59, %s5926_s15 }
0x17b5   :  { %v2577_v49 = vpop.f32.mrf.mxu1 }
0x17b6   :  { %v2578_v4 = vadd.f32 %v2577_v49, %v2535_v15 }
0x17b7   :  { %v5411_v5 = vpop.f32.mrf.mxu1 }
0x17b8   :  { %v6631_v6 = vpack.c.bf16 %v2578_v4, %v2575_v3  ;;  %2906 = vrot.lane.b32.xlu0 %v6625_v59, %s5927_s16  ;;  %v4915_v3 = vld [vmem:[%s7186_s3 + $0x1f0] ss:$0 sm:$0xff] }
0x17b9   :  { %v5779_v7 = vpop.eup %5778 }
0x17ba   :  { %v2320_v8 = vmul.f32 1.0614054, %v5779_v7  ;;  %2692 = vrot.lane.b32.xlu1 %v6631_v6, %s5925_s14  ;;  %v2588_v43 = vsel %vm178_vm3, %v6631_v6, 0 }
0x17bc   :  { %v4910_v16 = vadd.f32 -1.4531521, %v2320_v8 }
0x17bd   :  { %v5781_v17 = vpop.eup %5780 }
0x17be   :  { %v2324_v18 = vmul.f32 %v5779_v7, %v4910_v16  ;;  %v2321_v21 = vmul.f32 1.0614054, %v5781_v17  ;;  %2800 = vrot.lane.b32.xlu1 %v6631_v6, %s5926_s15  ;;  %v5783_v36 = vpop.eup %5782 }
0x17bf   :  { %v5785_v40 = vpop.eup %5784 }
0x17c0   :  { %v2326_v24 = vadd.f32 1.4214138, %v2324_v18  ;;  %v4911_v46 = vadd.f32 -1.4531521, %v2321_v21 }
0x17c2   :  { %v2328_v25 = vmul.f32 %v5779_v7, %v2326_v24  ;;  %v2325_v26 = vmul.f32 %v5781_v17, %v4911_v46  ;;  %2908 = vrot.lane.b32.xlu1 %v6631_v6, %s5927_s16 }
0x17c4   :  { %v4912_v27 = vadd.f32 -0.28449672, %v2328_v25  ;;  %v2327_v12 = vadd.f32 1.4214138, %v2325_v26 }
0x17c6   :  { %v2332_v28 = vmul.f32 %v5779_v7, %v4912_v27  ;;  %v2329_v29 = vmul.f32 %v5781_v17, %v2327_v12 }
0x17c8   :  { %v2334_v30 = vadd.f32 0.2548296, %v2332_v28  ;;  %v4913_v33 = vadd.f32 -0.28449672, %v2329_v29 }
0x17ca   :  { %v2336_v34 = vmul.f32 %v5779_v7, %v2334_v30  ;;  %v2333_v35 = vmul.f32 %v5781_v17, %v4913_v33 }
0x17cc   :  { %v2346_v63 = vmul.f32 %v5783_v36, %v2336_v34  ;;  %v2335_v37 = vadd.f32 0.2548296, %v2333_v35 }
0x17ce   :  { %v2348_v38 = vsub.f32 1.0, %v2346_v63  ;;  %v2337_v39 = vmul.f32 %v5781_v17, %v2335_v37 }
0x17d0   :  { %v2352_v42 = vsub.f32 0.0, %v2348_v38  ;;  %v2347_v31 = vmul.f32 %v5785_v40, %v2337_v39 }
0x17d2   :  { %v2354_v44 = vsel %vm2350_vm13, %v2352_v42, %v2348_v38  ;;  %v2349_v32 = vsub.f32 1.0, %v2347_v31 }
0x17d3   :  { %v2356_v51 = vadd.f32 1.0, %v2354_v44 }
0x17d4   :  { %v2353_v47 = vsub.f32 0.0, %v2349_v32 }
0x17d5   :  { %v2358_v56 = vmul.f32 %v2356_v51, %v2306_v53 }
0x17d6   :  { %v2355_v52 = vsel %vm2351_vm14, %v2353_v47, %v2349_v32 }
0x17d7   :  { %v2357_v55 = vadd.f32 1.0, %v2355_v52 }
0x17d9   :  { %v2359_v0 = vmul.f32 %v2357_v55, %v2307_v54 }
0x17db   :  { %v2368_v57 = vpack.c.bf16 %v2359_v0, %v2358_v56 }
0x17dd   :  { %5393 = vmatmul.mubr.msk.bf16.vlgmr.msra.gmra.mxu0 %vm1394_vm12, %v2368_v57 }
0x17de   :  { %5413 = vmatpush3.bf16.xpose.msra.mxu0 %v2588_v43  ;;  %5414 = vmatprep.mubr.msk.bf16.mxu0 %vm5924_vm1, %v5923_v13 }
0x17df   :  { %5424 = vmatprep.subr.bf16.mxu0 %v5923_v13 }
0x17e5   :  { %5415 = vmatmul.mubr.msk.bf16.vlgmr.msra.gmra.mxu0 %vm178_vm3, %v6625_v59 }
0x17e6   :  { %2436 = vadd.xlane.f32.xlu1 %v2435_v45  ;;  %5426 = vmatprep.mubr.msk.bf16.mxu0 %vm5924_vm1, %v5923_v13 }
0x1822   :  { %v2691_v60 = vpop.permute.xlu0 %2690 }
0x1826   :  { %v2799_v15 = vpop.permute.xlu0 %2798 }
0x182a   :  { %v2907_v49 = vpop.permute.xlu0 %2906 }
0x182c   :  { %v2693_v48 = vpop.permute.xlu1 %2692 }
0x182d   :  { %v2698_v58 = vsel %vm178_vm3, %v2693_v48, 0 }
0x182e   :  { %5425 = vmatpush3.bf16.xpose.msra.mxu0 %v2698_v58 }
0x182f   :  { %5436 = vmatprep.subr.bf16.mxu0 %v5923_v13 }
0x1830   :  { %v2801_v50 = vpop.permute.xlu1 %2800 }
0x1831   :  { %v2806_v61 = vsel %vm178_vm3, %v2801_v50, 0 }
0x1834   :  { %v2909_v59 = vpop.permute.xlu1 %2908 }
0x1835   :  { %5427 = vmatmul.mubr.msk.bf16.vlgmr.msra.gmra.mxu0 %vm178_vm3, %v2691_v60  ;;  %v2914_v62 = vsel %vm178_vm3, %v2909_v59, 0 }
0x1836   :  { %5437 = vmatpush3.bf16.xpose.msra.mxu0 %v2806_v61  ;;  %5438 = vmatprep.mubr.msk.bf16.mxu0 %vm5924_vm1, %v5923_v13 }
0x1837   :  { %5448 = vmatprep.subr.bf16.mxu0 %v5923_v13 }
0x183d   :  { %5439 = vmatmul.mubr.msk.bf16.vlgmr.msra.gmra.mxu0 %vm178_vm3, %v2799_v15 }
0x183e   :  { %5449 = vmatpush3.bf16.xpose.msra.mxu0 %v2914_v62  ;;  %5450 = vmatprep.mubr.msk.bf16.mxu0 %vm5924_vm1, %v5923_v13 }
0x183f   :  { %5460 = vmatprep.subr.bf16.mxu0 %v5923_v13 }
0x1845   :  { %5451 = vmatmul.mubr.msk.bf16.vlgmr.msra.gmra.mxu0 %vm178_vm3, %v2907_v49 }
0x1846   :  { %5464 = vmatprep.mubr.msk.bf16.mxu0 %vm5924_vm1, %v5923_v13 }
0x186f   :  { %v2437_v1 = vpop.xlane.xlu1 %2436 }
0x1870   :  { %vm2438_vm15 = vcmp.ge.f32.partialorder %v2437_v1, 15.5 }
0x1871   :  { %vm2440_vm5 = vmxor %vm2438_vm15, %vm5928_vm6 }
0x1872   :  { %vm2443_vm7 = vmand %vm2439_vm4, %vm2440_vm5 }
0x1873   :  { %v6682_v14 = vsel %vm2443_vm7, -1e+30, %v5923_v13 }
0x189d   :  { %v2410_v2 = vpop.f32.mrf.mxu0 }
0x189e   :  { %v2417_v4 = vadd.f32 %v2410_v2, %v6493_v9 }
0x189f   :  { %v5394_v5 = vpop.f32.mrf.mxu0 }
0x18a0   :  { %v2424_v7 = vadd.f32 %v4915_v3, %v2417_v4 }
0x18a1   :  { %v2413_v8 = vpop.f32.mrf.mxu0 }
0x18a2   :  { %2426 = vst.msk [vmem:[#allocation4] sm:$0xff] %vm38_vm0, %v2424_v7  ;;  %v2418_v10 = vadd.f32 %v2413_v8, %v6505_v19 }
0x18a3   :  { %v5395_v16 = vpop.f32.mrf.mxu0 }
0x18a4   :  { %v2425_v17 = vadd.f32 %v4915_v3, %v2418_v10 }
0x18a5   :  { %v2624_v18 = vpop.f32.mrf.mxu0 }
0x18a6   :  { %2427 = vst.msk [vmem:[#allocation4 + $0x8] sm:$0xff] %vm38_vm0, %v2425_v17  ;;  %v2625_v21 = vadd.f32 %v2624_v18, %v6682_v14 }
0x18a7   :  { %v5416_v23 = vpop.f32.mrf.mxu0 }
0x18a8   :  { %v2630_v9 = vsel %vm26_vm2, %v2625_v21, -inf }
0x18a9   :  { %2631 = vmax.xlane.f32.xlu0 %v2630_v9  ;;  %v2627_v24 = vpop.f32.mrf.mxu0 }
0x18ab   :  { %v5417_v46 = vpop.f32.mrf.mxu0 }
0x18f5   :  { %v2734_v25 = vpop.f32.mrf.mxu0 }
0x18f6   :  { %v2735_v26 = vadd.f32 %v2734_v25, %v6682_v14 }
0x18f7   :  { %v5428_v19 = vpop.f32.mrf.mxu0 }
0x18f8   :  { %v2740_v27 = vsel %vm26_vm2, %v2735_v26, -inf }
0x18f9   :  { %2741 = vmax.xlane.f32.xlu0 %v2740_v27  ;;  %v2737_v12 = vpop.f32.mrf.mxu0  ;;  %v3031_v27 = vld [vmem:[%s7186_s3 + $0x40] sm:$0xff] }
0x18fa   :  { %v3032_v12 = vld [vmem:[%s7186_s3 + $0x48] sm:$0xff] }
0x18fb   :  { %v5429_v28 = vpop.f32.mrf.mxu0 }
0x18fc   :  { %v3035_v28 = vpack.c.bf16 %v3032_v12, %v3031_v27 }
0x18fd   :  { %v2842_v29 = vpop.f32.mrf.mxu0 }
0x18fe   :  { %v2843_v30 = vadd.f32 %v2842_v29, %v6682_v14  ;;  %5461 = vmatpush3.bf16.msra.mxu0 %v3035_v28 }
0x18ff   :  { %v5440_v33 = vpop.f32.mrf.mxu0  ;;  %5462 = vmatprep.subr.bf16.mxu0 %v5923_v13 }
0x1900   :  { %v2848_v34 = vsel %vm26_vm2, %v2843_v30, -inf  ;;  %v3029_v33 = vld [vmem:[%s7186_s3 + $0x30] sm:$0xff] }
0x1901   :  { %2849 = vmax.xlane.f32.xlu1 %v2848_v34  ;;  %v2845_v35 = vpop.f32.mrf.mxu0  ;;  %v3030_v34 = vld [vmem:[%s7186_s3 + $0x38] sm:$0xff] }
0x1902   :  { %v3034_v35 = vpack.c.bf16 %v3030_v34, %v3029_v33 }
0x1903   :  { %v5441_v36 = vpop.f32.mrf.mxu0 }
0x1904   :  { %5463 = vmatpush3.bf16.msra.mxu0 %v3034_v35 }
0x1905   :  { %v2950_v63 = vpop.f32.mrf.mxu0  ;;  %5476 = vmatprep.subr.bf16.mxu0 %v5923_v13 }
0x1906   :  { %v2951_v37 = vadd.f32 %v2950_v63, %v6682_v14 }
0x1907   :  { %v5452_v38 = vpop.f32.mrf.mxu0 }
0x1908   :  { %v2956_v39 = vsel %vm26_vm2, %v2951_v37, -inf }
0x1909   :  { %2957 = vmax.xlane.f32.xlu0 %v2956_v39  ;;  %v2953_v40 = vpop.f32.mrf.mxu0 }
0x190b   :  { %v5453_v42 = vpop.f32.mrf.mxu0 }
0x1932   :  { %v2632_v31 = vpop.xlane.xlu0 %2631 }
0x1933   :  { %v2633_v44 = vsub.f32 %v2625_v21, %v2632_v31 }
0x1935   :  { %v2634_v32 = vmul.f32 1.442695, %v2633_v44 }
0x1937   :  { %5786 = vpow2.f32 %v2634_v32 }
0x1944   :  { %v5787_v47 = vpop.eup %5786 }
0x1945   :  { %v2636_v51 = vsel %vm26_vm2, %v5787_v47, 0.0 }
0x1946   :  { %2637 = vadd.xlane.f32.xlu1 %v2636_v51 }
0x1957   :  { %2643 = vrot.lane.b32.xlu1 %v6631_v6, %s5922_s28 }
0x1982   :  { %v2742_v52 = vpop.xlane.xlu0 %2741 }
0x1983   :  { %v2743_v53 = vsub.f32 %v2735_v26, %v2742_v52 }
0x1985   :  { %v2744_v54 = vmul.f32 1.442695, %v2743_v53 }
0x1987   :  { %5788 = vpow2.f32 %v2744_v54 }
0x198a   :  { %v2850_v55 = vpop.xlane.xlu1 %2849 }
0x198b   :  { %v2851_v56 = vsub.f32 %v2843_v30, %v2850_v55 }
0x198d   :  { %v2852_v0 = vmul.f32 1.442695, %v2851_v56 }
0x198f   :  { %5790 = vpow2.f32 %v2852_v0  ;;  %v4931_v0 = vld [vmem:[%s7186_s3 + $0x50] ss:$0 sm:$0xff] }
0x1992   :  { %v2958_v57 = vpop.xlane.xlu0 %2957 }
0x1993   :  { %v2959_v43 = vsub.f32 %v2951_v37, %v2958_v57 }
0x1994   :  { %v5789_v41 = vpop.eup %5788 }
0x1995   :  { %v2960_v45 = vmul.f32 1.442695, %v2959_v43  ;;  %v2746_v48 = vsel %vm26_vm2, %v5789_v41, 0.0 }
0x1996   :  { %2747 = vadd.xlane.f32.xlu0 %v2746_v48 }
0x1997   :  { %5792 = vpow2.f32 %v2960_v45 }
0x199c   :  { %v5791_v58 = vpop.eup %5790 }
0x199d   :  { %v2854_v50 = vsel %vm26_vm2, %v5791_v58, 0.0 }
0x199e   :  { %2855 = vadd.xlane.f32.xlu1 %v2854_v50 }
0x19a4   :  { %v5793_v60 = vpop.eup %5792 }
0x19a5   :  { %v2962_v61 = vsel %vm26_vm2, %v5793_v60, 0.0 }
0x19a6   :  { %2963 = vadd.xlane.f32.xlu0 %v2962_v61 }
0x19af   :  { %2860 = vrot.lane.b32.xlu1 %v6631_v6, %s5931_s19 }
0x19b3   :  { %2968 = vrot.lane.b32.xlu1 %v6631_v6, %s5930_s18 }
0x19bc   :  { %2752 = vrot.lane.b32.xlu0 %v6631_v6, %s5929_s17 }
0x19cf   :  { %v2638_v59 = vpop.xlane.xlu1 %2637 }
0x19d0   :  { %5794 = vrcp.f32 %v2638_v59 }
0x19d3   :  { %v2644_v15 = vpop.permute.xlu1 %2643 }
0x19d4   :  { %5419 = vmatpush3.bf16.msra.mxu1 %v2644_v15 }
0x19d5   :  { %5430 = vmatprep.subr.bf16.mxu1 %v5923_v13 }
0x19dd   :  { %v5795_v62 = vpop.eup %5794 }
0x19de   :  { %v2640_v49 = vmul.f32 %v5795_v62, %v5787_v47 }
0x19e0   :  { %v2641_v1 = vpack.c.bf16 %v2640_v49, %v2640_v49  ;;  %v3111_v49 = vld [vmem:[%s7186_s3 + $0x70] sm:$0xff] }
0x19e2   :  { %5421 = vmatmul.mubr.msk.bf16.vlgmr.msra.gmra.mxu1 %vm26_vm2, %v2641_v1 }
0x19e3   :  { %5432 = vmatprep.mubr.msk.bf16.mxu1 %vm5924_vm1, %v5923_v13 }
0x1a1f   :  { %v2748_v2 = vpop.xlane.xlu0 %2747 }
0x1a20   :  { %5796 = vrcp.f32 %v2748_v2  ;;  %v3109_v2 = vld [vmem:[%s7186_s3 + $0x60] sm:$0xff] }
0x1a27   :  { %v2856_v3 = vpop.xlane.xlu1 %2855 }
0x1a28   :  { %5798 = vrcp.f32 %v2856_v3  ;;  %v3110_v3 = vld [vmem:[%s7186_s3 + $0x68] sm:$0xff] }
0x1a2b   :  { %v2861_v16 = vpop.permute.xlu1 %2860 }
0x1a2d   :  { %v5797_v4 = vpop.eup %5796 }
0x1a2e   :  { %v2750_v5 = vmul.f32 %v5797_v4, %v5789_v41  ;;  %v3114_v4 = vpack.c.bf16 %v3110_v3, %v3109_v2 }
0x1a2f   :  { %v2964_v6 = vpop.xlane.xlu0 %2963  ;;  %v2969_v23 = vpop.permute.xlu1 %2968 }
0x1a30   :  { %5800 = vrcp.f32 %v2964_v6  ;;  %v2751_v8 = vpack.c.bf16 %v2750_v5, %v2750_v5 }
0x1a33   :  { %v2753_v7 = vpop.permute.xlu0 %2752 }
0x1a34   :  { %5431 = vmatpush3.bf16.msra.mxu1 %v2753_v7 }
0x1a35   :  { %5442 = vmatprep.subr.bf16.mxu1 %v5923_v13  ;;  %v5799_v10 = vpop.eup %5798 }
0x1a36   :  { %v2858_v17 = vmul.f32 %v5799_v10, %v5791_v58 }
0x1a37   :  { %5433 = vmatmul.mubr.msk.bf16.vlgmr.msra.gmra.mxu1 %vm26_vm2, %v2751_v8  ;;  %v3085_v8 = vld [vmem:[%s7186_s3 + $0x58] sm:$0x3] }
0x1a38   :  { %5443 = vmatpush3.bf16.msra.mxu1 %v2861_v16  ;;  %5444 = vmatprep.mubr.msk.bf16.mxu1 %vm5924_vm1, %v5923_v13  ;;  %v2859_v18 = vpack.c.bf16 %v2858_v17, %v2858_v17  ;;  %v3102_v10 = vrot.slane %v3085_v8, %v6007_v20 }
0x1a39   :  { %5454 = vmatprep.subr.bf16.mxu1 %v5923_v13 }
0x1a3d   :  { %v5801_v21 = vpop.eup %5800 }
0x1a3e   :  { %v2966_v9 = vmul.f32 %v5801_v21, %v5793_v60 }
0x1a3f   :  { %5445 = vmatmul.mubr.msk.bf16.vlgmr.msra.gmra.mxu1 %vm26_vm2, %v2859_v18  ;;  %v3107_v18 = vrot.slane %v3085_v8, %v6012_v22 }
0x1a40   :  { %5455 = vmatpush3.bf16.msra.mxu1 %v2969_v23  ;;  %5456 = vmatprep.mubr.msk.bf16.mxu1 %vm5924_vm1, %v5923_v13  ;;  %v2967_v24 = vpack.c.bf16 %v2966_v9, %v2966_v9 }
0x1a41   :  { %5468 = vmatprep.subr.bf16.mxu1 %v5923_v13 }
0x1a47   :  { %5457 = vmatmul.mubr.msk.bf16.vlgmr.msra.gmra.mxu1 %vm26_vm2, %v2967_v24  ;;  %v4933_v24 = vld [vmem:[%s7186_s3 + $0x80] ss:$0 sm:$0xff] }
0x1a48   :  { %5472 = vmatprep.mubr.msk.bf16.mxu1 %vm5924_vm1, %v5923_v13 }
0x1aa2   :  { %v2683_v46 = vpop.f32.mrf.mxu1 }
0x1aa4   :  { %v5422_v25 = vpop.f32.mrf.mxu1 }
0x1aa6   :  { %v2686_v26 = vpop.f32.mrf.mxu1 }
0x1aa8   :  { %v5423_v19 = vpop.f32.mrf.mxu1 }
0x1af7   :  { %v2792_v29 = vpop.f32.mrf.mxu1 }
0x1af8   :  { %3015 = vrot.lane.b32.xlu0 %v2792_v29, %s5932_s20 }
0x1af9   :  { %v5434_v30 = vpop.f32.mrf.mxu1 }
0x1afb   :  { %v2795_v36 = vpop.f32.mrf.mxu1 }
0x1afd   :  { %v5435_v63 = vpop.f32.mrf.mxu1 }
0x1aff   :  { %v2900_v37 = vpop.f32.mrf.mxu1 }
0x1b00   :  { %3019 = vrot.lane.b32.xlu1 %v2900_v37, %s5933_s30 }
0x1b01   :  { %v5446_v38 = vpop.f32.mrf.mxu1 }
0x1b03   :  { %v2903_v39 = vpop.f32.mrf.mxu1 }
0x1b05   :  { %v5447_v40 = vpop.f32.mrf.mxu1 }
0x1b07   :  { %v3008_v42 = vpop.f32.mrf.mxu1 }
0x1b08   :  { %3023 = vrot.lane.b32.xlu0 %v3008_v42, %s5934_s6 }
0x1b09   :  { %v5458_v31 = vpop.f32.mrf.mxu1 }
0x1b0b   :  { %v3011_v44 = vpop.f32.mrf.mxu1 }
0x1b0d   :  { %v5459_v32 = vpop.f32.mrf.mxu1 }
0x1b6a   :  { %v3016_v47 = vpop.permute.xlu0 %3015 }
0x1b6b   :  { %v3026_v52 = vsel %vm178_vm3, %v2683_v46, %v3016_v47 }
0x1b72   :  { %v3020_v51 = vpop.permute.xlu1 %3019 }
0x1b73   :  { %v3027_v53 = vsel %vm26_vm2, %v3026_v52, %v3020_v51 }
0x1b7a   :  { %v3024_v54 = vpop.permute.xlu0 %3023 }
0x1b7b   :  { %v3028_v55 = vsel %vm623_vm9, %v3027_v53, %v3024_v54 }
0x1b7c   :  { %v3033_v56 = vpack.c.bf16 %v3028_v55, %v3028_v55 }
0x1b7e   :  { %5465 = vmatmul.mubr.msk.bf16.vlgmr.msra.gmra.mxu0 %vm38_vm0, %v3033_v56 }
0x1b7f   :  { %5478 = vmatprep.mubr.msk.bf16.mxu0 %vm5924_vm1, %v5923_v13 }
0x1c3e   :  { %v3078_v57 = vpop.f32.mrf.mxu0 }
0x1c3f   :  { %v3079_v43 = vadd.f32 %v4931_v0, %v3078_v57 }
0x1c40   :  { %v5466_v41 = vpop.f32.mrf.mxu0 }
0x1c41   :  { %v6748_v45 = vadd.f32 %v6498_v11, %v3079_v43  ;;  %v3112_v11 = vld [vmem:[%s7186_s3 + $0x78] sm:$0xff] }
0x1c42   :  { %v3081_v48 = vpop.f32.mrf.mxu0  ;;  %v3115_v1 = vpack.c.bf16 %v3112_v11, %v3111_v49 }
0x1c43   :  { %v3086_v58 = vsel %vm38_vm0, %v6748_v45, 0.0 }
0x1c44   :  { %3087 = vadd.xlane.f32.xlu1 %v3086_v58  ;;  %v5467_v50 = vpop.f32.mrf.mxu0  ;;  %5469 = vmatpush3.bf16.msra.mxu1 %v3115_v1 }
0x1c45   :  { %5470 = vmatprep.subr.bf16.mxu1 %v5923_v13 }
0x1c48   :  { %5471 = vmatpush3.bf16.msra.mxu1 %v3114_v4 }
0x1c49   :  { %5482 = vmatprep.subr.bf16.mxu1 %v5923_v13 }
0x1ccd   :  { %v3088_v60 = vpop.xlane.xlu1 %3087 }
0x1cce   :  { %v3089_v61 = vmul.f32 0.03125, %v3088_v60 }
0x1cd0   :  { %v3090_v59 = vsub.f32 %v6748_v45, %v3089_v61 }
0x1cd2   :  { %v3091_v15 = vmul.f32 %v3090_v59, %v3090_v59 }
0x1cd4   :  { %v3092_v62 = vsel %vm38_vm0, %v3091_v15, 0.0 }
0x1cd5   :  { %3093 = vadd.xlane.f32.xlu0 %v3092_v62 }
0x1d5e   :  { %v3094_v6 = vpop.xlane.xlu0 %3093 }
0x1d5f   :  { %v3095_v5 = vmul.f32 0.03125, %v3094_v6 }
0x1d61   :  { %v3096_v7 = vadd.f32 1e-05, %v3095_v5 }
0x1d63   :  { %5802 = vrsqrt.f32 %v3096_v7 }
0x1d70   :  { %v5803_v16 = vpop.eup %5802 }
0x1d71   :  { %v3098_v17 = vmul.f32 %v5803_v16, %v3090_v59 }
0x1d73   :  { %v3103_v21 = vmul.f32 %v3102_v10, %v3098_v17 }
0x1d75   :  { %v3108_v23 = vadd.f32 %v3107_v18, %v3103_v21 }
0x1d77   :  { %v3113_v9 = vpack.c.bf16 %v3108_v23, %v3108_v23 }
0x1d79   :  { %5473 = vmatmul.mubr.msk.bf16.vlgmr.msra.gmra.mxu1 %vm38_vm0, %v3113_v9 }
0x1d7a   :  { %5484 = vmatprep.mubr.msk.bf16.mxu1 %vm5924_vm1, %v5923_v13 }
0x1e39   :  { %v3158_v46 = vpop.f32.mrf.mxu1 }
0x1e3a   :  { %v3159_v25 = vadd.f32 %v4933_v24, %v3158_v46 }
0x1e3b   :  { %v5474_v26 = vpop.f32.mrf.mxu1 }
0x1e3c   :  { %v3164_v19 = vmul.f32 0.35355338, %v3159_v25  ;;  %v6779_v27 = vpack.c.bf16 %v3159_v25, %v3159_v25 }
0x1e3d   :  { %v3161_v12 = vpop.f32.mrf.mxu1 }
0x1e3e   :  { %3279 = vrot.lane.b32.xlu1 %v6779_v27, %s5929_s17  ;;  %3168 = vrot.lane.b32.xlu0 %v6779_v27, %s5922_s28  ;;  %v3165_v29 = vpack.c.bf16 %v3164_v19, %v3164_v19 }
0x1e3f   :  { %v5475_v28 = vpop.f32.mrf.mxu1 }
0x1e42   :  { %3389 = vrot.lane.b32.xlu0 %v6779_v27, %s5931_s19  ;;  %3277 = vrot.lane.b32.xlu1 %v3165_v29, %s5925_s14 }
0x1e46   :  { %3499 = vrot.lane.b32.xlu0 %v6779_v27, %s5930_s18  ;;  %3387 = vrot.lane.b32.xlu1 %v3165_v29, %s5926_s15 }
0x1e4a   :  { %3497 = vrot.lane.b32.xlu1 %v3165_v29, %s5927_s16 }
0x1eb0   :  { %v3169_v30 = vpop.permute.xlu0 %3168  ;;  %v3280_v34 = vpop.permute.xlu1 %3279 }
0x1eb1   :  { %v3174_v33 = vsel %vm178_vm3, %v3169_v30, 0  ;;  %v3285_v35 = vsel %vm178_vm3, %v3280_v34, 0 }
0x1eb2   :  { %5477 = vmatpush3.bf16.xpose.msra.mxu0 %v3174_v33 }
0x1eb3   :  { %5488 = vmatprep.subr.bf16.mxu0 %v5923_v13 }
0x1eb4   :  { %v3390_v36 = vpop.permute.xlu0 %3389  ;;  %v3278_v63 = vpop.permute.xlu1 %3277 }
0x1eb5   :  { %v3395_v37 = vsel %vm178_vm3, %v3390_v36, 0 }
0x1eb8   :  { %v3500_v38 = vpop.permute.xlu0 %3499  ;;  %v3388_v39 = vpop.permute.xlu1 %3387 }
0x1eb9   :  { %5479 = vmatmul.mubr.msk.bf16.vlgmr.msra.gmra.mxu0 %vm178_vm3, %v3165_v29  ;;  %v3505_v40 = vsel %vm178_vm3, %v3500_v38, 0 }
0x1eba   :  { %5489 = vmatpush3.bf16.xpose.msra.mxu0 %v3285_v35  ;;  %5490 = vmatprep.mubr.msk.bf16.mxu0 %vm5924_vm1, %v5923_v13 }
0x1ebb   :  { %5500 = vmatprep.subr.bf16.mxu0 %v5923_v13 }
0x1ebc   :  { %v3498_v42 = vpop.permute.xlu1 %3497 }
0x1ec1   :  { %5491 = vmatmul.mubr.msk.bf16.vlgmr.msra.gmra.mxu0 %vm178_vm3, %v3278_v63 }
0x1ec2   :  { %5501 = vmatpush3.bf16.xpose.msra.mxu0 %v3395_v37  ;;  %5502 = vmatprep.mubr.msk.bf16.mxu0 %vm5924_vm1, %v5923_v13 }
0x1ec3   :  { %5512 = vmatprep.subr.bf16.mxu0 %v5923_v13 }
0x1ec9   :  { %5503 = vmatmul.mubr.msk.bf16.vlgmr.msra.gmra.mxu0 %vm178_vm3, %v3388_v39 }
0x1eca   :  { %5513 = vmatpush3.bf16.xpose.msra.mxu0 %v3505_v40  ;;  %5514 = vmatprep.mubr.msk.bf16.mxu0 %vm5924_vm1, %v5923_v13 }
0x1ecb   :  { %5524 = vmatprep.subr.bf16.mxu0 %v5923_v13 }
0x1ed1   :  { %5515 = vmatmul.mubr.msk.bf16.vlgmr.msra.gmra.mxu0 %vm178_vm3, %v3498_v42 }
0x1ed2   :  { %5528 = vmatprep.mubr.msk.bf16.mxu0 %vm5924_vm1, %v5923_v13 }
0x1f79   :  { %v3210_v31 = vpop.f32.mrf.mxu0 }
0x1f7a   :  { %v3216_v44 = vsel %vm178_vm3, %v3210_v31, -inf }
0x1f7b   :  { %3217 = vmax.xlane.f32.xlu0 %v3216_v44  ;;  %v5480_v32 = vpop.f32.mrf.mxu0 }
0x1f7d   :  { %v3213_v47 = vpop.f32.mrf.mxu0 }
0x1f7f   :  { %v5481_v51 = vpop.f32.mrf.mxu0 }
0x1f81   :  { %v3321_v52 = vpop.f32.mrf.mxu0 }
0x1f82   :  { %v3327_v53 = vsel %vm178_vm3, %v3321_v52, -inf }
0x1f83   :  { %3328 = vmax.xlane.f32.xlu1 %v3327_v53  ;;  %v5492_v54 = vpop.f32.mrf.mxu0 }
0x1f85   :  { %v3324_v55 = vpop.f32.mrf.mxu0 }
0x1f87   :  { %v5493_v56 = vpop.f32.mrf.mxu0 }
0x1f89   :  { %v3431_v0 = vpop.f32.mrf.mxu0 }
0x1f8a   :  { %v3437_v57 = vsel %vm178_vm3, %v3431_v0, -inf }
0x1f8b   :  { %3438 = vmax.xlane.f32.xlu0 %v3437_v57  ;;  %v5504_v43 = vpop.f32.mrf.mxu0 }
0x1f8d   :  { %v3434_v41 = vpop.f32.mrf.mxu0 }
0x1f8e   :  { %v3624_v41 = vld [vmem:[%s7186_s3 + $0x98] sm:$0xff] }
0x1f8f   :  { %v5505_v48 = vpop.f32.mrf.mxu0 }
0x1f90   :  { %v3625_v48 = vld [vmem:[%s7186_s3 + $0xa0] sm:$0xff] }
0x1f91   :  { %v3541_v58 = vpop.f32.mrf.mxu0 }
0x1f92   :  { %v3547_v50 = vsel %vm178_vm3, %v3541_v58, -inf }
0x1f93   :  { %3548 = vmax.xlane.f32.xlu0 %v3547_v50  ;;  %v5516_v60 = vpop.f32.mrf.mxu0  ;;  %v3622_v50 = vld [vmem:[%s7186_s3 + $0x88] sm:$0xff] }
0x1f94   :  { %v3623_v60 = vld [vmem:[%s7186_s3 + $0x90] sm:$0xff] }
0x1f95   :  { %v3544_v61 = vpop.f32.mrf.mxu0 }
0x1f96   :  { %v3627_v61 = vpack.c.bf16 %v3623_v60, %v3622_v50 }
0x1f97   :  { %v5517_v59 = vpop.f32.mrf.mxu0 }
0x2004   :  { %v3218_v15 = vpop.xlane.xlu0 %3217 }
0x2005   :  { %v3219_v62 = vsub.f32 %v3210_v31, %v3218_v15 }
0x2007   :  { %v3220_v49 = vmul.f32 1.442695, %v3219_v62 }
0x2009   :  { %5804 = vpow2.f32 %v3220_v49 }
0x200c   :  { %v3329_v11 = vpop.xlane.xlu1 %3328 }
0x200d   :  { %v3330_v1 = vsub.f32 %v3321_v52, %v3329_v11 }
0x200f   :  { %v3331_v2 = vmul.f32 1.442695, %v3330_v1 }
0x2011   :  { %5806 = vpow2.f32 %v3331_v2 }
0x2014   :  { %v3439_v6 = vpop.xlane.xlu0 %3438 }
0x2015   :  { %v3440_v21 = vsub.f32 %v3431_v0, %v3439_v6 }
0x2016   :  { %v5805_v3 = vpop.eup %5804 }
0x2017   :  { %v3222_v4 = vsel %vm178_vm3, %v5805_v3, 0.0  ;;  %v3441_v23 = vmul.f32 1.442695, %v3440_v21 }
0x2018   :  { %3223 = vadd.xlane.f32.xlu1 %v3222_v4 }
0x201c   :  { %v3549_v5 = vpop.xlane.xlu0 %3548 }
0x201d   :  { %v3550_v7 = vsub.f32 %v3541_v58, %v3549_v5  ;;  %v3628_v58 = vpack.c.bf16 %v3625_v48, %v3624_v41 }
0x201e   :  { %v5807_v8 = vpop.eup %5806 }
0x201f   :  { %v3551_v10 = vmul.f32 1.442695, %v3550_v7  ;;  %v3333_v16 = vsel %vm178_vm3, %v5807_v8, 0.0  ;;  %5525 = vmatpush3.bf16.msra.mxu0 %v3628_v58 }
0x2020   :  { %3334 = vadd.xlane.f32.xlu0 %v3333_v16  ;;  %5526 = vmatprep.subr.bf16.mxu0 %v5923_v13 }
0x2021   :  { %5808 = vpow2.f32 %v3551_v10 }
0x2022   :  { %5810 = vpow2.f32 %v3441_v23 }
0x2023   :  { %5527 = vmatpush3.bf16.msra.mxu0 %v3627_v61  ;;  %v3790_v61 = vld [vmem:[%s7186_s3 + $0x110] sm:$0xff] }
0x2024   :  { %5540 = vmatprep.subr.bf16.mxu0 %v5923_v13 }
0x2029   :  { %3228 = vrot.lane.b32.xlu1 %v6779_v27, %s5936_s7 }
0x202e   :  { %v5809_v17 = vpop.eup %5808 }
0x202f   :  { %v3553_v18 = vsel %vm178_vm3, %v5809_v17, 0.0  ;;  %v5811_v9 = vpop.eup %5810 }
0x2030   :  { %3554 = vadd.xlane.f32.xlu0 %v3553_v18  ;;  %v3443_v24 = vsel %vm178_vm3, %v5811_v9, 0.0 }
0x2046   :  { %3339 = vrot.lane.b32.xlu0 %v6779_v27, %s5935_s29 }
0x204d   :  { %3444 = vadd.xlane.f32.xlu1 %v3443_v24 }
0x205e   :  { %3449 = vrot.lane.b32.xlu1 %v6779_v27, %s5938_s9 }
0x2062   :  { %3559 = vrot.lane.b32.xlu1 %v6779_v27, %s5937_s8 }
0x20a1   :  { %v3224_v46 = vpop.xlane.xlu1 %3223 }
0x20a2   :  { %5812 = vrcp.f32 %v3224_v46 }
0x20a5   :  { %v3229_v25 = vpop.permute.xlu1 %3228 }
0x20a6   :  { %v3234_v26 = vsel %vm829_vm10, %v3229_v25, 0 }
0x20a7   :  { %5483 = vmatpush3.bf16.msra.mxu1 %v3234_v26  ;;  %v6882_v26 = vld [vmem:[%s7184_s1 + $0x18] sm:$0xff] }
0x20a8   :  { %5494 = vmatprep.subr.bf16.mxu1 %v5923_v13 }
0x20a9   :  { %v3335_v19 = vpop.xlane.xlu0 %3334 }
0x20aa   :  { %5814 = vrcp.f32 %v3335_v19  ;;  %v3885_v19 = vsel %vm38_vm0, %v6882_v26, 0.0 }
0x20af   :  { %v5813_v12 = vpop.eup %5812 }
0x20b0   :  { %v3226_v28 = vmul.f32 %v5813_v12, %v5805_v3 }
0x20b2   :  { %v3227_v29 = vpack.c.bf16 %v3226_v28, %v3226_v28 }
0x20b4   :  { %5485 = vmatmul.mubr.msk.bf16.vlgmr.msra.gmra.mxu1 %vm178_vm3, %v3227_v29 }
0x20b5   :  { %5496 = vmatprep.mubr.msk.bf16.mxu1 %vm5924_vm1, %v5923_v13 }
0x20b7   :  { %v5815_v30 = vpop.eup %5814 }
0x20b8   :  { %v3337_v33 = vmul.f32 %v5815_v30, %v5807_v8 }
0x20b9   :  { %v3555_v27 = vpop.xlane.xlu0 %3554 }
0x20ba   :  { %v3338_v36 = vpack.c.bf16 %v3337_v33, %v3337_v33 }
0x20bd   :  { %v3340_v34 = vpop.permute.xlu0 %3339 }
0x20be   :  { %v3345_v35 = vsel %vm829_vm10, %v3340_v34, 0  ;;  %v3704_v34 = vld [vmem:[%s7186_s3 + $0xc8] sm:$0xff] }
0x20bf   :  { %5495 = vmatpush3.bf16.msra.mxu1 %v3345_v35  ;;  %v3705_v35 = vld [vmem:[%s7186_s3 + $0xd0] sm:$0xff] }
0x20c0   :  { %5506 = vmatprep.subr.bf16.mxu1 %v5923_v13 }
0x20c2   :  { %5497 = vmatmul.mubr.msk.bf16.vlgmr.msra.gmra.mxu1 %vm178_vm3, %v3338_v36  ;;  %v3708_v36 = vpack.c.bf16 %v3705_v35, %v3704_v34 }
0x20c3   :  { %5508 = vmatprep.mubr.msk.bf16.mxu1 %vm5924_vm1, %v5923_v13 }
0x20d6   :  { %v3445_v63 = vpop.xlane.xlu1 %3444 }
0x20d7   :  { %5816 = vrcp.f32 %v3445_v63  ;;  %v3702_v63 = vld [vmem:[%s7186_s3 + $0xb8] sm:$0xff] }
0x20d8   :  { %5818 = vrcp.f32 %v3555_v27  ;;  %v6891_v27 = vld [vmem:[%s7184_s1 + $0x10] sm:$0xff] }
0x20d9   :  { %v3882_v33 = vsel %vm38_vm0, %v6891_v27, 0.0 }
0x20da   :  { %v3450_v37 = vpop.permute.xlu1 %3449 }
0x20db   :  { %v3455_v38 = vsel %vm829_vm10, %v3450_v37, 0  ;;  %v3703_v37 = vld [vmem:[%s7186_s3 + $0xc0] sm:$0xff] }
0x20dc   :  { %5507 = vmatpush3.bf16.msra.mxu1 %v3455_v38  ;;  %v3707_v38 = vpack.c.bf16 %v3703_v37, %v3702_v63 }
0x20dd   :  { %5518 = vmatprep.subr.bf16.mxu1 %v5923_v13 }
0x20de   :  { %v3560_v42 = vpop.permute.xlu1 %3559 }
0x20df   :  { %v3565_v32 = vsel %vm829_vm10, %v3560_v42, 0 }
0x20e4   :  { %v5817_v39 = vpop.eup %5816 }
0x20e5   :  { %v3447_v40 = vmul.f32 %v5817_v39, %v5811_v9  ;;  %v5819_v44 = vpop.eup %5818 }
0x20e6   :  { %v3557_v47 = vmul.f32 %v5819_v44, %v5809_v17  ;;  %v4943_v17 = vld [vmem:[%s7186_s3 + $0xa8] ss:$0 sm:$0xff] }
0x20e7   :  { %v3448_v31 = vpack.c.bf16 %v3447_v40, %v3447_v40 }
0x20e8   :  { %v3558_v51 = vpack.c.bf16 %v3557_v47, %v3557_v47 }
0x20e9   :  { %5509 = vmatmul.mubr.msk.bf16.vlgmr.msra.gmra.mxu1 %vm178_vm3, %v3448_v31 }
0x20ea   :  { %5519 = vmatpush3.bf16.msra.mxu1 %v3565_v32  ;;  %5520 = vmatprep.mubr.msk.bf16.mxu1 %vm5924_vm1, %v5923_v13 }
0x20eb   :  { %5532 = vmatprep.subr.bf16.mxu1 %v5923_v13 }
0x20f1   :  { %5521 = vmatmul.mubr.msk.bf16.vlgmr.msra.gmra.mxu1 %vm178_vm3, %v3558_v51 }
0x20f2   :  { %5536 = vmatprep.mubr.msk.bf16.mxu1 %vm5924_vm1, %v5923_v13  ;;  %5533 = vmatpush3.bf16.msra.mxu1 %v3708_v36 }
0x20f3   :  { %5534 = vmatprep.subr.bf16.mxu1 %v5923_v13 }
0x20f6   :  { %5535 = vmatpush3.bf16.msra.mxu1 %v3707_v38 }
0x20f7   :  { %5552 = vmatprep.subr.bf16.mxu1 %v5923_v13 }
0x2174   :  { %v3270_v52 = vpop.f32.mrf.mxu1 }
0x2176   :  { %v5486_v53 = vpop.f32.mrf.mxu1 }
0x2178   :  { %v3273_v54 = vpop.f32.mrf.mxu1 }
0x217a   :  { %v5487_v55 = vpop.f32.mrf.mxu1 }
0x2182   :  { %v3381_v56 = vpop.f32.mrf.mxu1 }
0x2183   :  { %3608 = vrot.lane.b32.xlu0 %v3381_v56, %s5932_s20 }
0x2184   :  { %v5498_v0 = vpop.f32.mrf.mxu1 }
0x2185   :  { %v3678_v0 = vld [vmem:[%s7186_s3 + $0xb0] sm:$0x3] }
0x2186   :  { %v3384_v57 = vpop.f32.mrf.mxu1  ;;  %v3700_v48 = vrot.slane %v3678_v0, %v6012_v22 }
0x2187   :  { %v3695_v57 = vrot.slane %v3678_v0, %v6007_v20 }
0x2188   :  { %v5499_v43 = vpop.f32.mrf.mxu1 }
0x21a9   :  { %v3491_v59 = vpop.f32.mrf.mxu1 }
0x21aa   :  { %3612 = vrot.lane.b32.xlu1 %v3491_v59, %s5933_s30  ;;  %v3791_v59 = vld [vmem:[%s7186_s3 + $0x118] sm:$0xff] }
0x21ab   :  { %v5510_v15 = vpop.f32.mrf.mxu1 }
0x21ac   :  { %v3796_v15 = vpack.c.bf16 %v3791_v59, %v3790_v61 }
0x21ad   :  { %v3494_v62 = vpop.f32.mrf.mxu1 }
0x21ae   :  { %v3788_v62 = vld [vmem:[%s7186_s3 + $0x100] sm:$0xff] }
0x21af   :  { %v5511_v49 = vpop.f32.mrf.mxu1 }
0x21b0   :  { %v3789_v49 = vld [vmem:[%s7186_s3 + $0x108] sm:$0xff] }
0x21b1   :  { %v3601_v11 = vpop.f32.mrf.mxu1 }
0x21b2   :  { %3616 = vrot.lane.b32.xlu0 %v3601_v11, %s5934_s6  ;;  %v3795_v11 = vpack.c.bf16 %v3789_v49, %v3788_v62 }
0x21b3   :  { %v5522_v1 = vpop.f32.mrf.mxu1 }
0x21b4   :  { %v3786_v1 = vld [vmem:[%s7186_s3 + $0xf0] sm:$0xff] }
0x21b5   :  { %v3604_v2 = vpop.f32.mrf.mxu1 }
0x21b6   :  { %v3787_v2 = vld [vmem:[%s7186_s3 + $0xf8] sm:$0xff] }
0x21b7   :  { %v5523_v3 = vpop.f32.mrf.mxu1 }
0x21b8   :  { %v3794_v3 = vpack.c.bf16 %v3787_v2, %v3786_v1 }
0x21f5   :  { %v3609_v4 = vpop.permute.xlu0 %3608 }
0x21f6   :  { %v3619_v5 = vsel %vm178_vm3, %v3270_v52, %v3609_v4 }
0x221c   :  { %v3613_v6 = vpop.permute.xlu1 %3612 }
0x221d   :  { %v3620_v7 = vsel %vm26_vm2, %v3619_v5, %v3613_v6  ;;  %v3784_v5 = vld [vmem:[%s7186_s3 + $0xe0] sm:$0xff] }
0x2224   :  { %v3617_v8 = vpop.permute.xlu0 %3616 }
0x2225   :  { %v3621_v10 = vsel %vm623_vm9, %v3620_v7, %v3617_v8  ;;  %v3785_v7 = vld [vmem:[%s7186_s3 + $0xe8] sm:$0xff] }
0x2226   :  { %v3626_v16 = vpack.c.bf16 %v3621_v10, %v3621_v10  ;;  %v3793_v8 = vpack.c.bf16 %v3785_v7, %v3784_v5 }
0x2228   :  { %5529 = vmatmul.mubr.msk.bf16.vlgmr.msra.gmra.mxu0 %vm38_vm0, %v3626_v16  ;;  %v3922_v16 = vld [vmem:[%s7186_s3 + $0x140] sm:$0xff] }
0x2229   :  { %5548 = vmatprep.mubr.msk.bf16.mxu0 %vm5924_vm1, %v5923_v13  ;;  %5541 = vmatpush3.bf16.msra.mxu0 %v3796_v15 }
0x222a   :  { %5542 = vmatprep.subr.bf16.mxu0 %v5923_v13 }
0x222d   :  { %5543 = vmatpush3.bf16.msra.mxu0 %v3795_v11 }
0x222e   :  { %5544 = vmatprep.subr.bf16.mxu0 %v5923_v13 }
0x2231   :  { %5545 = vmatpush3.bf16.msra.mxu0 %v3794_v3 }
0x2232   :  { %5546 = vmatprep.subr.bf16.mxu0 %v5923_v13 }
0x2235   :  { %5547 = vmatpush3.bf16.msra.mxu0 %v3793_v8  ;;  %v4951_v8 = vld [vmem:[%s7186_s3 + $0x150] ss:$0 sm:$0xff] }
0x2236   :  { %5568 = vmatprep.subr.bf16.mxu0 %v5923_v13 }
0x22e8   :  { %v3671_v18 = vpop.f32.mrf.mxu0 }
0x22e9   :  { %v3672_v21 = vadd.f32 %v4943_v17, %v3671_v18  ;;  %v3923_v17 = vld [vmem:[%s7186_s3 + $0x148] sm:$0xff]  ;;  %v3920_v18 = vld [vmem:[%s7186_s3 + $0x130] sm:$0xff] }
0x22ea   :  { %v5530_v23 = vpop.f32.mrf.mxu0 }
0x22eb   :  { %v6875_v9 = vadd.f32 %v3672_v21, %v6748_v45  ;;  %v3926_v21 = vpack.c.bf16 %v3923_v17, %v3922_v16  ;;  %v3921_v23 = vld [vmem:[%s7186_s3 + $0x138] sm:$0xff] }
0x22ec   :  { %v3674_v24 = vpop.f32.mrf.mxu0 }
0x22ed   :  { %v3679_v46 = vsel %vm38_vm0, %v6875_v9, 0.0 }
0x22ee   :  { %3680 = vadd.xlane.f32.xlu1 %v3679_v46  ;;  %v5531_v25 = vpop.f32.mrf.mxu0  ;;  %v3925_v46 = vpack.c.bf16 %v3921_v23, %v3920_v18 }
0x22f2   :  { %3886 = vadd.xlane.f32.xlu1 %v3885_v19 }
0x2377   :  { %v3681_v12 = vpop.xlane.xlu1 %3680 }
0x2378   :  { %v3682_v28 = vmul.f32 0.03125, %v3681_v12 }
0x237a   :  { %v3683_v45 = vsub.f32 %v6875_v9, %v3682_v28  ;;  %v3881_v28 = vld [vmem:[%s7186_s3 + $0x128] sm:$0x3] }
0x237b   :  { %v3887_v39 = vpop.xlane.xlu1 %3886 }
0x237c   :  { %v3684_v29 = vmul.f32 %v3683_v45, %v3683_v45  ;;  %v3889_v40 = vmul.f32 0.03125, %v3887_v39  ;;  %v4945_v39 = vld [vmem:[%s7186_s3 + $0xd8] ss:$0 sm:$0xff] }
0x237e   :  { %v3685_v30 = vsel %vm38_vm0, %v3684_v29, 0.0  ;;  %v6910_v42 = vsub.f32 %v6882_v26, %v3889_v40 }
0x237f   :  { %3686 = vadd.xlane.f32.xlu0 %v3685_v30 }
0x2380   :  { %v3893_v31 = vmul.f32 %v6910_v42, %v6910_v42 }
0x2382   :  { %v3897_v44 = vsel %vm38_vm0, %v3893_v31, 0.0 }
0x2383   :  { %3883 = vadd.xlane.f32.xlu0 %v3882_v33  ;;  %3898 = vadd.xlane.f32.xlu1 %v3897_v44  ;;  %v3917_v33 = vrot.slane %v3881_v28, %v6012_v22 }
0x2394   :  { %3979 = vrot.lane.b32.xlu1 %v3925_v46, %s5922_s28 }
0x2398   :  { %3986 = vrot.lane.b32.xlu1 %v4951_v8, %s5922_s28 }
0x2408   :  { %v3687_v32 = vpop.xlane.xlu0 %3686 }
0x2409   :  { %v3688_v47 = vmul.f32 0.03125, %v3687_v32 }
0x240b   :  { %v3689_v51 = vadd.f32 1e-05, %v3688_v47 }
0x240c   :  { %v3884_v52 = vpop.xlane.xlu0 %3883  ;;  %v3899_v4 = vpop.xlane.xlu1 %3898 }
0x240d   :  { %5820 = vrsqrt.f32 %v3689_v51  ;;  %v3888_v53 = vmul.f32 0.03125, %v3884_v52  ;;  %v3901_v6 = vmul.f32 0.03125, %v3899_v4 }
0x240f   :  { %v3890_v54 = vsub.f32 %v6891_v27, %v3888_v53  ;;  %v3903_v10 = vadd.f32 1e-05, %v3901_v6 }
0x2410   :  { %v3980_v7 = vpop.permute.xlu1 %3979 }
0x2411   :  { %v3892_v55 = vmul.f32 %v3890_v54, %v3890_v54  ;;  %5822 = vrsqrt.f32 %v3903_v10 }
0x2413   :  { %v3894_v56 = vsel %vm38_vm0, %v3892_v55, 0.0 }
0x2414   :  { %3895 = vadd.xlane.f32.xlu0 %v3894_v56 }
0x241a   :  { %v5821_v43 = vpop.eup %5820 }
0x241b   :  { %v3691_v41 = vmul.f32 %v5821_v43, %v3683_v45  ;;  %v3911_v45 = vrot.slane %v3881_v28, %v6007_v20 }
0x241d   :  { %v3696_v58 = vmul.f32 %v3695_v57, %v3691_v41 }
0x241e   :  { %v5823_v12 = vpop.eup %5822 }
0x241f   :  { %v3701_v50 = vadd.f32 %v3700_v48, %v3696_v58  ;;  %v3907_v29 = vmul.f32 %v5823_v12, %v6910_v42  ;;  %v4950_v12 = vld [vmem:[%s7186_s3 + $0x120] ss:$0 sm:$0xff] }
0x2421   :  { %v3706_v60 = vpack.c.bf16 %v3701_v50, %v3701_v50  ;;  %v3913_v30 = vmul.f32 %v3911_v45, %v3907_v29 }
0x2423   :  { %5537 = vmatmul.mubr.msk.bf16.vlgmr.msra.gmra.mxu1 %vm38_vm0, %v3706_v60  ;;  %v3919_v63 = vadd.f32 %v3917_v33, %v3913_v30 }
0x2424   :  { %5556 = vmatprep.mubr.msk.bf16.mxu1 %vm5924_vm1, %v5923_v13  ;;  %5553 = vmatpush3.bf16.msra.mxu1 %v3926_v21 }
0x2425   :  { %5554 = vmatprep.subr.bf16.mxu1 %v5923_v13 }
0x2428   :  { %5555 = vmatpush3.bf16.msra.mxu1 %v3925_v46 }
0x2429   :  { %5560 = vmatprep.subr.bf16.mxu1 %v5923_v13 }
0x242a   :  { %3981 = vrot.lane.b32.xlu0 %v3926_v21, %s5922_s28 }
0x249d   :  { %v3896_v24 = vpop.xlane.xlu0 %3895 }
0x249e   :  { %v3900_v25 = vmul.f32 0.03125, %v3896_v24 }
0x24a0   :  { %v3902_v19 = vadd.f32 1e-05, %v3900_v25 }
0x24a1   :  { %v3982_v11 = vpop.permute.xlu0 %3981 }
0x24a2   :  { %5824 = vrsqrt.f32 %v3902_v19 }
0x24af   :  { %v5825_v34 = vpop.eup %5824 }
0x24b0   :  { %v3906_v35 = vmul.f32 %v5825_v34, %v3890_v54 }
0x24b2   :  { %v3912_v36 = vmul.f32 %v3911_v45, %v3906_v35  ;;  %v3987_v35 = vpop.permute.xlu1 %3986 }
0x24b4   :  { %v3918_v37 = vadd.f32 %v3917_v33, %v3912_v36 }
0x24b6   :  { %v3924_v38 = vpack.c.bf16 %v3919_v63, %v3918_v37 }
0x24b8   :  { %5557 = vmatmul.mubr.msk.bf16.vlgmr.msra.gmra.mxu1 %vm38_vm0, %v3924_v38 }
0x24b9   :  { %5564 = vmatprep.mubr.msk.bf16.mxu1 %vm5924_vm1, %v5923_v13  ;;  %5561 = vmatpush3.bf16.msra.mxu1 %v3982_v11 }
0x24ba   :  { %5562 = vmatprep.subr.bf16.mxu1 %v5923_v13 }
0x24bd   :  { %5563 = vmatpush3.bf16.msra.mxu1 %v3980_v7 }
0x24be   :  { %5574 = vmatprep.subr.bf16.mxu1 %v5923_v13 }
0x24e3   :  { %v3751_v40 = vpop.f32.mrf.mxu1 }
0x24e4   :  { %v3752_v42 = vadd.f32 %v4945_v39, %v3751_v40 }
0x24e5   :  { %v5538_v31 = vpop.f32.mrf.mxu1 }
0x24e6   :  { %v3758_v44 = vmul.f32 0.70710677, %v3752_v42  ;;  %v3757_v3 = vmul.f32 0.5, %v3752_v42 }
0x24e7   :  { %v3754_v32 = vpop.f32.mrf.mxu1 }
0x24e8   :  { %v3759_v47 = vand.u32 2147483647, %v3758_v44  ;;  %vm3779_vm6 = vcmp.lt.f32.partialorder %v3758_v44, 0.0 }
0x24e9   :  { %v5539_v51 = vpop.f32.mrf.mxu1 }
0x24ea   :  { %v3760_v52 = vmul.f32 0.3275911, %v3759_v47  ;;  %v3773_v54 = vsub.f32 0.0, %v3759_v47 }
0x24ec   :  { %v3761_v53 = vadd.f32 1.0, %v3760_v52  ;;  %v3774_v55 = vmul.f32 %v3773_v54, %v3759_v47 }
0x24ee   :  { %5826 = vrcp.f32 %v3761_v53  ;;  %v3775_v57 = vmul.f32 1.442695, %v3774_v55 }
0x24f0   :  { %5828 = vpow2.f32 %v3775_v57 }
0x24fb   :  { %v5827_v56 = vpop.eup %5826 }
0x24fc   :  { %v3764_v0 = vmul.f32 1.0614054, %v5827_v56 }
0x24fd   :  { %v5829_v15 = vpop.eup %5828 }
0x24fe   :  { %v4947_v43 = vadd.f32 -1.4531521, %v3764_v0 }
0x2500   :  { %v3766_v41 = vmul.f32 %v5827_v56, %v4947_v43 }
0x2502   :  { %v3767_v48 = vadd.f32 1.4214138, %v3766_v41 }
0x2504   :  { %v3768_v58 = vmul.f32 %v5827_v56, %v3767_v48 }
0x2506   :  { %v4948_v50 = vadd.f32 -0.28449672, %v3768_v58 }
0x2508   :  { %v3770_v60 = vmul.f32 %v5827_v56, %v4948_v50 }
0x250a   :  { %v3771_v61 = vadd.f32 0.2548296, %v3770_v60 }
0x250c   :  { %v3772_v59 = vmul.f32 %v5827_v56, %v3771_v61 }
0x250e   :  { %v3777_v62 = vmul.f32 %v5829_v15, %v3772_v59 }
0x2510   :  { %v3778_v49 = vsub.f32 1.0, %v3777_v62 }
0x2512   :  { %v3780_v1 = vsub.f32 0.0, %v3778_v49 }
0x2514   :  { %v3781_v2 = vsel %vm3779_vm6, %v3780_v1, %v3778_v49 }
0x2515   :  { %v3782_v4 = vadd.f32 1.0, %v3781_v2 }
0x2517   :  { %v3783_v6 = vmul.f32 %v3782_v4, %v3757_v3 }
0x2519   :  { %v3792_v5 = vpack.c.bf16 %v3783_v6, %v3783_v6 }
0x251b   :  { %5549 = vmatmul.mubr.msk.bf16.vlgmr.msra.gmra.mxu0 %vm1394_vm12, %v3792_v5 }
0x251c   :  { %5570 = vmatprep.mubr.msk.bf16.mxu0 %vm5924_vm1, %v5923_v13 }
0x2578   :  { %v3969_v10 = vpop.f32.mrf.mxu1 }
0x2579   :  { %v3970_v16 = vadd.f32 %v4951_v8, %v3969_v10 }
0x257a   :  { %v5558_v17 = vpop.f32.mrf.mxu1 }
0x257b   :  { %v4032_v21 = vmul.f32 0.35355338, %v3970_v16 }
0x257c   :  { %v3972_v18 = vpop.f32.mrf.mxu1 }
0x257d   :  { %v3973_v23 = vadd.f32 %v4951_v8, %v3972_v18 }
0x257e   :  { %v5559_v24 = vpop.f32.mrf.mxu1 }
0x257f   :  { %v4033_v46 = vmul.f32 0.35355338, %v3973_v23 }
0x2581   :  { %v4034_v25 = vpack.c.bf16 %v4033_v46, %v4032_v21 }
0x2583   :  { %4157 = vrot.lane.b32.xlu1 %v4034_v25, %s5925_s14 }
0x2587   :  { %4280 = vrot.lane.b32.xlu1 %v4034_v25, %s5926_s15 }
0x258b   :  { %4403 = vrot.lane.b32.xlu1 %v4034_v25, %s5927_s16 }
0x25db   :  { %v3834_v19 = vpop.f32.mrf.mxu0 }
0x25dc   :  { %v3840_v28 = vadd.f32 %v3834_v19, %v6875_v9 }
0x25dd   :  { %v5550_v45 = vpop.f32.mrf.mxu0 }
0x25de   :  { %v3846_v29 = vadd.f32 %v4950_v12, %v3840_v28 }
0x25df   :  { %v3837_v30 = vpop.f32.mrf.mxu0 }
0x25e0   :  { %3848 = vst.msk [vmem:[#allocation2 + $0x8] sm:$0xff] %vm38_vm0, %v3846_v29  ;;  %v3976_v33 = vpack.c.bf16 %v3846_v29, %v3846_v29 }
0x25e1   :  { %v5551_v34 = vpop.f32.mrf.mxu0 }
0x25e2   :  { %5565 = vmatmul.mubr.msk.bf16.vlgmr.msra.gmra.mxu1 %vm38_vm0, %v3976_v33 }
0x25e3   :  { %5576 = vmatprep.mubr.msk.bf16.mxu1 %vm5924_vm1, %v5923_v13 }
0x25f5   :  { %v4158_v32 = vpop.permute.xlu1 %4157 }
0x26a2   :  { %v4026_v36 = vpop.f32.mrf.mxu1 }
0x26a3   :  { %v4027_v63 = vadd.f32 %v4026_v36, %v3987_v35 }
0x26a4   :  { %v5566_v37 = vpop.f32.mrf.mxu1 }
0x26a5   :  { %v7001_v38 = vpack.c.bf16 %v4027_v63, %v4027_v63 }
0x26a6   :  { %v4029_v39 = vpop.f32.mrf.mxu1 }
0x26a7   :  { %4159 = vrot.lane.b32.xlu0 %v7001_v38, %s5925_s14  ;;  %v4040_v9 = vsel %vm178_vm3, %v7001_v38, 0 }
0x26a8   :  { %v5567_v40 = vpop.f32.mrf.mxu1  ;;  %5569 = vmatpush3.bf16.xpose.msra.mxu0 %v4040_v9 }
0x26a9   :  { %5580 = vmatprep.subr.bf16.mxu0 %v5923_v13 }
0x26ab   :  { %4282 = vrot.lane.b32.xlu0 %v7001_v38, %s5926_s15 }
0x26af   :  { %4405 = vrot.lane.b32.xlu0 %v7001_v38, %s5927_s16  ;;  %5571 = vmatmul.mubr.msk.bf16.vlgmr.msra.gmra.mxu0 %vm178_vm3, %v4034_v25 }
0x26b0   :  { %5582 = vmatprep.mubr.msk.bf16.mxu0 %vm5924_vm1, %v5923_v13 }
0x26cd   :  { %3849 = vxpose.xlu0.b32.start.end [1/1] (short) (narrow) %v6682_v14, 16  ;;  %v4281_v14 = vpop.permute.xlu1 %4280 }
0x26d1   :  { %v4404_v53 = vpop.permute.xlu1 %4403 }
0x2719   :  { %v4160_v42 = vpop.permute.xlu0 %4159 }
0x271a   :  { %v4165_v31 = vsel %vm178_vm3, %v4160_v42, 0 }
0x271b   :  { %5581 = vmatpush3.bf16.xpose.msra.mxu0 %v4165_v31 }
0x271c   :  { %5592 = vmatprep.subr.bf16.mxu0 %v5923_v13 }
0x271d   :  { %v4283_v44 = vpop.permute.xlu0 %4282 }
0x271e   :  { %v4288_v47 = vsel %vm178_vm3, %v4283_v44, 0 }
0x2721   :  { %v4406_v51 = vpop.permute.xlu0 %4405 }
0x2722   :  { %5583 = vmatmul.mubr.msk.bf16.vlgmr.msra.gmra.mxu0 %vm178_vm3, %v4158_v32  ;;  %v4411_v52 = vsel %vm178_vm3, %v4406_v51, 0 }
0x2723   :  { %5593 = vmatpush3.bf16.xpose.msra.mxu0 %v4288_v47  ;;  %5594 = vmatprep.mubr.msk.bf16.mxu0 %vm5924_vm1, %v5923_v13 }
0x2724   :  { %5604 = vmatprep.subr.bf16.mxu0 %v5923_v13 }
0x272a   :  { %5595 = vmatmul.mubr.msk.bf16.vlgmr.msra.gmra.mxu0 %vm178_vm3, %v4281_v14 }
0x272b   :  { %5605 = vmatpush3.bf16.xpose.msra.mxu0 %v4411_v52  ;;  %5606 = vmatprep.mubr.msk.bf16.mxu0 %vm5924_vm1, %v5923_v13 }
0x272c   :  { %5616 = vmatprep.subr.bf16.mxu0 %v5923_v13 }
0x2732   :  { %5607 = vmatmul.mubr.msk.bf16.vlgmr.msra.gmra.mxu0 %vm178_vm3, %v4404_v53 }
0x2733   :  { %5620 = vmatprep.mubr.msk.bf16.mxu0 %vm5924_vm1, %v5923_v13 }
0x2749   :  { %v3865_v54 = vpop.trf.xlu0 }
0x274d   :  { %v3866_v57 = vpop.trf.xlu0 }
0x276f   :  { %v4076_v55 = vpop.f32.mrf.mxu0 }
0x2770   :  { %v4077_v56 = vadd.f32 %v4076_v55, %v3865_v54 }
0x2771   :  { %v5572_v0 = vpop.f32.mrf.mxu0 }
0x2772   :  { %v4083_v43 = vsel %vm178_vm3, %v4077_v56, -inf }
0x2773   :  { %4084 = vmax.xlane.f32.xlu1 %v4083_v43  ;;  %v4079_v41 = vpop.f32.mrf.mxu0 }
0x2774   :  { %v4080_v48 = vadd.f32 %v4079_v41, %v3866_v57 }
0x2775   :  { %v5573_v58 = vpop.f32.mrf.mxu0 }
0x2776   :  { %v4086_v50 = vsel %vm178_vm3, %v4080_v48, -inf }
0x2777   :  { %4087 = vmax.xlane.f32.xlu0 %v4086_v50 }
0x27e2   :  { %v4201_v60 = vpop.f32.mrf.mxu0 }
0x27e3   :  { %v4202_v61 = vadd.f32 %v4201_v60, %v3865_v54 }
0x27e4   :  { %v5584_v59 = vpop.f32.mrf.mxu0 }
0x27e5   :  { %v4208_v15 = vsel %vm178_vm3, %v4202_v61, -inf }
0x27e6   :  { %4209 = vmax.xlane.f32.xlu1 %v4208_v15  ;;  %v4204_v62 = vpop.f32.mrf.mxu0 }
0x27e7   :  { %v4205_v49 = vadd.f32 %v4204_v62, %v3866_v57 }
0x27e8   :  { %v5585_v11 = vpop.f32.mrf.mxu0 }
0x27e9   :  { %v4211_v1 = vsel %vm178_vm3, %v4205_v49, -inf }
0x27ea   :  { %4212 = vmax.xlane.f32.xlu1 %v4211_v1  ;;  %v4324_v2 = vpop.f32.mrf.mxu0 }
0x27eb   :  { %v4325_v3 = vadd.f32 %v4324_v2, %v3865_v54 }
0x27ec   :  { %v5596_v4 = vpop.f32.mrf.mxu0 }
0x27ed   :  { %v4331_v6 = vsel %vm178_vm3, %v4325_v3, -inf }
0x27ee   :  { %4332 = vmax.xlane.f32.xlu1 %v4331_v6  ;;  %v4327_v5 = vpop.f32.mrf.mxu0 }
0x27ef   :  { %v4328_v7 = vadd.f32 %v4327_v5, %v3866_v57 }
0x27f0   :  { %v5597_v8 = vpop.f32.mrf.mxu0 }
0x27f1   :  { %v4334_v10 = vsel %vm178_vm3, %v4328_v7, -inf }
0x27f2   :  { %4335 = vmax.xlane.f32.xlu1 %v4334_v10  ;;  %v4447_v16 = vpop.f32.mrf.mxu0 }
0x27f3   :  { %v4448_v17 = vadd.f32 %v4447_v16, %v3865_v54 }
0x27f4   :  { %v5608_v18 = vpop.f32.mrf.mxu0 }
0x27f5   :  { %v4454_v21 = vsel %vm178_vm3, %v4448_v17, -inf }
0x27f6   :  { %4455 = vmax.xlane.f32.xlu1 %v4454_v21  ;;  %v4450_v23 = vpop.f32.mrf.mxu0 }
0x27f7   :  { %v4451_v24 = vadd.f32 %v4450_v23, %v3866_v57 }
0x27f8   :  { %v5609_v46 = vpop.f32.mrf.mxu0 }
0x27f9   :  { %v4457_v25 = vsel %vm178_vm3, %v4451_v24, -inf }
0x27fa   :  { %4458 = vmax.xlane.f32.xlu1 %v4457_v25 }
0x27fc   :  { %v4085_v19 = vpop.xlane.xlu1 %4084 }
0x27fd   :  { %v4089_v12 = vsub.f32 %v4077_v56, %v4085_v19 }
0x27ff   :  { %v4091_v45 = vmul.f32 1.442695, %v4089_v12 }
0x2800   :  { %v4088_v28 = vpop.xlane.xlu0 %4087 }
0x2801   :  { %v4090_v29 = vsub.f32 %v4080_v48, %v4088_v28  ;;  %5830 = vpow2.f32 %v4091_v45 }
0x2803   :  { %v4093_v30 = vmul.f32 1.442695, %v4090_v29 }
0x2805   :  { %5832 = vpow2.f32 %v4093_v30 }
0x280b   :  { %4107 = vrot.lane.b32.xlu1 %v7001_v38, %s5922_s28 }
0x280e   :  { %v5831_v33 = vpop.eup %5830 }
0x280f   :  { %v4095_v34 = vsel %vm178_vm3, %v5831_v33, 0.0 }
0x2812   :  { %v5833_v35 = vpop.eup %5832 }
0x2813   :  { %v4098_v36 = vsel %vm178_vm3, %v5833_v35, 0.0 }
0x282f   :  { %4096 = vadd.xlane.f32.xlu1 %v4095_v34 }
0x2833   :  { %4099 = vadd.xlane.f32.xlu1 %v4098_v36 }
0x286f   :  { %v4210_v63 = vpop.xlane.xlu1 %4209 }
0x2870   :  { %v4214_v37 = vsub.f32 %v4202_v61, %v4210_v63 }
0x2872   :  { %v4216_v39 = vmul.f32 1.442695, %v4214_v37 }
0x2873   :  { %v4213_v9 = vpop.xlane.xlu1 %4212 }
0x2874   :  { %5834 = vpow2.f32 %v4216_v39  ;;  %v4215_v40 = vsub.f32 %v4205_v49, %v4213_v9 }
0x2876   :  { %v4218_v42 = vmul.f32 1.442695, %v4215_v40 }
0x2877   :  { %v4333_v31 = vpop.xlane.xlu1 %4332 }
0x2878   :  { %5836 = vpow2.f32 %v4218_v42  ;;  %v4337_v44 = vsub.f32 %v4325_v3, %v4333_v31 }
0x287a   :  { %v4339_v32 = vmul.f32 1.442695, %v4337_v44 }
0x287b   :  { %v4336_v47 = vpop.xlane.xlu1 %4335 }
0x287c   :  { %5838 = vpow2.f32 %v4339_v32  ;;  %v4338_v51 = vsub.f32 %v4328_v7, %v4336_v47 }
0x287e   :  { %v4341_v14 = vmul.f32 1.442695, %v4338_v51 }
0x287f   :  { %v4456_v52 = vpop.xlane.xlu1 %4455 }
0x2880   :  { %5840 = vpow2.f32 %v4341_v14  ;;  %v4460_v53 = vsub.f32 %v4448_v17, %v4456_v52 }
0x2881   :  { %v5835_v54 = vpop.eup %5834 }
0x2882   :  { %v4462_v55 = vmul.f32 1.442695, %v4460_v53  ;;  %v4220_v56 = vsel %vm178_vm3, %v5835_v54, 0.0 }
0x2883   :  { %4221 = vadd.xlane.f32.xlu1 %v4220_v56  ;;  %v4459_v0 = vpop.xlane.xlu1 %4458 }
0x2884   :  { %5842 = vpow2.f32 %v4462_v55  ;;  %v4461_v57 = vsub.f32 %v4451_v24, %v4459_v0  ;;  %v4559_v55 = vld [vmem:[%s7186_s3 + $0x170] sm:$0xff] }
0x2885   :  { %v5837_v43 = vpop.eup %5836 }
0x2886   :  { %v4464_v41 = vmul.f32 1.442695, %v4461_v57  ;;  %v4223_v48 = vsel %vm178_vm3, %v5837_v43, 0.0 }
0x2887   :  { %4224 = vadd.xlane.f32.xlu1 %v4223_v48  ;;  %v4108_v58 = vpop.permute.xlu1 %4107  ;;  %v4556_v48 = vld [vmem:[%s7186_s3 + $0x158] sm:$0xff] }
0x2888   :  { %5844 = vpow2.f32 %v4464_v41  ;;  %v4113_v50 = vsel %vm829_vm10, %v4108_v58, 0  ;;  %v4557_v58 = vld [vmem:[%s7186_s3 + $0x160] sm:$0xff] }
0x2889   :  { %v5839_v60 = vpop.eup %5838  ;;  %5575 = vmatpush3.bf16.msra.mxu1 %v4113_v50  ;;  %v4561_v50 = vpack.c.bf16 %v4557_v58, %v4556_v48 }
0x288a   :  { %v4343_v61 = vsel %vm178_vm3, %v5839_v60, 0.0  ;;  %5586 = vmatprep.subr.bf16.mxu1 %v5923_v13 }
0x288b   :  { %4344 = vadd.xlane.f32.xlu1 %v4343_v61 }
0x288d   :  { %v5841_v59 = vpop.eup %5840 }
0x288e   :  { %v4346_v15 = vsel %vm178_vm3, %v5841_v59, 0.0 }
0x288f   :  { %4347 = vadd.xlane.f32.xlu0 %v4346_v15 }
0x2891   :  { %v5843_v62 = vpop.eup %5842 }
0x2892   :  { %v4466_v49 = vsel %vm178_vm3, %v5843_v62, 0.0 }
0x2893   :  { %4467 = vadd.xlane.f32.xlu1 %v4466_v49 }
0x2895   :  { %v5845_v11 = vpop.eup %5844 }
0x2896   :  { %v4469_v1 = vsel %vm178_vm3, %v5845_v11, 0.0 }
0x2897   :  { %4470 = vadd.xlane.f32.xlu0 %v4469_v1 }
0x28a4   :  { %4354 = vrot.lane.b32.xlu1 %v7001_v38, %s5931_s19 }
0x28a8   :  { %4477 = vrot.lane.b32.xlu1 %v7001_v38, %s5930_s18 }
0x28ad   :  { %4231 = vrot.lane.b32.xlu0 %v7001_v38, %s5929_s17 }
0x28b8   :  { %v4097_v2 = vpop.xlane.xlu1 %4096 }
0x28b9   :  { %5846 = vrcp.f32 %v4097_v2 }
0x28bc   :  { %v4100_v3 = vpop.xlane.xlu1 %4099 }
0x28bd   :  { %5848 = vrcp.f32 %v4100_v3 }
0x28c6   :  { %v5847_v4 = vpop.eup %5846 }
0x28c7   :  { %v4103_v5 = vmul.f32 %v5847_v4, %v5831_v33 }
0x28ca   :  { %v5849_v6 = vpop.eup %5848 }
0x28cb   :  { %v4104_v7 = vmul.f32 %v5849_v6, %v5833_v35 }
0x28cd   :  { %v4105_v8 = vpack.c.bf16 %v4104_v7, %v4103_v5 }
0x28cf   :  { %5577 = vmatmul.mubr.msk.bf16.vlgmr.msra.gmra.mxu1 %vm178_vm3, %v4105_v8 }
0x28d0   :  { %5588 = vmatprep.mubr.msk.bf16.mxu1 %vm5924_vm1, %v5923_v13 }
0x290c   :  { %v4222_v10 = vpop.xlane.xlu1 %4221 }
0x2910   :  { %v4225_v16 = vpop.xlane.xlu1 %4224 }
0x2911   :  { %5850 = vrcp.f32 %v4225_v16 }
0x2912   :  { %5852 = vrcp.f32 %v4222_v10 }
0x2914   :  { %v4345_v38 = vpop.xlane.xlu1 %4344 }
0x2918   :  { %v4348_v17 = vpop.xlane.xlu0 %4347 }
0x2919   :  { %5854 = vrcp.f32 %v4348_v17 }
0x291a   :  { %5856 = vrcp.f32 %v4345_v38 }
0x291c   :  { %v4468_v21 = vpop.xlane.xlu1 %4467 }
0x291e   :  { %v5851_v18 = vpop.eup %5850 }
0x291f   :  { %v5853_v24 = vpop.eup %5852  ;;  %v4229_v46 = vmul.f32 %v5851_v18, %v5837_v43 }
0x2920   :  { %v4471_v23 = vpop.xlane.xlu0 %4470  ;;  %v4228_v19 = vmul.f32 %v5853_v24, %v5835_v54  ;;  %v4355_v28 = vpop.permute.xlu1 %4354  ;;  %v4558_v54 = vld [vmem:[%s7186_s3 + $0x168] sm:$0xff] }
0x2921   :  { %5858 = vrcp.f32 %v4471_v23  ;;  %v4360_v30 = vsel %vm829_vm10, %v4355_v28, 0  ;;  %v4562_v0 = vpack.c.bf16 %v4559_v55, %v4558_v54 }
0x2922   :  { %5860 = vrcp.f32 %v4468_v21  ;;  %v4230_v45 = vpack.c.bf16 %v4229_v46, %v4228_v19 }
0x2923   :  { %5617 = vmatpush3.bf16.msra.mxu0 %v4562_v0 }
0x2924   :  { %v4232_v25 = vpop.permute.xlu0 %4231  ;;  %v4478_v36 = vpop.permute.xlu1 %4477  ;;  %5618 = vmatprep.subr.bf16.mxu0 %v5923_v13 }
0x2925   :  { %v4237_v12 = vsel %vm829_vm10, %v4232_v25, 0  ;;  %v4483_v39 = vsel %vm829_vm10, %v4478_v36, 0  ;;  %v4962_v25 = vld [vmem:[%s7186_s3 + $0x178] ss:$0 sm:$0xff] }
0x2926   :  { %5587 = vmatpush3.bf16.msra.mxu1 %v4237_v12  ;;  %v5855_v29 = vpop.eup %5854 }
0x2927   :  { %5598 = vmatprep.subr.bf16.mxu1 %v5923_v13  ;;  %v5857_v33 = vpop.eup %5856  ;;  %v4352_v34 = vmul.f32 %v5855_v29, %v5841_v59  ;;  %5619 = vmatpush3.bf16.msra.mxu0 %v4561_v50 }
0x2928   :  { %v4351_v35 = vmul.f32 %v5857_v33, %v5839_v60  ;;  %5632 = vmatprep.subr.bf16.mxu0 %v5923_v13 }
0x2929   :  { %5589 = vmatmul.mubr.msk.bf16.vlgmr.msra.gmra.mxu1 %vm178_vm3, %v4230_v45 }
0x292a   :  { %5599 = vmatpush3.bf16.msra.mxu1 %v4360_v30  ;;  %5600 = vmatprep.mubr.msk.bf16.mxu1 %vm5924_vm1, %v5923_v13  ;;  %v4353_v63 = vpack.c.bf16 %v4352_v34, %v4351_v35 }
0x292b   :  { %5610 = vmatprep.subr.bf16.mxu1 %v5923_v13 }
0x292e   :  { %v5859_v37 = vpop.eup %5858 }
0x292f   :  { %v5861_v9 = vpop.eup %5860  ;;  %v4475_v40 = vmul.f32 %v5859_v37, %v5845_v11 }
0x2930   :  { %v4474_v42 = vmul.f32 %v5861_v9, %v5843_v62 }
0x2931   :  { %5601 = vmatmul.mubr.msk.bf16.vlgmr.msra.gmra.mxu1 %vm178_vm3, %v4353_v63 }
0x2932   :  { %5611 = vmatpush3.bf16.msra.mxu1 %v4483_v39  ;;  %5612 = vmatprep.mubr.msk.bf16.mxu1 %vm5924_vm1, %v5923_v13  ;;  %v4476_v31 = vpack.c.bf16 %v4475_v40, %v4474_v42 }
0x2933   :  { %5624 = vmatprep.subr.bf16.mxu1 %v5923_v13 }
0x2939   :  { %5613 = vmatmul.mubr.msk.bf16.vlgmr.msra.gmra.mxu1 %vm178_vm3, %v4476_v31 }
0x293a   :  { %5628 = vmatprep.mubr.msk.bf16.mxu1 %vm5924_vm1, %v5923_v13 }
0x298f   :  { %v4149_v44 = vpop.f32.mrf.mxu1 }
0x2991   :  { %v5578_v32 = vpop.f32.mrf.mxu1 }
0x2992   :  { %v4655_v32 = vld [vmem:[%s7186_s3 + $0x198] sm:$0xff] }
0x2993   :  { %v4152_v47 = vpop.f32.mrf.mxu1 }
0x2995   :  { %v5579_v51 = vpop.f32.mrf.mxu1 }
0x29e9   :  { %v4273_v14 = vpop.f32.mrf.mxu1 }
0x29eb   :  { %v5590_v52 = vpop.f32.mrf.mxu1 }
0x29ec   :  { %v4654_v52 = vld [vmem:[%s7186_s3 + $0x190] sm:$0xff] }
0x29ed   :  { %v4276_v53 = vpop.f32.mrf.mxu1 }
0x29ee   :  { %v5679_v56 = vpack.i.bf16 %v4276_v53, %v4273_v14  ;;  %v4653_v14 = vld [vmem:[%s7186_s3 + $0x188] sm:$0xff] }
0x29ef   :  { %v5591_v57 = vpop.f32.mrf.mxu1  ;;  %v4658_v53 = vpack.c.bf16 %v4654_v52, %v4653_v14 }
0x29f0   :  { %5680 = vrot.lane.b32.xlu0 %v5679_v56, %s5932_s20 }
0x29f1   :  { %v4396_v43 = vpop.f32.mrf.mxu1 }
0x29f3   :  { %v5602_v41 = vpop.f32.mrf.mxu1 }
0x29f4   :  { %v4614_v41 = vld [vmem:[%s7186_s3 + $0x180] sm:$0x3] }
0x29f5   :  { %v4399_v60 = vpop.f32.mrf.mxu1  ;;  %v4644_v58 = vrot.slane %v4614_v41, %v6007_v20  ;;  %v4770_v20 = vld [vmem:[%s7186_s3 + $0x1e8] sm:$0xff] }
0x29f6   :  { %v5684_v61 = vpack.i.bf16 %v4399_v60, %v4396_v43 }
0x29f7   :  { %v5603_v59 = vpop.f32.mrf.mxu1 }
0x29f8   :  { %5685 = vrot.lane.b32.xlu1 %v5684_v61, %s5933_s30  ;;  %v4650_v61 = vrot.slane %v4614_v41, %v6012_v22  ;;  %v4767_v22 = vld [vmem:[%s7186_s3 + $0x1d0] sm:$0xff] }
0x29f9   :  { %v4519_v15 = vpop.f32.mrf.mxu1 }
0x29fb   :  { %v5614_v62 = vpop.f32.mrf.mxu1 }
0x29fd   :  { %v4522_v49 = vpop.f32.mrf.mxu1 }
0x29fe   :  { %v5689_v11 = vpack.i.bf16 %v4522_v49, %v4519_v15 }
0x29ff   :  { %v5615_v1 = vpop.f32.mrf.mxu1 }
0x2a00   :  { %5690 = vrot.lane.b32.xlu0 %v5689_v11, %s5934_s6 }
0x2a62   :  { %v5681_v2 = vpop.permute.xlu0 %5680 }
0x2a63   :  { %v5683_v4 = vunpack.i.h.bf16 %v5681_v2  ;;  %v5682_v6 = vunpack.i.l.bf16 %v5681_v2  ;;  %v4769_v2 = vld [vmem:[%s7186_s3 + $0x1e0] sm:$0xff] }
0x2a65   :  { %v4551_v10 = vsel %vm178_vm3, %v4152_v47, %v5683_v4  ;;  %v4550_v16 = vsel %vm178_vm3, %v4149_v44, %v5682_v6  ;;  %v4656_v47 = vld [vmem:[%s7186_s3 + $0x1a0] sm:$0xff]  ;;  %v4768_v4 = vld [vmem:[%s7186_s3 + $0x1d8] sm:$0xff] }
0x2a66   :  { %v4659_v51 = vpack.c.bf16 %v4656_v47, %v4655_v32  ;;  %v4774_v6 = vpack.c.bf16 %v4768_v4, %v4767_v22 }
0x2a68   :  { %5625 = vmatpush3.bf16.msra.mxu1 %v4659_v51 }
0x2a69   :  { %5626 = vmatprep.subr.bf16.mxu1 %v5923_v13 }
0x2a6a   :  { %v5686_v3 = vpop.permute.xlu1 %5685 }
0x2a6b   :  { %v5688_v5 = vunpack.i.h.bf16 %v5686_v3  ;;  %v5687_v7 = vunpack.i.l.bf16 %v5686_v3  ;;  %v4775_v3 = vpack.c.bf16 %v4770_v20, %v4769_v2 }
0x2a6c   :  { %5627 = vmatpush3.bf16.msra.mxu1 %v4658_v53 }
0x2a6d   :  { %v4553_v18 = vsel %vm26_vm2, %v4551_v10, %v5688_v5  ;;  %v4552_v21 = vsel %vm26_vm2, %v4550_v16, %v5687_v7  ;;  %v4765_v5 = vld [vmem:[%s7186_s3 + $0x1c0] sm:$0xff]  ;;  %v4766_v7 = vld [vmem:[%s7186_s3 + $0x1c8] sm:$0xff]  ;;  %v4763_v10 = vld [vmem:[%s7186_s3 + $0x1b0] sm:$0xff] }
0x2a6e   :  { %v4764_v16 = vld [vmem:[%s7186_s3 + $0x1b8] sm:$0xff] }
0x2a72   :  { %v5691_v8 = vpop.permute.xlu0 %5690 }
0x2a73   :  { %v5693_v17 = vunpack.i.h.bf16 %v5691_v8  ;;  %v5692_v38 = vunpack.i.l.bf16 %v5691_v8  ;;  %v4773_v8 = vpack.c.bf16 %v4766_v7, %v4765_v5 }
0x2a75   :  { %v4554_v23 = vsel %vm623_vm9, %v4552_v21, %v5692_v38  ;;  %v4555_v24 = vsel %vm623_vm9, %v4553_v18, %v5693_v17  ;;  %v4772_v17 = vpack.c.bf16 %v4764_v16, %v4763_v10  ;;  %v4964_v38 = vld [vmem:[%s7186_s3 + $0x1a8] ss:$0 sm:$0xff] }
0x2a76   :  { %v4560_v46 = vpack.c.bf16 %v4555_v24, %v4554_v23 }
0x2a78   :  { %5621 = vmatmul.mubr.msk.bf16.vlgmr.msra.gmra.mxu0 %vm38_vm0, %v4560_v46 }
0x2a79   :  { %5640 = vmatprep.mubr.msk.bf16.mxu0 %vm5924_vm1, %v5923_v13  ;;  %5633 = vmatpush3.bf16.msra.mxu0 %v4775_v3 }
0x2a7a   :  { %5634 = vmatprep.subr.bf16.mxu0 %v5923_v13 }
0x2a7d   :  { %5635 = vmatpush3.bf16.msra.mxu0 %v4774_v6 }
0x2a7e   :  { %5636 = vmatprep.subr.bf16.mxu0 %v5923_v13 }
0x2a81   :  { %5637 = vmatpush3.bf16.msra.mxu0 %v4773_v8 }
0x2a82   :  { %5638 = vmatprep.subr.bf16.mxu0 %v5923_v13 }
0x2a85   :  { %5639 = vmatpush3.bf16.msra.mxu0 %v4772_v17 }
0x2b38   :  { %v4605_v19 = vpop.f32.mrf.mxu0 }
0x2b39   :  { %v4606_v12 = vadd.f32 %v4962_v25, %v4605_v19 }
0x2b3a   :  { %v5622_v28 = vpop.f32.mrf.mxu0 }
0x2b3b   :  { %v7105_v45 = vadd.f32 %v6891_v27, %v4606_v12 }
0x2b3c   :  { %v4608_v29 = vpop.f32.mrf.mxu0 }
0x2b3d   :  { %v4609_v30 = vadd.f32 %v4962_v25, %v4608_v29  ;;  %v4615_v33 = vsel %vm38_vm0, %v7105_v45, 0.0 }
0x2b3e   :  { %4616 = vadd.xlane.f32.xlu1 %v4615_v33  ;;  %v5623_v34 = vpop.f32.mrf.mxu0 }
0x2b3f   :  { %v7110_v35 = vadd.f32 %v6882_v26, %v4609_v30 }
0x2b41   :  { %v4618_v36 = vsel %vm38_vm0, %v7110_v35, 0.0 }
0x2b42   :  { %4619 = vadd.xlane.f32.xlu0 %v4618_v36 }
0x2bc7   :  { %v4617_v63 = vpop.xlane.xlu1 %4616 }
0x2bc8   :  { %v4621_v37 = vmul.f32 0.03125, %v4617_v63 }
0x2bca   :  { %v4623_v39 = vsub.f32 %v7105_v45, %v4621_v37 }
0x2bcb   :  { %v4620_v27 = vpop.xlane.xlu0 %4619 }
0x2bcc   :  { %v4622_v9 = vmul.f32 0.03125, %v4620_v27  ;;  %v4625_v40 = vmul.f32 %v4623_v39, %v4623_v39 }
0x2bce   :  { %v4624_v42 = vsub.f32 %v7110_v35, %v4622_v9  ;;  %v4627_v31 = vsel %vm38_vm0, %v4625_v40, 0.0 }
0x2bcf   :  { %4628 = vadd.xlane.f32.xlu0 %v4627_v31 }
0x2bd0   :  { %v4626_v44 = vmul.f32 %v4624_v42, %v4624_v42 }
0x2bd2   :  { %v4630_v26 = vsel %vm38_vm0, %v4626_v44, 0.0 }
0x2bd3   :  { %4631 = vadd.xlane.f32.xlu1 %v4630_v26 }
0x2c58   :  { %v4629_v54 = vpop.xlane.xlu0 %4628 }
0x2c59   :  { %v4633_v55 = vmul.f32 0.03125, %v4629_v54 }
0x2c5b   :  { %v4635_v56 = vadd.f32 1e-05, %v4633_v55 }
0x2c5c   :  { %v4632_v0 = vpop.xlane.xlu1 %4631 }
0x2c5d   :  { %5862 = vrsqrt.f32 %v4635_v56  ;;  %v4634_v57 = vmul.f32 0.03125, %v4632_v0 }
0x2c5f   :  { %v4636_v43 = vadd.f32 1e-05, %v4634_v57 }
0x2c61   :  { %5864 = vrsqrt.f32 %v4636_v43 }
0x2c6a   :  { %v5863_v48 = vpop.eup %5862 }
0x2c6b   :  { %v4639_v50 = vmul.f32 %v5863_v48, %v4623_v39 }
0x2c6d   :  { %v4645_v59 = vmul.f32 %v4644_v58, %v4639_v50 }
0x2c6e   :  { %v5865_v60 = vpop.eup %5864 }
0x2c6f   :  { %v4640_v15 = vmul.f32 %v5865_v60, %v4624_v42  ;;  %v4651_v49 = vadd.f32 %v4650_v61, %v4645_v59 }
0x2c71   :  { %v4646_v62 = vmul.f32 %v4644_v58, %v4640_v15 }
0x2c73   :  { %v4652_v11 = vadd.f32 %v4650_v61, %v4646_v62 }
0x2c75   :  { %v4657_v1 = vpack.c.bf16 %v4652_v11, %v4651_v49 }
0x2c77   :  { %5629 = vmatmul.mubr.msk.bf16.vlgmr.msra.gmra.mxu1 %vm38_vm0, %v4657_v1 }
0x2d37   :  { %v4702_v18 = vpop.f32.mrf.mxu1 }
0x2d38   :  { %v4703_v21 = vadd.f32 %v4964_v38, %v4702_v18 }
0x2d39   :  { %v5630_v23 = vpop.f32.mrf.mxu1 }
0x2d3a   :  { %v4711_v24 = vmul.f32 0.70710677, %v4703_v21  ;;  %v4709_v3 = vmul.f32 0.5, %v4703_v21 }
0x2d3b   :  { %v4705_v46 = vpop.f32.mrf.mxu1 }
0x2d3c   :  { %v4713_v13 = vand.u32 2147483647, %v4711_v24  ;;  %v4706_v25 = vadd.f32 %v4964_v38, %v4705_v46  ;;  %vm4753_vm1 = vcmp.lt.f32.partialorder %v4711_v24, 0.0 }
0x2d3d   :  { %v5631_v19 = vpop.f32.mrf.mxu1 }
0x2d3e   :  { %v4715_v12 = vmul.f32 0.3275911, %v4713_v13  ;;  %v4712_v28 = vmul.f32 0.70710677, %v4706_v25  ;;  %v4741_v36 = vsub.f32 0.0, %v4713_v13  ;;  %v4710_v22 = vmul.f32 0.5, %v4706_v25 }
0x2d40   :  { %v4717_v29 = vadd.f32 1.0, %v4715_v12  ;;  %v4714_v30 = vand.u32 2147483647, %v4712_v28  ;;  %v4743_v63 = vmul.f32 %v4741_v36, %v4713_v13  ;;  %vm4754_vm2 = vcmp.lt.f32.partialorder %v4712_v28, 0.0 }
0x2d42   :  { %5866 = vrcp.f32 %v4717_v29  ;;  %v4716_v33 = vmul.f32 0.3275911, %v4714_v30  ;;  %v4742_v37 = vsub.f32 0.0, %v4714_v30  ;;  %v4745_v9 = vmul.f32 1.442695, %v4743_v63 }
0x2d44   :  { %v4718_v34 = vadd.f32 1.0, %v4716_v33  ;;  %v4744_v40 = vmul.f32 %v4742_v37, %v4714_v30 }
0x2d46   :  { %5868 = vrcp.f32 %v4718_v34  ;;  %v4747_v32 = vmul.f32 1.442695, %v4744_v40 }
0x2d47   :  { %5870 = vpow2.f32 %v4745_v9 }
0x2d48   :  { %5872 = vpow2.f32 %v4747_v32 }
0x2d4f   :  { %v5867_v39 = vpop.eup %5866 }
0x2d50   :  { %v4723_v27 = vmul.f32 1.0614054, %v5867_v39 }
0x2d52   :  { %v4966_v42 = vadd.f32 -1.4531521, %v4723_v27 }
0x2d53   :  { %v5869_v31 = vpop.eup %5868 }
0x2d54   :  { %v4727_v44 = vmul.f32 %v5867_v39, %v4966_v42  ;;  %v4724_v26 = vmul.f32 1.0614054, %v5869_v31  ;;  %v5871_v48 = vpop.eup %5870 }
0x2d55   :  { %v5873_v59 = vpop.eup %5872 }
0x2d56   :  { %v4729_v47 = vadd.f32 1.4214138, %v4727_v44  ;;  %v4967_v51 = vadd.f32 -1.4531521, %v4724_v26 }
0x2d58   :  { %v4731_v14 = vmul.f32 %v5867_v39, %v4729_v47  ;;  %v4728_v52 = vmul.f32 %v5869_v31, %v4967_v51 }
0x2d5a   :  { %v4968_v53 = vadd.f32 -0.28449672, %v4731_v14  ;;  %v4730_v54 = vadd.f32 1.4214138, %v4728_v52 }
0x2d5c   :  { %v4735_v55 = vmul.f32 %v5867_v39, %v4968_v53  ;;  %v4732_v56 = vmul.f32 %v5869_v31, %v4730_v54 }
0x2d5e   :  { %v4737_v0 = vadd.f32 0.2548296, %v4735_v55  ;;  %v4969_v57 = vadd.f32 -0.28449672, %v4732_v56 }
0x2d60   :  { %v4739_v43 = vmul.f32 %v5867_v39, %v4737_v0  ;;  %v4736_v41 = vmul.f32 %v5869_v31, %v4969_v57 }
0x2d62   :  { %v4749_v58 = vmul.f32 %v5871_v48, %v4739_v43  ;;  %v4738_v50 = vadd.f32 0.2548296, %v4736_v41 }
0x2d64   :  { %v4751_v60 = vsub.f32 1.0, %v4749_v58  ;;  %v4740_v61 = vmul.f32 %v5869_v31, %v4738_v50 }
0x2d66   :  { %v4755_v15 = vsub.f32 0.0, %v4751_v60  ;;  %v4750_v62 = vmul.f32 %v5873_v59, %v4740_v61 }
0x2d68   :  { %v4757_v49 = vsel %vm4753_vm1, %v4755_v15, %v4751_v60  ;;  %v4752_v11 = vsub.f32 1.0, %v4750_v62 }
0x2d69   :  { %v4759_v2 = vadd.f32 1.0, %v4757_v49 }
0x2d6a   :  { %v4756_v1 = vsub.f32 0.0, %v4752_v11 }
0x2d6b   :  { %v4761_v6 = vmul.f32 %v4759_v2, %v4709_v3 }
0x2d6c   :  { %v4758_v20 = vsel %vm4754_vm2, %v4756_v1, %v4752_v11 }
0x2d6d   :  { %v4760_v4 = vadd.f32 1.0, %v4758_v20 }
0x2d6f   :  { %v4762_v5 = vmul.f32 %v4760_v4, %v4710_v22 }
0x2d71   :  { %v4771_v7 = vpack.c.bf16 %v4762_v5, %v4761_v6 }
0x2d73   :  { %5641 = vmatmul.mubr.msk.bf16.vlgmr.msra.gmra.mxu0 %vm1394_vm12, %v4771_v7 }
0x2d74   :  { %5889 = shalt.err (!%p5886_p4)
}
0x2d75   :  { %s5940_s10 = smov 128   ;;  %v4971_v10 = vld [vmem:[%s7186_s3 + $0x1f0] ss:$0 sm:$0xff]  ;;  %s5941_s21 = smov [#allocation4]  }
0x2d76   :  { %4843 = dma.vmem_to_hbm [thread:$0]  %s4838_s27, 256, %s7187_s4, [#allocation3], %s5940_s10, %s5940_s10, %s5932_s20  }
0x2d77   :  { %s4849_s22 = sshll.u32 %s5941_s21, 4  ;;  %s4850_s22 = int_to_ptr.vmem [resolvable:$true] %s4849_s22 }
0x2d78   :  { %s5898_s4 = scalar_lea.vmem %s4850_s22, 512  ;;  %p5903_p6 = scmp.lt.s32.totalorder %s4850_s22, %s4850_s22 }
0x2d79   :  { %p5899_p5 = scmp.ne.s32.totalorder %s4850_s22, %s5898_s4  ;;  %p5904_p7 = scmp.lt.s32.totalorder %s5898_s4, %s5898_s4 }
0x2d7b   :  { %p5905_p8 = por %p5904_p7, %p5903_p6 }
0x2d7d   :  { %p5906_p9 = pnand %p5905_p8, %p5899_p5 }
0x2e33   :  { %v4813_v8 = vpop.f32.mrf.mxu0 }
0x2e34   :  { %v4820_v16 = vadd.f32 %v4813_v8, %v7105_v45 }
0x2e35   :  { %v5642_v17 = vpop.f32.mrf.mxu0 }
0x2e36   :  { %v4827_v38 = vadd.f32 %v4971_v10, %v4820_v16 }
0x2e37   :  { %v4816_v18 = vpop.f32.mrf.mxu0 }
0x2e38   :  { %4830 = vst.msk [vmem:[#allocation4 + $0x10] sm:$0xff] %vm38_vm0, %v4827_v38  ;;  %v4821_v21 = vadd.f32 %v4816_v18, %v7110_v35 }
0x2e39   :  { %v5643_v23 = vpop.f32.mrf.mxu0 }
0x2e3a   :  { %v4828_v24 = vadd.f32 %v4971_v10, %v4821_v21 }
0x2e3c   :  { %4831 = vst.msk [vmem:[#allocation4 + $0x18] sm:$0xff] %vm38_vm0, %v4828_v24 }
0x2e3d   :  { %5909 = shalt.err (!%p5906_p9)
}
0x2e3e   :  { %4855 = dma.vmem_to_hbm [thread:$0]  %s4850_s22, 512, %s7188_s5, [#allocation5], %s5940_s10, %s5940_s10, %s5932_s20  }
0x2e3f   :  { %5918 = dma.done.wait [#allocation3], 256  }
0x2e40   :  { %5919 = vsyncadd [#allocation3], 4294967040 }
0x2e41   :  { %5920 = dma.done.wait [#allocation5], 512  }
0x2e42   :  { %5921 = vsyncadd [#allocation5], 4294966784 }
0x2e43   :  { %4862 = vsyncpa [#allocation3], 1 }
0x2e44   :  { %4863 = vsyncpa [#allocation5], 1 }

</bundles_post_ra>
